<compile_context>
chip_gen: v7x
topology: tpu7x:2x2x1
jax: 0.10.0
libtpu: 0.0.40
codegen_flags: <defaults>
</compile_context>

<pallas_src>
import jax
import jax.numpy as jnp
from jax.experimental import pallas as pl
from jax.experimental.pallas import tpu as pltpu


# --------------------------------------------------------------------------- #
# Pallas kernels                                                               #
# --------------------------------------------------------------------------- #
def _matmul_bias_relu_kernel(x_ref, w_ref, b_ref, o_ref):
    """o = relu(x @ w + b).  Full-K block, bf16 MXU operands, f32 epilogue."""
    y = jnp.dot(x_ref[...].astype(jnp.bfloat16), w_ref[...],
                preferred_element_type=jnp.float32)
    y = jnp.maximum(y + b_ref[...], 0.0)
    o_ref[...] = y.astype(o_ref.dtype)


def _mlp_head_kernel(x_ref, w1_ref, b1_ref, w2_ref, b2_ref, o_ref):
    """Fused fc1 (ReLU) + fc2; the (B, 512) hidden stays on-chip."""
    h = jnp.dot(x_ref[...].astype(jnp.bfloat16), w1_ref[...],
                preferred_element_type=jnp.float32)
    h = jnp.maximum(h + b1_ref[...], 0.0)
    y = jnp.dot(h.astype(jnp.bfloat16), w2_ref[...],
                preferred_element_type=jnp.float32)
    o_ref[...] = (y + b2_ref[...]).astype(o_ref.dtype)


# --------------------------------------------------------------------------- #
# Wrappers                                                                     #
# --------------------------------------------------------------------------- #
def _im2col(x_nhwc, k, s):
    B, H, W, C = x_nhwc.shape
    OH = (H - k) // s + 1
    OW = (W - k) // s + 1
    cols = []
    for ki in range(k):
        for kj in range(k):
            cols.append(x_nhwc[:, ki:ki + s * OH:s, kj:kj + s * OW:s, :])
    patches = jnp.stack(cols, axis=3)                    # (B, OH, OW, k*k, C)
    return patches.reshape(B * OH * OW, k * k * C), OH, OW


def conv2d_relu_pallas(x_nhwc, w2d, b_row, *, ksize, stride, m_tiles=1):
    """Conv+ReLU as im2col followed by a single fused Pallas matmul call.

    w2d : (ksize*ksize*Cin, Cout) bf16, rows in (ki, kj, ci) order.
    b_row: (1, Cout) f32.
    """
    B = x_nhwc.shape[0]
    patches, OH, OW = _im2col(x_nhwc, ksize, stride)     # (M, K) f32
    M, K = patches.shape
    N = w2d.shape[1]
    assert M % m_tiles == 0
    tm = M // m_tiles                                    # divides M exactly -> no padding

    y = pl.pallas_call(
        _matmul_bias_relu_kernel,
        out_shape=jax.ShapeDtypeStruct((M, N), jnp.float32),
        grid_spec=pltpu.PrefetchScalarGridSpec(
            num_scalar_prefetch=0,
            grid=(m_tiles,),
            in_specs=[
                pl.BlockSpec((tm, K), lambda i: (i, 0)),   # activation tile (full K)
                pl.BlockSpec((K, N), lambda i: (0, 0)),    # full weight, resident
                pl.BlockSpec((1, N), lambda i: (0, 0)),    # bias row
            ],
            out_specs=pl.BlockSpec((tm, N), lambda i: (i, 0)),
        ),
        compiler_params=pltpu.CompilerParams(
            dimension_semantics=("parallel",)
        ),
    )(patches, w2d, b_row)
    return y.reshape(B, OH, OW, N)


def mlp_head_pallas(x, w1, b1, w2, b2):
    """Fused fc1(ReLU)+fc2 in one pallas_call.  x:(B,3136), w1:(3136,512), w2:(512,2)."""
    M, K1 = x.shape
    H = w1.shape[1]
    N = w2.shape[1]
    return pl.pallas_call(
        _mlp_head_kernel,
        out_shape=jax.ShapeDtypeStruct((M, N), jnp.float32),
        grid_spec=pltpu.PrefetchScalarGridSpec(
            num_scalar_prefetch=0,
            grid=(1,),
            in_specs=[
                pl.BlockSpec((M, K1), lambda i: (0, 0)),
                pl.BlockSpec((K1, H), lambda i: (0, 0)),
                pl.BlockSpec((1, H), lambda i: (0, 0)),
                pl.BlockSpec((H, N), lambda i: (0, 0)),
                pl.BlockSpec((1, N), lambda i: (0, 0)),
            ],
            out_specs=pl.BlockSpec((M, N), lambda i: (0, 0)),
        ),
        compiler_params=pltpu.CompilerParams(
            dimension_semantics=("arbitrary",)
        ),
    )(x, w1, b1, w2, b2)


# --------------------------------------------------------------------------- #
# One-time parameter preparation (layout + bf16 cast folded into the weights). #
# --------------------------------------------------------------------------- #
def prepare_params(params):
    def conv_prep(w_oihw, b):
        Cout, Cin, KH, KW = w_oihw.shape
        # (Cout,Cin,KH,KW) -> (KH,KW,Cin,Cout) -> (KH*KW*Cin, Cout), matching im2col
        w2d = jnp.transpose(w_oihw, (2, 3, 1, 0)).reshape(KH * KW * Cin, Cout)
        return w2d.astype(jnp.bfloat16), b.reshape(1, Cout).astype(jnp.float32)

    prep = {
        "conv1": conv_prep(*params["conv1"]),
        "conv2": conv_prep(*params["conv2"]),
        "conv3": conv_prep(*params["conv3"]),
    }

    # fc1: torch flattens NCHW, i.e. features in (C,H,W)=(64,7,7) order.  Our conv3
    # output flattens NHWC, i.e. (H,W,C) order.  Permute the weight columns ONCE so
    # no activation transpose is needed at runtime.
    wf1, bf1 = params["fc1"]                       # (512, 3136), (512,)
    w1 = wf1.reshape(512, 64, 7, 7)                # (out, C, H, W)
    w1 = jnp.transpose(w1, (2, 3, 1, 0)).reshape(64 * 7 * 7, 512)   # (H,W,C) rows
    wf2, bf2 = params["fc2"]                       # (2, 512), (2,)
    prep["fc1"] = (w1.astype(jnp.bfloat16), bf1.reshape(1, -1).astype(jnp.float32))
    prep["fc2"] = (wf2.T.astype(jnp.bfloat16), bf2.reshape(1, -1).astype(jnp.float32))
    return jax.tree_util.tree_map(jax.device_put, prep)


# --------------------------------------------------------------------------- #
# Forward pass (conv1 -> conv2 -> conv3 -> fused fc1+fc2).                     #
# --------------------------------------------------------------------------- #
def deep_q_forward(prep, x_nchw):
    x = jnp.transpose(x_nchw, (0, 2, 3, 1))                       # NCHW -> NHWC
    x = conv2d_relu_pallas(x, *prep["conv1"], ksize=8, stride=4, m_tiles=2)  # (B,20,20,32)
    x = conv2d_relu_pallas(x, *prep["conv2"], ksize=4, stride=2, m_tiles=1)  # (B,9,9,64)
    x = conv2d_relu_pallas(x, *prep["conv3"], ksize=3, stride=1, m_tiles=1)  # (B,7,7,64)
    B = x.shape[0]
    feats = x.reshape(B, -1)            # (B, 3136) in (H,W,C) order; weight pre-permuted
    return mlp_head_pallas(feats, *prep["fc1"], *prep["fc2"])     # (B, 2)


# --------------------------------------------------------------------------- #
# Deterministic parameter init (PyTorch-default-style uniform fan-in bounds).  #
# --------------------------------------------------------------------------- #
def init_params(key):
    def conv_p(k, cout, cin, ks):
        fan_in = cin * ks * ks
        bound = 1.0 / float(fan_in) ** 0.5
        k1, k2 = jax.random.split(k)
        w = jax.random.uniform(k1, (cout, cin, ks, ks), jnp.float32, -bound, bound)
        b = jax.random.uniform(k2, (cout,), jnp.float32, -bound, bound)
        return w, b

    def lin_p(k, cout, cin):
        bound = 1.0 / float(cin) ** 0.5
        k1, k2 = jax.random.split(k)
        w = jax.random.uniform(k1, (cout, cin), jnp.float32, -bound, bound)
        b = jax.random.uniform(k2, (cout,), jnp.float32, -bound, bound)
        return w, b

    ks = jax.random.split(key, 5)
    return {
        "conv1": conv_p(ks[0], 32, 4, 8),
        "conv2": conv_p(ks[1], 64, 32, 4),
        "conv3": conv_p(ks[2], 64, 64, 3),
        "fc1": lin_p(ks[3], 512, 3136),
        "fc2": lin_p(ks[4], 2, 512),
    }


# --------------------------------------------------------------------------- #
# Pure-JAX f32 reference for correctness checking.                             #
# --------------------------------------------------------------------------- #
def reference_forward(params, x_nchw):
    def conv(x, w, b, s):
        y = jax.lax.conv_general_dilated(
            x, w, (s, s), "VALID", dimension_numbers=("NCHW", "OIHW", "NCHW")
        )
        return jax.nn.relu(y + b[None, :, None, None])

    x = conv(x_nchw, *params["conv1"], 4)
    x = conv(x, *params["conv2"], 2)
    x = conv(x, *params["conv3"], 1)
    x = x.reshape(x.shape[0], -1)
    wf1, bf1 = params["fc1"]
    wf2, bf2 = params["fc2"]
    x = jax.nn.relu(x @ wf1.T + bf1)
    return x @ wf2.T + bf2


if __name__ == "__main__":
    key = jax.random.PRNGKey(0)
    pkey, xkey = jax.random.split(key)
    params = init_params(pkey)
    prep = prepare_params(params)          # one-time layout/bf16 prep, outside jit

    # fc1 expects 3136 = 64*7*7 features, which pins the spatial size to 84x84.
    x = jax.random.normal(xkey, (2, 4, 84, 84), jnp.float32)

    fwd = jax.jit(deep_q_forward)
    out = jax.block_until_ready(fwd(prep, x))
    assert out.shape == (2, 2)

    ref = reference_forward(params, x)
    max_err = float(jnp.max(jnp.abs(out - ref)))
    if max_err > 1e-2:
        raise AssertionError(f"Pallas/reference mismatch, max abs err = {max_err}")

    print("KERNEL_OK")
</pallas_src>

<mosaic_0001>
module attributes {stable_mosaic.version = 11 : i64} {
  func.func @_matmul_bias_relu_kernel(%arg0: i32, %arg1: memref<400x256xf32, #tpu.memory_space<vmem>>, %arg2: memref<256x32xbf16, #tpu.memory_space<vmem>>, %arg3: memref<1x32xf32, #tpu.memory_space<vmem>>, %arg4: memref<400x32xf32, #tpu.memory_space<vmem>>) attributes {dimension_semantics = [#tpu.dimension_semantics<parallel>], iteration_bounds = array<i64: 2>, scalar_prefetch = 0 : i64, scratch_operands = 0 : i64, tpu.core_type = #tpu.core_type<tc>, window_params = [{transform_indices = @transform_0, window_bounds = array<i64: 400, 256>}, {pipeline_mode = #tpu.pipeline_mode<synchronous>, transform_indices = @transform_1, window_bounds = array<i64: 256, 32>}, {pipeline_mode = #tpu.pipeline_mode<synchronous>, transform_indices = @transform_2, window_bounds = array<i64: 1, 32>}, {transform_indices = @transform_3, window_bounds = array<i64: 400, 32>}]} {
    %c0 = arith.constant 0 : index
    %c0_0 = arith.constant 0 : index
    %0 = vector.load %arg1[%c0, %c0_0] : memref<400x256xf32, #tpu.memory_space<vmem>>, vector<400x256xf32>
    %1 = arith.truncf %0 : vector<400x256xf32> to vector<400x256xbf16>
    %c0_1 = arith.constant 0 : index
    %c0_2 = arith.constant 0 : index
    %2 = vector.load %arg2[%c0_1, %c0_2] : memref<256x32xbf16, #tpu.memory_space<vmem>>, vector<256x32xbf16>
    %cst = arith.constant dense<0.000000e+00> : vector<400x32xf32>
    %3 = tpu.matmul %1, %2, %cst {dimension_numbers = #tpu.dot_dimension_numbers<[1], [0], [0], [1], [0, 0, 1, 1], [], []>} : vector<400x256xbf16>, vector<256x32xbf16>, vector<400x32xf32> -> vector<400x32xf32>
    %c0_3 = arith.constant 0 : index
    %c0_4 = arith.constant 0 : index
    %4 = vector.load %arg3[%c0_3, %c0_4] : memref<1x32xf32, #tpu.memory_space<vmem>>, vector<1x32xf32>
    %5 = vector.broadcast %4 : vector<1x32xf32> to vector<400x32xf32>
    %6 = arith.addf %3, %5 : vector<400x32xf32>
    %cst_5 = arith.constant 0.000000e+00 : f32
    %7 = vector.broadcast %cst_5 : f32 to vector<400x32xf32>
    %8 = arith.maximumf %6, %7 : vector<400x32xf32>
    %c0_6 = arith.constant 0 : index
    %c0_7 = arith.constant 0 : index
    %9 = vector.load %arg4[%c0_6, %c0_7] : memref<400x32xf32, #tpu.memory_space<vmem>>, vector<400x32xf32>
    tpu.vector_store %arg4[%c0_6, %c0_7], %8 {strides = array<i32>} : memref<400x32xf32, #tpu.memory_space<vmem>>, vector<400x32xf32>,
    return
  }
  func.func @transform_0(%arg0: i32) -> (i32, i32) {
    %c0_i32 = arith.constant 0 : i32
    %c0_i32_0 = arith.constant 0 : i32
    return %arg0, %c0_i32 : i32, i32
  }
  func.func @transform_1(%arg0: i32) -> (i32, i32) {
    %c0_i32 = arith.constant 0 : i32
    %c0_i32_0 = arith.constant 0 : i32
    %c0_i32_1 = arith.constant 0 : i32
    return %c0_i32, %c0_i32_0 : i32, i32
  }
  func.func @transform_2(%arg0: i32) -> (i32, i32) {
    %c0_i32 = arith.constant 0 : i32
    %c0_i32_0 = arith.constant 0 : i32
    %c0_i32_1 = arith.constant 0 : i32
    return %c0_i32, %c0_i32_0 : i32, i32
  }
  func.func @transform_3(%arg0: i32) -> (i32, i32) {
    %c0_i32 = arith.constant 0 : i32
    %c0_i32_0 = arith.constant 0 : i32
    return %arg0, %c0_i32 : i32, i32
  }
}

module attributes {stable_mosaic.version = 11 : i64} {
  func.func @_matmul_bias_relu_kernel(%arg0: i32, %arg1: memref<162x512xf32, #tpu.memory_space<vmem>>, %arg2: memref<512x64xbf16, #tpu.memory_space<vmem>>, %arg3: memref<1x64xf32, #tpu.memory_space<vmem>>, %arg4: memref<162x64xf32, #tpu.memory_space<vmem>>) attributes {dimension_semantics = [#tpu.dimension_semantics<parallel>], iteration_bounds = array<i64: 1>, scalar_prefetch = 0 : i64, scratch_operands = 0 : i64, tpu.core_type = #tpu.core_type<tc>, window_params = [{transform_indices = @transform_0, window_bounds = array<i64: 162, 512>}, {pipeline_mode = #tpu.pipeline_mode<synchronous>, transform_indices = @transform_1, window_bounds = array<i64: 512, 64>}, {pipeline_mode = #tpu.pipeline_mode<synchronous>, transform_indices = @transform_2, window_bounds = array<i64: 1, 64>}, {transform_indices = @transform_3, window_bounds = array<i64: 162, 64>}]} {
    %c0 = arith.constant 0 : index
    %c0_0 = arith.constant 0 : index
    %0 = vector.load %arg1[%c0, %c0_0] : memref<162x512xf32, #tpu.memory_space<vmem>>, vector<162x512xf32>
    %1 = arith.truncf %0 : vector<162x512xf32> to vector<162x512xbf16>
    %c0_1 = arith.constant 0 : index
    %c0_2 = arith.constant 0 : index
    %2 = vector.load %arg2[%c0_1, %c0_2] : memref<512x64xbf16, #tpu.memory_space<vmem>>, vector<512x64xbf16>
    %cst = arith.constant dense<0.000000e+00> : vector<162x64xf32>
    %3 = tpu.matmul %1, %2, %cst {dimension_numbers = #tpu.dot_dimension_numbers<[1], [0], [0], [1], [0, 0, 1, 1], [], []>} : vector<162x512xbf16>, vector<512x64xbf16>, vector<162x64xf32> -> vector<162x64xf32>
    %c0_3 = arith.constant 0 : index
    %c0_4 = arith.constant 0 : index
    %4 = vector.load %arg3[%c0_3, %c0_4] : memref<1x64xf32, #tpu.memory_space<vmem>>, vector<1x64xf32>
    %5 = vector.broadcast %4 : vector<1x64xf32> to vector<162x64xf32>
    %6 = arith.addf %3, %5 : vector<162x64xf32>
    %cst_5 = arith.constant 0.000000e+00 : f32
    %7 = vector.broadcast %cst_5 : f32 to vector<162x64xf32>
    %8 = arith.maximumf %6, %7 : vector<162x64xf32>
    %c0_6 = arith.constant 0 : index
    %c0_7 = arith.constant 0 : index
    %9 = vector.load %arg4[%c0_6, %c0_7] : memref<162x64xf32, #tpu.memory_space<vmem>>, vector<162x64xf32>
    tpu.vector_store %arg4[%c0_6, %c0_7], %8 {strides = array<i32>} : memref<162x64xf32, #tpu.memory_space<vmem>>, vector<162x64xf32>,
    return
  }
  func.func @transform_0(%arg0: i32) -> (i32, i32) {
    %c0_i32 = arith.constant 0 : i32
    %c0_i32_0 = arith.constant 0 : i32
    return %arg0, %c0_i32 : i32, i32
  }
  func.func @transform_1(%arg0: i32) -> (i32, i32) {
    %c0_i32 = arith.constant 0 : i32
    %c0_i32_0 = arith.constant 0 : i32
    %c0_i32_1 = arith.constant 0 : i32
    return %c0_i32, %c0_i32_0 : i32, i32
  }
  func.func @transform_2(%arg0: i32) -> (i32, i32) {
    %c0_i32 = arith.constant 0 : i32
    %c0_i32_0 = arith.constant 0 : i32
    %c0_i32_1 = arith.constant 0 : i32
    return %c0_i32, %c0_i32_0 : i32, i32
  }
  func.func @transform_3(%arg0: i32) -> (i32, i32) {
    %c0_i32 = arith.constant 0 : i32
    %c0_i32_0 = arith.constant 0 : i32
    return %arg0, %c0_i32 : i32, i32
  }
}

module attributes {stable_mosaic.version = 11 : i64} {
  func.func @_matmul_bias_relu_kernel(%arg0: i32, %arg1: memref<98x576xf32, #tpu.memory_space<vmem>>, %arg2: memref<576x64xbf16, #tpu.memory_space<vmem>>, %arg3: memref<1x64xf32, #tpu.memory_space<vmem>>, %arg4: memref<98x64xf32, #tpu.memory_space<vmem>>) attributes {dimension_semantics = [#tpu.dimension_semantics<parallel>], iteration_bounds = array<i64: 1>, scalar_prefetch = 0 : i64, scratch_operands = 0 : i64, tpu.core_type = #tpu.core_type<tc>, window_params = [{transform_indices = @transform_0, window_bounds = array<i64: 98, 576>}, {pipeline_mode = #tpu.pipeline_mode<synchronous>, transform_indices = @transform_1, window_bounds = array<i64: 576, 64>}, {pipeline_mode = #tpu.pipeline_mode<synchronous>, transform_indices = @transform_2, window_bounds = array<i64: 1, 64>}, {transform_indices = @transform_3, window_bounds = array<i64: 98, 64>}]} {
    %c0 = arith.constant 0 : index
    %c0_0 = arith.constant 0 : index
    %0 = vector.load %arg1[%c0, %c0_0] : memref<98x576xf32, #tpu.memory_space<vmem>>, vector<98x576xf32>
    %1 = arith.truncf %0 : vector<98x576xf32> to vector<98x576xbf16>
    %c0_1 = arith.constant 0 : index
    %c0_2 = arith.constant 0 : index
    %2 = vector.load %arg2[%c0_1, %c0_2] : memref<576x64xbf16, #tpu.memory_space<vmem>>, vector<576x64xbf16>
    %cst = arith.constant dense<0.000000e+00> : vector<98x64xf32>
    %3 = tpu.matmul %1, %2, %cst {dimension_numbers = #tpu.dot_dimension_numbers<[1], [0], [0], [1], [0, 0, 1, 1], [], []>} : vector<98x576xbf16>, vector<576x64xbf16>, vector<98x64xf32> -> vector<98x64xf32>
    %c0_3 = arith.constant 0 : index
    %c0_4 = arith.constant 0 : index
    %4 = vector.load %arg3[%c0_3, %c0_4] : memref<1x64xf32, #tpu.memory_space<vmem>>, vector<1x64xf32>
    %5 = vector.broadcast %4 : vector<1x64xf32> to vector<98x64xf32>
    %6 = arith.addf %3, %5 : vector<98x64xf32>
    %cst_5 = arith.constant 0.000000e+00 : f32
    %7 = vector.broadcast %cst_5 : f32 to vector<98x64xf32>
    %8 = arith.maximumf %6, %7 : vector<98x64xf32>
    %c0_6 = arith.constant 0 : index
    %c0_7 = arith.constant 0 : index
    %9 = vector.load %arg4[%c0_6, %c0_7] : memref<98x64xf32, #tpu.memory_space<vmem>>, vector<98x64xf32>
    tpu.vector_store %arg4[%c0_6, %c0_7], %8 {strides = array<i32>} : memref<98x64xf32, #tpu.memory_space<vmem>>, vector<98x64xf32>,
    return
  }
  func.func @transform_0(%arg0: i32) -> (i32, i32) {
    %c0_i32 = arith.constant 0 : i32
    %c0_i32_0 = arith.constant 0 : i32
    return %arg0, %c0_i32 : i32, i32
  }
  func.func @transform_1(%arg0: i32) -> (i32, i32) {
    %c0_i32 = arith.constant 0 : i32
    %c0_i32_0 = arith.constant 0 : i32
    %c0_i32_1 = arith.constant 0 : i32
    return %c0_i32, %c0_i32_0 : i32, i32
  }
  func.func @transform_2(%arg0: i32) -> (i32, i32) {
    %c0_i32 = arith.constant 0 : i32
    %c0_i32_0 = arith.constant 0 : i32
    %c0_i32_1 = arith.constant 0 : i32
    return %c0_i32, %c0_i32_0 : i32, i32
  }
  func.func @transform_3(%arg0: i32) -> (i32, i32) {
    %c0_i32 = arith.constant 0 : i32
    %c0_i32_0 = arith.constant 0 : i32
    return %arg0, %c0_i32 : i32, i32
  }
}

module attributes {stable_mosaic.version = 11 : i64} {
  func.func @_mlp_head_kernel(%arg0: i32, %arg1: memref<2x3136xf32, #tpu.memory_space<vmem>>, %arg2: memref<3136x512xbf16, #tpu.memory_space<vmem>>, %arg3: memref<1x512xf32, #tpu.memory_space<vmem>>, %arg4: memref<512x2xbf16, #tpu.memory_space<vmem>>, %arg5: memref<1x2xf32, #tpu.memory_space<vmem>>, %arg6: memref<2x2xf32, #tpu.memory_space<vmem>>) attributes {dimension_semantics = [#tpu.dimension_semantics<arbitrary>], iteration_bounds = array<i64: 1>, scalar_prefetch = 0 : i64, scratch_operands = 0 : i64, tpu.core_type = #tpu.core_type<tc>, window_params = [{pipeline_mode = #tpu.pipeline_mode<synchronous>, transform_indices = @transform_0, window_bounds = array<i64: 2, 3136>}, {pipeline_mode = #tpu.pipeline_mode<synchronous>, transform_indices = @transform_1, window_bounds = array<i64: 3136, 512>}, {pipeline_mode = #tpu.pipeline_mode<synchronous>, transform_indices = @transform_2, window_bounds = array<i64: 1, 512>}, {pipeline_mode = #tpu.pipeline_mode<synchronous>, transform_indices = @transform_3, window_bounds = array<i64: 512, 2>}, {pipeline_mode = #tpu.pipeline_mode<synchronous>, transform_indices = @transform_4, window_bounds = array<i64: 1, 2>}, {pipeline_mode = #tpu.pipeline_mode<synchronous>, transform_indices = @transform_5, window_bounds = array<i64: 2, 2>}]} {
    %c0 = arith.constant 0 : index
    %c0_0 = arith.constant 0 : index
    %0 = vector.load %arg1[%c0, %c0_0] : memref<2x3136xf32, #tpu.memory_space<vmem>>, vector<2x3136xf32>
    %1 = arith.truncf %0 : vector<2x3136xf32> to vector<2x3136xbf16>
    %c0_1 = arith.constant 0 : index
    %c0_2 = arith.constant 0 : index
    %2 = vector.load %arg2[%c0_1, %c0_2] : memref<3136x512xbf16, #tpu.memory_space<vmem>>, vector<3136x512xbf16>
    %cst = arith.constant dense<0.000000e+00> : vector<2x512xf32>
    %3 = tpu.matmul %1, %2, %cst {dimension_numbers = #tpu.dot_dimension_numbers<[1], [0], [0], [1], [0, 0, 1, 1], [], []>} : vector<2x3136xbf16>, vector<3136x512xbf16>, vector<2x512xf32> -> vector<2x512xf32>
    %c0_3 = arith.constant 0 : index
    %c0_4 = arith.constant 0 : index
    %4 = vector.load %arg3[%c0_3, %c0_4] : memref<1x512xf32, #tpu.memory_space<vmem>>, vector<1x512xf32>
    %5 = vector.broadcast %4 : vector<1x512xf32> to vector<2x512xf32>
    %6 = arith.addf %3, %5 : vector<2x512xf32>
    %cst_5 = arith.constant 0.000000e+00 : f32
    %7 = vector.broadcast %cst_5 : f32 to vector<2x512xf32>
    %8 = arith.maximumf %6, %7 : vector<2x512xf32>
    %9 = arith.truncf %8 : vector<2x512xf32> to vector<2x512xbf16>
    %c0_6 = arith.constant 0 : index
    %c0_7 = arith.constant 0 : index
    %10 = vector.load %arg4[%c0_6, %c0_7] : memref<512x2xbf16, #tpu.memory_space<vmem>>, vector<512x2xbf16>
    %cst_8 = arith.constant dense<0.000000e+00> : vector<2x2xf32>
    %11 = tpu.matmul %9, %10, %cst_8 {dimension_numbers = #tpu.dot_dimension_numbers<[1], [0], [0], [1], [0, 0, 1, 1], [], []>} : vector<2x512xbf16>, vector<512x2xbf16>, vector<2x2xf32> -> vector<2x2xf32>
    %c0_9 = arith.constant 0 : index
    %c0_10 = arith.constant 0 : index
    %12 = vector.load %arg5[%c0_9, %c0_10] : memref<1x2xf32, #tpu.memory_space<vmem>>, vector<1x2xf32>
    %13 = vector.broadcast %12 : vector<1x2xf32> to vector<2x2xf32>
    %14 = arith.addf %11, %13 : vector<2x2xf32>
    %c0_11 = arith.constant 0 : index
    %c0_12 = arith.constant 0 : index
    %15 = vector.load %arg6[%c0_11, %c0_12] : memref<2x2xf32, #tpu.memory_space<vmem>>, vector<2x2xf32>
    tpu.vector_store %arg6[%c0_11, %c0_12], %14 {strides = array<i32>} : memref<2x2xf32, #tpu.memory_space<vmem>>, vector<2x2xf32>,
    return
  }
  func.func @transform_0(%arg0: i32) -> (i32, i32) {
    %c0_i32 = arith.constant 0 : i32
    %c0_i32_0 = arith.constant 0 : i32
    %c0_i32_1 = arith.constant 0 : i32
    return %c0_i32, %c0_i32_0 : i32, i32
  }
  func.func @transform_1(%arg0: i32) -> (i32, i32) {
    %c0_i32 = arith.constant 0 : i32
    %c0_i32_0 = arith.constant 0 : i32
    %c0_i32_1 = arith.constant 0 : i32
    return %c0_i32, %c0_i32_0 : i32, i32
  }
  func.func @transform_2(%arg0: i32) -> (i32, i32) {
    %c0_i32 = arith.constant 0 : i32
    %c0_i32_0 = arith.constant 0 : i32
    %c0_i32_1 = arith.constant 0 : i32
    return %c0_i32, %c0_i32_0 : i32, i32
  }
  func.func @transform_3(%arg0: i32) -> (i32, i32) {
    %c0_i32 = arith.constant 0 : i32
    %c0_i32_0 = arith.constant 0 : i32
    %c0_i32_1 = arith.constant 0 : i32
    return %c0_i32, %c0_i32_0 : i32, i32
  }
  func.func @transform_4(%arg0: i32) -> (i32, i32) {
    %c0_i32 = arith.constant 0 : i32
    %c0_i32_0 = arith.constant 0 : i32
    %c0_i32_1 = arith.constant 0 : i32
    return %c0_i32, %c0_i32_0 : i32, i32
  }
  func.func @transform_5(%arg0: i32) -> (i32, i32) {
    %c0_i32 = arith.constant 0 : i32
    %c0_i32_0 = arith.constant 0 : i32
    %c0_i32_1 = arith.constant 0 : i32
    return %c0_i32, %c0_i32_0 : i32, i32
  }
}

</mosaic_0001>

<bundles_post_ra>
// kernel: deep_q_forward.4
= control target key start
LH: loop header
LB: loop body
LE: loop exit
PB: predicated region body
PF: predicated region fallthrough
CT: control target
= control target key end

     0   :  { %s967_s12 = smov 0   ;;  %s1327_s0 = inlined_call_operand.vmem [shape: f32[800,256], index: 0, kind: input, shape index: {}]   ;;  %s1328_s1 = inlined_call_operand.vmem [shape: bf16[256,32], index: 1, kind: input, shape index: {}]   ;;  %s1329_s2 = inlined_call_operand.vmem [shape: f32[1,32], index: 2, kind: input, shape index: {}]   ;;  %s1330_s3 = inlined_call_operand.vmem [shape: f32[800,32], index: 3, kind: output, shape index: {}]  }
   0x1 LB: > { %s853_s13 = sadd.s32 4294967295, %s944_s12   ;;  %p857_p0 = scmp.ge.s32.totalorder %s944_s12, 1  ;;  %s944_s12 = sphi %s967_s12, %s13_s12  }
   0x2   : > { %p139_p1 = scmp.lt.s32.totalorder %s944_s12, 3 }
   0x4   : > { %p140_p2 = pnand %p857_p0, %p139_p1 }
   0x5   : > { %v922_v0 = vld [vmem:[%s1328_s1] sm:$0xff] (!%p140_p2)   ;;  %v946_v1 = vmov (!%p140_p2), 0   ;;  %s164_s16 = smul.u32 (!%p140_p2), 50, %s853_s13  ;;  %v923_v2 = vld [vmem:[%s1328_s1 + $0x8] sm:$0xff] (!%p140_p2)   ;;  %v924_v3 = vld [vmem:[%s1328_s1 + $0x10] sm:$0xff] (!%p140_p2)   ;;  %vm746_vm0 = vcmask (!%p140_p2), 261120  }
   0x6   : > { %143 = sbr.rel (%p140_p2) target bundleno = 385 (0x181), region = 32  ;;  %463 = vmatprep.subr.bf16.mxu0 (!%p140_p2), %v946_v1  ;;  %881 = vmatprep.subr.bf16.mxu1 (!%p140_p2), %v946_v1  ;;  %v925_v4 = vld [vmem:[%s1328_s1 + $0x18] sm:$0xff] (!%p140_p2)   ;;  %v926_v5 = vld [vmem:[%s1328_s1 + $0x20] sm:$0xff] (!%p140_p2)   ;;  %v927_v11 = vld [vmem:[%s1328_s1 + $0x28] sm:$0xff] (!%p140_p2)  }
   0x7   : > { %464 = vmatpush1.bf16.msra.mxu0 (!%p140_p2), %v922_v0  ;;  %897 = vmatpush1.bf16.msra.mxu1 (!%p140_p2), %v922_v0  ;;  %p165_p3 = scmp.lt.s32.totalorder (!%p140_p2), %s164_s16, 99  ;;  %v928_v13 = vld [vmem:[%s1328_s1 + $0x30] sm:$0xff] (!%p140_p2)   ;;  %v929_v14 = vld [vmem:[%s1328_s1 + $0x38] sm:$0xff] (!%p140_p2)   ;;  %v930_v15 = vld [vmem:[%s1328_s1 + $0x40] sm:$0xff] (!%p140_p2)  }
   0x8   : > { %465 = vmatprep.subr.bf16.mxu0 (!%p140_p2), %v946_v1  ;;  %882 = vmatprep.subr.bf16.mxu1 (!%p140_p2), %v946_v1  ;;  %v931_v16 = vld [vmem:[%s1328_s1 + $0x48] sm:$0xff] (!%p140_p2)   ;;  %v932_v17 = vld [vmem:[%s1328_s1 + $0x50] sm:$0xff] (!%p140_p2)   ;;  %v933_v18 = vld [vmem:[%s1328_s1 + $0x58] sm:$0xff] (!%p140_p2)  }
   0x9   : > { %v934_v19 = vld [vmem:[%s1328_s1 + $0x60] sm:$0xff] (!%p140_p2)   ;;  %v935_v20 = vld [vmem:[%s1328_s1 + $0x68] sm:$0xff] (!%p140_p2)   ;;  %v936_v21 = vld [vmem:[%s1328_s1 + $0x70] sm:$0xff] (!%p140_p2)  }
   0xa   : > { %v937_v22 = vld [vmem:[%s1328_s1 + $0x78] sm:$0xff] (!%p140_p2)  }
   0xb   : > { %466 = vmatpush1.bf16.msra.mxu0 (!%p140_p2), %v923_v2  ;;  %898 = vmatpush1.bf16.msra.mxu1 (!%p140_p2), %v923_v2 }
   0xc   : > { %467 = vmatprep.subr.bf16.mxu0 (!%p140_p2), %v946_v1  ;;  %883 = vmatprep.subr.bf16.mxu1 (!%p140_p2), %v946_v1 }
   0xd   : > { %s1332_s16 = smov (!%p165_p3, %s164_s16), 99 }
   0xe   : > { %s880_s23 = sshll.u32 %s1332_s16, 4  ;;  %s860_s29 = sshll.u32 %s1332_s16, 3 }
   0xf   : > { %468 = vmatpush1.bf16.msra.mxu0 %v924_v3  ;;  %899 = vmatpush1.bf16.msra.mxu1 %v924_v3  ;;  %s1001_s26 = scalar_lea.vmem %s1327_s0, %s880_s23 }
  0x10   : > { %469 = vmatprep.subr.bf16.mxu0 %v946_v1  ;;  %884 = vmatprep.subr.bf16.mxu1 %v946_v1  ;;  %v179_v6 = vld [vmem:[%s1001_s26 + $0x8] sm:$0xff]  ;;  %v181_v7 = vld [vmem:[%s1001_s26 + $0x18] sm:$0xff]  ;;  %v178_v23 = vld [vmem:[%s1001_s26] sm:$0xff] }
  0x11   : > { %v279_v8 = vpack.c.bf16 %v181_v7, %v179_v6  ;;  %v231_v9 = vld [vmem:[%s1001_s26 + $0x1a8] sm:$0xff]  ;;  %v233_v10 = vld [vmem:[%s1001_s26 + $0x1b8] sm:$0xff]  ;;  %v180_v24 = vld [vmem:[%s1001_s26 + $0x10] sm:$0xff] }
  0x12   : > { %v305_v12 = vpack.c.bf16 %v233_v10, %v231_v9  ;;  %v230_v25 = vld [vmem:[%s1001_s26 + $0x1a0] sm:$0xff]  ;;  %v232_v26 = vld [vmem:[%s1001_s26 + $0x1b0] sm:$0xff]  ;;  %v183_v27 = vld [vmem:[%s1001_s26 + $0x28] sm:$0xff]  ;;  %v278_v31 = vpack.c.bf16 %v180_v24, %v178_v23 }
  0x13   : > { %470 = vmatpush1.bf16.msra.mxu0 %v925_v4  ;;  %900 = vmatpush1.bf16.msra.mxu1 %v925_v4  ;;  %v185_v28 = vld [vmem:[%s1001_s26 + $0x38] sm:$0xff]  ;;  %v235_v29 = vld [vmem:[%s1001_s26 + $0x1c8] sm:$0xff]  ;;  %v304_v32 = vpack.c.bf16 %v232_v26, %v230_v25  ;;  %v182_v35 = vld [vmem:[%s1001_s26 + $0x20] sm:$0xff] }
  0x14   : > { %471 = vmatprep.subr.bf16.mxu0 %v946_v1  ;;  %885 = vmatprep.subr.bf16.mxu1 %v946_v1  ;;  %v237_v30 = vld [vmem:[%s1001_s26 + $0x1d8] sm:$0xff]  ;;  %v281_v33 = vpack.c.bf16 %v185_v28, %v183_v27  ;;  %v184_v36 = vld [vmem:[%s1001_s26 + $0x30] sm:$0xff]  ;;  %v234_v37 = vld [vmem:[%s1001_s26 + $0x1c0] sm:$0xff] }
  0x15   : > { %495 = vmatprep.mubr.bf16.mxu0 %v279_v8  ;;  %599 = vmatprep.mubr.bf16.mxu1 %v305_v12  ;;  %v307_v34 = vpack.c.bf16 %v237_v30, %v235_v29  ;;  %v236_v38 = vld [vmem:[%s1001_s26 + $0x1d0] sm:$0xff]  ;;  %v187_v39 = vld [vmem:[%s1001_s26 + $0x48] sm:$0xff]  ;;  %v189_v40 = vld [vmem:[%s1001_s26 + $0x58] sm:$0xff]  ;;  %v280_v43 = vpack.c.bf16 %v184_v36, %v182_v35 }
  0x16   : > { %v239_v41 = vld [vmem:[%s1001_s26 + $0x1e8] sm:$0xff]  ;;  %v241_v42 = vld [vmem:[%s1001_s26 + $0x1f8] sm:$0xff]  ;;  %v306_v44 = vpack.c.bf16 %v236_v38, %v234_v37  ;;  %v283_v45 = vpack.c.bf16 %v189_v40, %v187_v39  ;;  %v186_v47 = vld [vmem:[%s1001_s26 + $0x40] sm:$0xff] }
  0x17   : > { %472 = vmatpush1.bf16.msra.mxu0 %v926_v5  ;;  %901 = vmatpush1.bf16.msra.mxu1 %v926_v5  ;;  %v309_v46 = vpack.c.bf16 %v241_v42, %v239_v41  ;;  %v188_v48 = vld [vmem:[%s1001_s26 + $0x50] sm:$0xff]  ;;  %v238_v49 = vld [vmem:[%s1001_s26 + $0x1e0] sm:$0xff]  ;;  %v191_v51 = vld [vmem:[%s1001_s26 + $0x68] sm:$0xff] }
  0x18   : > { %473 = vmatprep.subr.bf16.mxu0 %v946_v1  ;;  %886 = vmatprep.subr.bf16.mxu1 %v946_v1  ;;  %v240_v50 = vld [vmem:[%s1001_s26 + $0x1f0] sm:$0xff]  ;;  %v193_v52 = vld [vmem:[%s1001_s26 + $0x78] sm:$0xff]  ;;  %v243_v53 = vld [vmem:[%s1001_s26 + $0x208] sm:$0xff]  ;;  %v282_v55 = vpack.c.bf16 %v188_v48, %v186_v47 }
  0x19   : > { %v245_v54 = vld [vmem:[%s1001_s26 + $0x218] sm:$0xff]  ;;  %v308_v56 = vpack.c.bf16 %v240_v50, %v238_v49  ;;  %v285_v57 = vpack.c.bf16 %v193_v52, %v191_v51  ;;  %v190_v59 = vld [vmem:[%s1001_s26 + $0x60] sm:$0xff]  ;;  %v192_v60 = vld [vmem:[%s1001_s26 + $0x70] sm:$0xff] }
  0x1a   : > { %v311_v58 = vpack.c.bf16 %v245_v54, %v243_v53  ;;  %v242_v61 = vld [vmem:[%s1001_s26 + $0x200] sm:$0xff]  ;;  %v244_v62 = vld [vmem:[%s1001_s26 + $0x210] sm:$0xff]  ;;  %v195_v63 = vld [vmem:[%s1001_s26 + $0x88] sm:$0xff]  ;;  %v284_v3 = vpack.c.bf16 %v192_v60, %v190_v59 }
  0x1b   : > { %474 = vmatpush1.bf16.msra.mxu0 %v927_v11  ;;  %902 = vmatpush1.bf16.msra.mxu1 %v927_v11  ;;  %v197_v0 = vld [vmem:[%s1001_s26 + $0x98] sm:$0xff]  ;;  %v310_v4 = vpack.c.bf16 %v244_v62, %v242_v61  ;;  %v194_v7 = vld [vmem:[%s1001_s26 + $0x80] sm:$0xff]  ;;  %v196_v8 = vld [vmem:[%s1001_s26 + $0x90] sm:$0xff] }
  0x1c   : > { %475 = vmatprep.subr.bf16.mxu0 %v946_v1  ;;  %887 = vmatprep.subr.bf16.mxu1 %v946_v1  ;;  %v249_v2 = vld [vmem:[%s1001_s26 + $0x238] sm:$0xff]  ;;  %v287_v5 = vpack.c.bf16 %v197_v0, %v195_v63  ;;  %v246_v9 = vld [vmem:[%s1001_s26 + $0x220] sm:$0xff]  ;;  %v248_v10 = vld [vmem:[%s1001_s26 + $0x230] sm:$0xff] }
  0x1d   : > { %v199_v11 = vld [vmem:[%s1001_s26 + $0xa8] sm:$0xff]  ;;  %v201_v12 = vld [vmem:[%s1001_s26 + $0xb8] sm:$0xff] }
  0x1e   : > { %v203_v23 = vld [vmem:[%s1001_s26 + $0xc8] sm:$0xff]  ;;  %v205_v24 = vld [vmem:[%s1001_s26 + $0xd8] sm:$0xff] }
  0x1f   : > { %476 = vmatpush1.bf16.msra.mxu0 %v928_v13  ;;  %903 = vmatpush1.bf16.msra.mxu1 %v928_v13  ;;  %v251_v13 = vld [vmem:[%s1001_s26 + $0x248] sm:$0xff]  ;;  %v257_v26 = vld [vmem:[%s1001_s26 + $0x278] sm:$0xff]  ;;  %v291_v29 = vpack.c.bf16 %v205_v24, %v203_v23 }
  0x20   : > { %477 = vmatprep.subr.bf16.mxu0 %v946_v1  ;;  %888 = vmatprep.subr.bf16.mxu1 %v946_v1  ;;  %v255_v25 = vld [vmem:[%s1001_s26 + $0x268] sm:$0xff]  ;;  %v209_v36 = vld [vmem:[%s1001_s26 + $0xf8] sm:$0xff] }
  0x21   : > { %v317_v30 = vpack.c.bf16 %v257_v26, %v255_v25  ;;  %v207_v35 = vld [vmem:[%s1001_s26 + $0xe8] sm:$0xff]  ;;  %v261_v38 = vld [vmem:[%s1001_s26 + $0x298] sm:$0xff] }
  0x22   : > { %v259_v37 = vld [vmem:[%s1001_s26 + $0x288] sm:$0xff]  ;;  %v293_v41 = vpack.c.bf16 %v209_v36, %v207_v35  ;;  %v213_v48 = vld [vmem:[%s1001_s26 + $0x118] sm:$0xff]  ;;  %v226_v36 = vld [vmem:[%s1001_s26 + $0x180] sm:$0xff] }
  0x23   : > { %478 = vmatpush1.bf16.msra.mxu0 %v929_v14  ;;  %904 = vmatpush1.bf16.msra.mxu1 %v929_v14  ;;  %v253_v14 = vld [vmem:[%s1001_s26 + $0x258] sm:$0xff]  ;;  %v319_v42 = vpack.c.bf16 %v261_v38, %v259_v37  ;;  %v211_v47 = vld [vmem:[%s1001_s26 + $0x108] sm:$0xff]  ;;  %v228_v37 = vld [vmem:[%s1001_s26 + $0x190] sm:$0xff] }
  0x24   : > { %479 = vmatprep.subr.bf16.mxu0 %v946_v1  ;;  %889 = vmatprep.subr.bf16.mxu1 %v946_v1  ;;  %v263_v49 = vld [vmem:[%s1001_s26 + $0x2a8] sm:$0xff]  ;;  %v265_v50 = vld [vmem:[%s1001_s26 + $0x2b8] sm:$0xff]  ;;  %v295_v53 = vpack.c.bf16 %v213_v48, %v211_v47  ;;  %v302_v38 = vpack.c.bf16 %v228_v37, %v226_v36 }
  0x25   : > { %v321_v54 = vpack.c.bf16 %v265_v50, %v263_v49  ;;  %v215_v59 = vld [vmem:[%s1001_s26 + $0x128] sm:$0xff]  ;;  %v217_v60 = vld [vmem:[%s1001_s26 + $0x138] sm:$0xff] }
  0x26   : > { %v267_v61 = vld [vmem:[%s1001_s26 + $0x2c8] sm:$0xff]  ;;  %v269_v62 = vld [vmem:[%s1001_s26 + $0x2d8] sm:$0xff] }
  0x27   : > { %480 = vmatpush1.bf16.msra.mxu0 %v930_v15  ;;  %905 = vmatpush1.bf16.msra.mxu1 %v930_v15  ;;  %v286_v15 = vpack.c.bf16 %v196_v8, %v194_v7  ;;  %v219_v7 = vld [vmem:[%s1001_s26 + $0x148] sm:$0xff]  ;;  %v221_v8 = vld [vmem:[%s1001_s26 + $0x158] sm:$0xff] }
  0x28   : > { %481 = vmatprep.subr.bf16.mxu0 %v946_v1  ;;  %890 = vmatprep.subr.bf16.mxu1 %v946_v1 }
  0x2b   : > { %482 = vmatpush1.bf16.msra.mxu0 %v931_v16  ;;  %906 = vmatpush1.bf16.msra.mxu1 %v931_v16  ;;  %v312_v16 = vpack.c.bf16 %v248_v10, %v246_v9  ;;  %v271_v9 = vld [vmem:[%s1001_s26 + $0x2e8] sm:$0xff]  ;;  %v273_v10 = vld [vmem:[%s1001_s26 + $0x2f8] sm:$0xff] }
  0x2c   : > { %483 = vmatprep.subr.bf16.mxu0 %v946_v1  ;;  %891 = vmatprep.subr.bf16.mxu1 %v946_v1 }
  0x2f   : > { %484 = vmatpush1.bf16.msra.mxu0 %v932_v17  ;;  %907 = vmatpush1.bf16.msra.mxu1 %v932_v17  ;;  %v289_v17 = vpack.c.bf16 %v201_v12, %v199_v11 }
  0x30   : > { %485 = vmatprep.subr.bf16.mxu0 %v946_v1  ;;  %892 = vmatprep.subr.bf16.mxu1 %v946_v1 }
  0x33   : > { %486 = vmatpush1.bf16.msra.mxu0 %v933_v18  ;;  %908 = vmatpush1.bf16.msra.mxu1 %v933_v18  ;;  %v315_v18 = vpack.c.bf16 %v253_v14, %v251_v13  ;;  %v299_v13 = vpack.c.bf16 %v221_v8, %v219_v7  ;;  %v325_v14 = vpack.c.bf16 %v273_v10, %v271_v9 }
  0x34   : > { %487 = vmatprep.subr.bf16.mxu0 %v946_v1  ;;  %893 = vmatprep.subr.bf16.mxu1 %v946_v1 }
  0x37   : > { %488 = vmatpush1.bf16.msra.mxu0 %v934_v19  ;;  %909 = vmatpush1.bf16.msra.mxu1 %v934_v19  ;;  %v198_v19 = vld [vmem:[%s1001_s26 + $0xa0] sm:$0xff] }
  0x38   : > { %489 = vmatprep.subr.bf16.mxu0 %v946_v1  ;;  %894 = vmatprep.subr.bf16.mxu1 %v946_v1 }
  0x3b   : > { %490 = vmatpush1.bf16.msra.mxu0 %v935_v20  ;;  %910 = vmatpush1.bf16.msra.mxu1 %v935_v20  ;;  %v200_v20 = vld [vmem:[%s1001_s26 + $0xb0] sm:$0xff] }
  0x3c   : > { %491 = vmatprep.subr.bf16.mxu0 %v946_v1  ;;  %895 = vmatprep.subr.bf16.mxu1 %v946_v1  ;;  %v288_v27 = vpack.c.bf16 %v200_v20, %v198_v19  ;;  %v223_v19 = vld [vmem:[%s1001_s26 + $0x168] sm:$0xff]  ;;  %v225_v20 = vld [vmem:[%s1001_s26 + $0x178] sm:$0xff] }
  0x3d   : > { %v301_v25 = vpack.c.bf16 %v225_v20, %v223_v19 }
  0x3f   : > { %492 = vmatpush1.bf16.msra.mxu0 %v936_v21  ;;  %911 = vmatpush1.bf16.msra.mxu1 %v936_v21  ;;  %v250_v21 = vld [vmem:[%s1001_s26 + $0x240] sm:$0xff] }
  0x40   : > { %493 = vmatprep.subr.bf16.mxu0 %v946_v1  ;;  %896 = vmatprep.subr.bf16.mxu1 %v946_v1  ;;  %v247_v1 = vld [vmem:[%s1001_s26 + $0x228] sm:$0xff] }
  0x41   : > { %v313_v6 = vpack.c.bf16 %v249_v2, %v247_v1  ;;  %v297_v1 = vpack.c.bf16 %v217_v60, %v215_v59  ;;  %v323_v2 = vpack.c.bf16 %v269_v62, %v267_v61 }
  0x43   : > { %494 = vmatpush1.bf16.msra.mxu0 %v937_v22  ;;  %912 = vmatpush1.bf16.msra.mxu1 %v937_v22  ;;  %v252_v22 = vld [vmem:[%s1001_s26 + $0x250] sm:$0xff] }
  0x44   : > { %v314_v28 = vpack.c.bf16 %v252_v22, %v250_v21  ;;  %v275_v21 = vld [vmem:[%s1001_s26 + $0x308] sm:$0xff]  ;;  %v277_v22 = vld [vmem:[%s1001_s26 + $0x318] sm:$0xff] }
  0x45   : > { %v327_v26 = vpack.c.bf16 %v277_v22, %v275_v21 }
  0x46   : > { %496 = vmatmul.mubr.bf16.vlgmr.msra.gmra.mrb[0].mxu0 %v278_v31  ;;  %600 = vmatmul.mubr.bf16.vlgmr.msra.gmra.mrb[0].mxu1 %v304_v32  ;;  %v202_v31 = vld [vmem:[%s1001_s26 + $0xc0] sm:$0xff]  ;;  %v204_v32 = vld [vmem:[%s1001_s26 + $0xd0] sm:$0xff] }
  0x47   : > { %503 = vmatprep.mubr.bf16.mxu0 %v281_v33  ;;  %607 = vmatprep.mubr.bf16.mxu1 %v307_v34  ;;  %v254_v33 = vld [vmem:[%s1001_s26 + $0x260] sm:$0xff]  ;;  %v256_v34 = vld [vmem:[%s1001_s26 + $0x270] sm:$0xff]  ;;  %v290_v39 = vpack.c.bf16 %v204_v32, %v202_v31  ;;  %v227_v31 = vld [vmem:[%s1001_s26 + $0x188] sm:$0xff] }
  0x48   : > { %v316_v40 = vpack.c.bf16 %v256_v34, %v254_v33  ;;  %v229_v32 = vld [vmem:[%s1001_s26 + $0x198] sm:$0xff] }
  0x49   : > { %v303_v35 = vpack.c.bf16 %v229_v32, %v227_v31 }
  0x4e   : > { %504 = vmatmul.mubr.bf16.gmra.mrb[4].mxu0 %v280_v43  ;;  %608 = vmatmul.mubr.bf16.gmra.mrb[4].mxu1 %v306_v44  ;;  %v206_v43 = vld [vmem:[%s1001_s26 + $0xe0] sm:$0xff]  ;;  %v208_v44 = vld [vmem:[%s1001_s26 + $0xf0] sm:$0xff] }
  0x4f   : > { %511 = vmatprep.mubr.bf16.mxu0 %v283_v45  ;;  %615 = vmatprep.mubr.bf16.mxu1 %v309_v46  ;;  %v258_v45 = vld [vmem:[%s1001_s26 + $0x280] sm:$0xff]  ;;  %v260_v46 = vld [vmem:[%s1001_s26 + $0x290] sm:$0xff]  ;;  %v292_v51 = vpack.c.bf16 %v208_v44, %v206_v43 }
  0x50   : > { %v318_v52 = vpack.c.bf16 %v260_v46, %v258_v45 }
  0x56   : > { %512 = vmatmul.mubr.bf16.gmra.mrb[8].mxu0 %v282_v55  ;;  %616 = vmatmul.mubr.bf16.gmra.mrb[8].mxu1 %v308_v56  ;;  %v210_v55 = vld [vmem:[%s1001_s26 + $0x100] sm:$0xff]  ;;  %v212_v56 = vld [vmem:[%s1001_s26 + $0x110] sm:$0xff] }
  0x57   : > { %519 = vmatprep.mubr.bf16.mxu0 %v285_v57  ;;  %623 = vmatprep.mubr.bf16.mxu1 %v311_v58  ;;  %v262_v57 = vld [vmem:[%s1001_s26 + $0x2a0] sm:$0xff]  ;;  %v264_v58 = vld [vmem:[%s1001_s26 + $0x2b0] sm:$0xff]  ;;  %v294_v63 = vpack.c.bf16 %v212_v56, %v210_v55 }
  0x58   : > { %v320_v0 = vpack.c.bf16 %v264_v58, %v262_v57 }
  0x5e   : > { %520 = vmatmul.mubr.bf16.gmra.mrb[12].mxu0 %v284_v3  ;;  %624 = vmatmul.mubr.bf16.gmra.mrb[12].mxu1 %v310_v4  ;;  %v214_v3 = vld [vmem:[%s1001_s26 + $0x120] sm:$0xff]  ;;  %v216_v4 = vld [vmem:[%s1001_s26 + $0x130] sm:$0xff] }
  0x5f   : > { %527 = vmatprep.mubr.bf16.mxu0 %v287_v5  ;;  %631 = vmatprep.mubr.bf16.mxu1 %v313_v6  ;;  %v266_v5 = vld [vmem:[%s1001_s26 + $0x2c0] sm:$0xff]  ;;  %v268_v6 = vld [vmem:[%s1001_s26 + $0x2d0] sm:$0xff]  ;;  %v296_v11 = vpack.c.bf16 %v216_v4, %v214_v3 }
  0x60   : > { %v322_v12 = vpack.c.bf16 %v268_v6, %v266_v5 }
  0x66   : > { %528 = vmatmul.mubr.bf16.gmra.mrb[16].mxu0 %v286_v15  ;;  %632 = vmatmul.mubr.bf16.gmra.mrb[16].mxu1 %v312_v16  ;;  %v218_v15 = vld [vmem:[%s1001_s26 + $0x140] sm:$0xff]  ;;  %v220_v16 = vld [vmem:[%s1001_s26 + $0x150] sm:$0xff] }
  0x67   : > { %535 = vmatprep.mubr.bf16.mxu0 %v289_v17  ;;  %639 = vmatprep.mubr.bf16.mxu1 %v315_v18  ;;  %v270_v17 = vld [vmem:[%s1001_s26 + $0x2e0] sm:$0xff]  ;;  %v272_v18 = vld [vmem:[%s1001_s26 + $0x2f0] sm:$0xff]  ;;  %v298_v23 = vpack.c.bf16 %v220_v16, %v218_v15 }
  0x68   : > { %v324_v24 = vpack.c.bf16 %v272_v18, %v270_v17 }
  0x6e   : > { %536 = vmatmul.mubr.bf16.gmra.mrb[20].mxu0 %v288_v27  ;;  %640 = vmatmul.mubr.bf16.gmra.mrb[20].mxu1 %v314_v28  ;;  %v222_v27 = vld [vmem:[%s1001_s26 + $0x160] sm:$0xff]  ;;  %v224_v28 = vld [vmem:[%s1001_s26 + $0x170] sm:$0xff] }
  0x6f   : > { %543 = vmatprep.mubr.bf16.mxu0 %v291_v29  ;;  %647 = vmatprep.mubr.bf16.mxu1 %v317_v30  ;;  %v274_v29 = vld [vmem:[%s1001_s26 + $0x300] sm:$0xff]  ;;  %v276_v30 = vld [vmem:[%s1001_s26 + $0x310] sm:$0xff]  ;;  %v300_v33 = vpack.c.bf16 %v224_v28, %v222_v27  ;;  %s1174_s26 = scalar_lea.vmem %s1330_s3, %s860_s29 }
  0x70   : > { %v326_v34 = vpack.c.bf16 %v276_v30, %v274_v29 }
  0x76   : > { %544 = vmatmul.mubr.bf16.gmra.mrb[24].mxu0 %v290_v39  ;;  %648 = vmatmul.mubr.bf16.gmra.mrb[24].mxu1 %v316_v40  ;;  %v1166_v39 = vld [vmem:[%s1329_s2] ss:$0 sm:$0xff] }
  0x77   : > { %551 = vmatprep.mubr.bf16.mxu0 %v293_v41  ;;  %655 = vmatprep.mubr.bf16.mxu1 %v319_v42 }
  0x7e   : > { %552 = vmatmul.mubr.bf16.gmra.mrb[28].mxu0 %v292_v51  ;;  %656 = vmatmul.mubr.bf16.gmra.mrb[28].mxu1 %v318_v52 }
  0x7f   : > { %559 = vmatprep.mubr.bf16.mxu0 %v295_v53  ;;  %663 = vmatprep.mubr.bf16.mxu1 %v321_v54 }
  0x86   : > { %560 = vmatmul.mubr.bf16.gmra.mrb[32].mxu0 %v294_v63  ;;  %664 = vmatmul.mubr.bf16.gmra.mrb[32].mxu1 %v320_v0 }
  0x87   : > { %567 = vmatprep.mubr.bf16.mxu0 %v297_v1  ;;  %671 = vmatprep.mubr.bf16.mxu1 %v323_v2 }
  0x8e   : > { %568 = vmatmul.mubr.bf16.gmra.mrb[36].mxu0 %v296_v11  ;;  %672 = vmatmul.mubr.bf16.gmra.mrb[36].mxu1 %v322_v12 }
  0x8f   : > { %575 = vmatprep.mubr.bf16.mxu0 %v299_v13  ;;  %679 = vmatprep.mubr.bf16.mxu1 %v325_v14 }
  0x96   : > { %576 = vmatmul.mubr.bf16.gmra.mrb[40].mxu0 %v298_v23  ;;  %680 = vmatmul.mubr.bf16.gmra.mrb[40].mxu1 %v324_v24 }
  0x97   : > { %583 = vmatprep.mubr.bf16.mxu0 %v301_v25  ;;  %687 = vmatprep.mubr.bf16.mxu1 %v327_v26 }
  0x9e   : > { %584 = vmatmul.mubr.bf16.gmra.mrb[44].mxu0 %v300_v33  ;;  %688 = vmatmul.mubr.bf16.gmra.mrb[44].mxu1 %v326_v34 }
  0x9f   : > { %591 = vmatprep.mubr.bf16.mxu0 %v303_v35 }
  0xa6   : > { %592 = vmatmul.mubr.bf16.gmra.mrb[48].mxu0 %v302_v38 }
 0x119   : > { %v497_v40 = vpop.f32.mrb[0].mxu0  ;;  %v601_v41 = vpop.f32.mrb[0].mxu1 }
 0x11a   : > { %v498_v42 = vadd.f32 %v1166_v39, %v497_v40  ;;  %v499_v43 = vpop.f32.mrb[1].mxu0  ;;  %v602_v44 = vadd.f32 %v1166_v39, %v601_v41  ;;  %v603_v45 = vpop.f32.mrb[1].mxu1 }
 0x11b   : > { %v500_v46 = vpop.f32.mrb[2].mxu0  ;;  %v604_v47 = vpop.f32.mrb[2].mxu1 }
 0x11c   : > { %v696_v48 = vmax.f32 %v498_v42, 0.0  ;;  %v501_v49 = vadd.f32 %v1166_v39, %v500_v46  ;;  %v502_v50 = vpop.f32.mrb[3].mxu0  ;;  %v722_v51 = vmax.f32 %v602_v44, 0.0  ;;  %v605_v52 = vadd.f32 %v1166_v39, %v604_v47  ;;  %v606_v53 = vpop.f32.mrb[3].mxu1 }
 0x11e   : > { %747 = vst.msk [vmem:[%s1174_s26] sm:$0xff] %vm746_vm0, %v696_v48  ;;  %v697_v54 = vmax.f32 %v501_v49, 0.0  ;;  %773 = vst.msk [vmem:[%s1174_s26 + $0xd0] sm:$0xff] %vm746_vm0, %v722_v51  ;;  %v723_v55 = vmax.f32 %v605_v52, 0.0 }
 0x120   : > { %748 = vst.msk [vmem:[%s1174_s26 + $0x8] sm:$0xff] %vm746_vm0, %v697_v54  ;;  %774 = vst.msk [vmem:[%s1174_s26 + $0xd8] sm:$0xff] %vm746_vm0, %v723_v55 }
 0x121   : > { %v505_v56 = vpop.f32.mrb[4].mxu0  ;;  %v609_v57 = vpop.f32.mrb[4].mxu1 }
 0x122   : > { %v506_v58 = vadd.f32 %v1166_v39, %v505_v56  ;;  %v507_v59 = vpop.f32.mrb[5].mxu0  ;;  %v610_v60 = vadd.f32 %v1166_v39, %v609_v57  ;;  %v611_v61 = vpop.f32.mrb[5].mxu1 }
 0x123   : > { %v508_v62 = vpop.f32.mrb[6].mxu0  ;;  %v612_v63 = vpop.f32.mrb[6].mxu1 }
 0x124   : > { %v698_v0 = vmax.f32 %v506_v58, 0.0  ;;  %v509_v1 = vadd.f32 %v1166_v39, %v508_v62  ;;  %v510_v2 = vpop.f32.mrb[7].mxu0  ;;  %v724_v3 = vmax.f32 %v610_v60, 0.0  ;;  %v613_v4 = vadd.f32 %v1166_v39, %v612_v63  ;;  %v614_v5 = vpop.f32.mrb[7].mxu1 }
 0x126   : > { %749 = vst.msk [vmem:[%s1174_s26 + $0x10] sm:$0xff] %vm746_vm0, %v698_v0  ;;  %v699_v6 = vmax.f32 %v509_v1, 0.0  ;;  %775 = vst.msk [vmem:[%s1174_s26 + $0xe0] sm:$0xff] %vm746_vm0, %v724_v3  ;;  %v725_v7 = vmax.f32 %v613_v4, 0.0 }
 0x128   : > { %750 = vst.msk [vmem:[%s1174_s26 + $0x18] sm:$0xff] %vm746_vm0, %v699_v6  ;;  %776 = vst.msk [vmem:[%s1174_s26 + $0xe8] sm:$0xff] %vm746_vm0, %v725_v7 }
 0x129   : > { %v513_v8 = vpop.f32.mrb[8].mxu0  ;;  %v617_v9 = vpop.f32.mrb[8].mxu1 }
 0x12a   : > { %v514_v10 = vadd.f32 %v1166_v39, %v513_v8  ;;  %v515_v11 = vpop.f32.mrb[9].mxu0  ;;  %v618_v12 = vadd.f32 %v1166_v39, %v617_v9  ;;  %v619_v13 = vpop.f32.mrb[9].mxu1 }
 0x12b   : > { %v516_v14 = vpop.f32.mrb[10].mxu0  ;;  %v620_v15 = vpop.f32.mrb[10].mxu1 }
 0x12c   : > { %v700_v16 = vmax.f32 %v514_v10, 0.0  ;;  %v517_v17 = vadd.f32 %v1166_v39, %v516_v14  ;;  %v518_v18 = vpop.f32.mrb[11].mxu0  ;;  %v726_v19 = vmax.f32 %v618_v12, 0.0  ;;  %v621_v20 = vadd.f32 %v1166_v39, %v620_v15  ;;  %v622_v21 = vpop.f32.mrb[11].mxu1 }
 0x12e   : > { %751 = vst.msk [vmem:[%s1174_s26 + $0x20] sm:$0xff] %vm746_vm0, %v700_v16  ;;  %v701_v22 = vmax.f32 %v517_v17, 0.0  ;;  %777 = vst.msk [vmem:[%s1174_s26 + $0xf0] sm:$0xff] %vm746_vm0, %v726_v19  ;;  %v727_v23 = vmax.f32 %v621_v20, 0.0 }
 0x130   : > { %752 = vst.msk [vmem:[%s1174_s26 + $0x28] sm:$0xff] %vm746_vm0, %v701_v22  ;;  %778 = vst.msk [vmem:[%s1174_s26 + $0xf8] sm:$0xff] %vm746_vm0, %v727_v23 }
 0x131   : > { %v521_v24 = vpop.f32.mrb[12].mxu0  ;;  %v625_v25 = vpop.f32.mrb[12].mxu1 }
 0x132   : > { %v522_v26 = vadd.f32 %v1166_v39, %v521_v24  ;;  %v523_v27 = vpop.f32.mrb[13].mxu0  ;;  %v626_v28 = vadd.f32 %v1166_v39, %v625_v25  ;;  %v627_v29 = vpop.f32.mrb[13].mxu1 }
 0x133   : > { %v524_v30 = vpop.f32.mrb[14].mxu0  ;;  %v628_v31 = vpop.f32.mrb[14].mxu1 }
 0x134   : > { %v702_v32 = vmax.f32 %v522_v26, 0.0  ;;  %v525_v33 = vadd.f32 %v1166_v39, %v524_v30  ;;  %v526_v34 = vpop.f32.mrb[15].mxu0  ;;  %v728_v35 = vmax.f32 %v626_v28, 0.0  ;;  %v629_v36 = vadd.f32 %v1166_v39, %v628_v31  ;;  %v630_v37 = vpop.f32.mrb[15].mxu1 }
 0x136   : > { %753 = vst.msk [vmem:[%s1174_s26 + $0x30] sm:$0xff] %vm746_vm0, %v702_v32  ;;  %v703_v38 = vmax.f32 %v525_v33, 0.0  ;;  %779 = vst.msk [vmem:[%s1174_s26 + $0x100] sm:$0xff] %vm746_vm0, %v728_v35  ;;  %v729_v40 = vmax.f32 %v629_v36, 0.0 }
 0x138   : > { %754 = vst.msk [vmem:[%s1174_s26 + $0x38] sm:$0xff] %vm746_vm0, %v703_v38  ;;  %780 = vst.msk [vmem:[%s1174_s26 + $0x108] sm:$0xff] %vm746_vm0, %v729_v40 }
 0x139   : > { %v529_v41 = vpop.f32.mrb[16].mxu0  ;;  %v633_v42 = vpop.f32.mrb[16].mxu1 }
 0x13a   : > { %v530_v43 = vadd.f32 %v1166_v39, %v529_v41  ;;  %v531_v44 = vpop.f32.mrb[17].mxu0  ;;  %v634_v45 = vadd.f32 %v1166_v39, %v633_v42  ;;  %v635_v46 = vpop.f32.mrb[17].mxu1 }
 0x13b   : > { %v532_v47 = vpop.f32.mrb[18].mxu0  ;;  %v636_v48 = vpop.f32.mrb[18].mxu1 }
 0x13c   : > { %v704_v49 = vmax.f32 %v530_v43, 0.0  ;;  %v533_v50 = vadd.f32 %v1166_v39, %v532_v47  ;;  %v534_v51 = vpop.f32.mrb[19].mxu0  ;;  %v730_v52 = vmax.f32 %v634_v45, 0.0  ;;  %v637_v53 = vadd.f32 %v1166_v39, %v636_v48  ;;  %v638_v54 = vpop.f32.mrb[19].mxu1 }
 0x13e   : > { %755 = vst.msk [vmem:[%s1174_s26 + $0x40] sm:$0xff] %vm746_vm0, %v704_v49  ;;  %v705_v55 = vmax.f32 %v533_v50, 0.0  ;;  %781 = vst.msk [vmem:[%s1174_s26 + $0x110] sm:$0xff] %vm746_vm0, %v730_v52  ;;  %v731_v56 = vmax.f32 %v637_v53, 0.0 }
 0x140   : > { %756 = vst.msk [vmem:[%s1174_s26 + $0x48] sm:$0xff] %vm746_vm0, %v705_v55  ;;  %782 = vst.msk [vmem:[%s1174_s26 + $0x118] sm:$0xff] %vm746_vm0, %v731_v56 }
 0x141   : > { %v537_v57 = vpop.f32.mrb[20].mxu0  ;;  %v641_v58 = vpop.f32.mrb[20].mxu1 }
 0x142   : > { %v538_v59 = vadd.f32 %v1166_v39, %v537_v57  ;;  %v539_v60 = vpop.f32.mrb[21].mxu0  ;;  %v642_v61 = vadd.f32 %v1166_v39, %v641_v58  ;;  %v643_v62 = vpop.f32.mrb[21].mxu1 }
 0x143   : > { %v540_v63 = vpop.f32.mrb[22].mxu0  ;;  %v644_v0 = vpop.f32.mrb[22].mxu1 }
 0x144   : > { %v706_v1 = vmax.f32 %v538_v59, 0.0  ;;  %v541_v2 = vadd.f32 %v1166_v39, %v540_v63  ;;  %v542_v3 = vpop.f32.mrb[23].mxu0  ;;  %v732_v4 = vmax.f32 %v642_v61, 0.0  ;;  %v645_v5 = vadd.f32 %v1166_v39, %v644_v0  ;;  %v646_v6 = vpop.f32.mrb[23].mxu1 }
 0x146   : > { %757 = vst.msk [vmem:[%s1174_s26 + $0x50] sm:$0xff] %vm746_vm0, %v706_v1  ;;  %v707_v7 = vmax.f32 %v541_v2, 0.0  ;;  %783 = vst.msk [vmem:[%s1174_s26 + $0x120] sm:$0xff] %vm746_vm0, %v732_v4  ;;  %v733_v8 = vmax.f32 %v645_v5, 0.0 }
 0x148   : > { %758 = vst.msk [vmem:[%s1174_s26 + $0x58] sm:$0xff] %vm746_vm0, %v707_v7  ;;  %784 = vst.msk [vmem:[%s1174_s26 + $0x128] sm:$0xff] %vm746_vm0, %v733_v8 }
 0x149   : > { %v545_v9 = vpop.f32.mrb[24].mxu0  ;;  %v649_v10 = vpop.f32.mrb[24].mxu1 }
 0x14a   : > { %v546_v11 = vadd.f32 %v1166_v39, %v545_v9  ;;  %v547_v12 = vpop.f32.mrb[25].mxu0  ;;  %v650_v13 = vadd.f32 %v1166_v39, %v649_v10  ;;  %v651_v14 = vpop.f32.mrb[25].mxu1 }
 0x14b   : > { %v548_v15 = vpop.f32.mrb[26].mxu0  ;;  %v652_v16 = vpop.f32.mrb[26].mxu1 }
 0x14c   : > { %v708_v17 = vmax.f32 %v546_v11, 0.0  ;;  %v549_v18 = vadd.f32 %v1166_v39, %v548_v15  ;;  %v550_v19 = vpop.f32.mrb[27].mxu0  ;;  %v734_v20 = vmax.f32 %v650_v13, 0.0  ;;  %v653_v21 = vadd.f32 %v1166_v39, %v652_v16  ;;  %v654_v22 = vpop.f32.mrb[27].mxu1 }
 0x14e   : > { %759 = vst.msk [vmem:[%s1174_s26 + $0x60] sm:$0xff] %vm746_vm0, %v708_v17  ;;  %v709_v23 = vmax.f32 %v549_v18, 0.0  ;;  %785 = vst.msk [vmem:[%s1174_s26 + $0x130] sm:$0xff] %vm746_vm0, %v734_v20  ;;  %v735_v24 = vmax.f32 %v653_v21, 0.0 }
 0x150   : > { %760 = vst.msk [vmem:[%s1174_s26 + $0x68] sm:$0xff] %vm746_vm0, %v709_v23  ;;  %786 = vst.msk [vmem:[%s1174_s26 + $0x138] sm:$0xff] %vm746_vm0, %v735_v24 }
 0x151   : > { %v553_v25 = vpop.f32.mrb[28].mxu0  ;;  %v657_v26 = vpop.f32.mrb[28].mxu1 }
 0x152   : > { %v554_v27 = vadd.f32 %v1166_v39, %v553_v25  ;;  %v555_v28 = vpop.f32.mrb[29].mxu0  ;;  %v658_v29 = vadd.f32 %v1166_v39, %v657_v26  ;;  %v659_v30 = vpop.f32.mrb[29].mxu1 }
 0x153   : > { %v556_v31 = vpop.f32.mrb[30].mxu0  ;;  %v660_v32 = vpop.f32.mrb[30].mxu1 }
 0x154   : > { %v710_v33 = vmax.f32 %v554_v27, 0.0  ;;  %v557_v34 = vadd.f32 %v1166_v39, %v556_v31  ;;  %v558_v35 = vpop.f32.mrb[31].mxu0  ;;  %v736_v36 = vmax.f32 %v658_v29, 0.0  ;;  %v661_v37 = vadd.f32 %v1166_v39, %v660_v32  ;;  %v662_v38 = vpop.f32.mrb[31].mxu1 }
 0x156   : > { %761 = vst.msk [vmem:[%s1174_s26 + $0x70] sm:$0xff] %vm746_vm0, %v710_v33  ;;  %v711_v40 = vmax.f32 %v557_v34, 0.0  ;;  %787 = vst.msk [vmem:[%s1174_s26 + $0x140] sm:$0xff] %vm746_vm0, %v736_v36  ;;  %v737_v41 = vmax.f32 %v661_v37, 0.0 }
 0x158   : > { %762 = vst.msk [vmem:[%s1174_s26 + $0x78] sm:$0xff] %vm746_vm0, %v711_v40  ;;  %788 = vst.msk [vmem:[%s1174_s26 + $0x148] sm:$0xff] %vm746_vm0, %v737_v41 }
 0x159   : > { %v561_v42 = vpop.f32.mrb[32].mxu0  ;;  %v665_v43 = vpop.f32.mrb[32].mxu1 }
 0x15a   : > { %v562_v44 = vadd.f32 %v1166_v39, %v561_v42  ;;  %v563_v45 = vpop.f32.mrb[33].mxu0  ;;  %v666_v46 = vadd.f32 %v1166_v39, %v665_v43  ;;  %v667_v47 = vpop.f32.mrb[33].mxu1 }
 0x15b   : > { %v564_v48 = vpop.f32.mrb[34].mxu0  ;;  %v668_v49 = vpop.f32.mrb[34].mxu1 }
 0x15c   : > { %v712_v50 = vmax.f32 %v562_v44, 0.0  ;;  %v565_v51 = vadd.f32 %v1166_v39, %v564_v48  ;;  %v566_v52 = vpop.f32.mrb[35].mxu0  ;;  %v738_v53 = vmax.f32 %v666_v46, 0.0  ;;  %v669_v54 = vadd.f32 %v1166_v39, %v668_v49  ;;  %v670_v55 = vpop.f32.mrb[35].mxu1 }
 0x15e   : > { %763 = vst.msk [vmem:[%s1174_s26 + $0x80] sm:$0xff] %vm746_vm0, %v712_v50  ;;  %v713_v56 = vmax.f32 %v565_v51, 0.0  ;;  %789 = vst.msk [vmem:[%s1174_s26 + $0x150] sm:$0xff] %vm746_vm0, %v738_v53  ;;  %v739_v57 = vmax.f32 %v669_v54, 0.0 }
 0x160   : > { %764 = vst.msk [vmem:[%s1174_s26 + $0x88] sm:$0xff] %vm746_vm0, %v713_v56  ;;  %790 = vst.msk [vmem:[%s1174_s26 + $0x158] sm:$0xff] %vm746_vm0, %v739_v57 }
 0x161   : > { %v569_v58 = vpop.f32.mrb[36].mxu0  ;;  %v673_v59 = vpop.f32.mrb[36].mxu1 }
 0x162   : > { %v570_v60 = vadd.f32 %v1166_v39, %v569_v58  ;;  %v571_v61 = vpop.f32.mrb[37].mxu0  ;;  %v674_v62 = vadd.f32 %v1166_v39, %v673_v59  ;;  %v675_v63 = vpop.f32.mrb[37].mxu1 }
 0x163   : > { %v572_v0 = vpop.f32.mrb[38].mxu0  ;;  %v676_v1 = vpop.f32.mrb[38].mxu1 }
 0x164   : > { %v714_v2 = vmax.f32 %v570_v60, 0.0  ;;  %v573_v3 = vadd.f32 %v1166_v39, %v572_v0  ;;  %v574_v4 = vpop.f32.mrb[39].mxu0  ;;  %v740_v5 = vmax.f32 %v674_v62, 0.0  ;;  %v677_v6 = vadd.f32 %v1166_v39, %v676_v1  ;;  %v678_v7 = vpop.f32.mrb[39].mxu1 }
 0x166   : > { %765 = vst.msk [vmem:[%s1174_s26 + $0x90] sm:$0xff] %vm746_vm0, %v714_v2  ;;  %v715_v8 = vmax.f32 %v573_v3, 0.0  ;;  %791 = vst.msk [vmem:[%s1174_s26 + $0x160] sm:$0xff] %vm746_vm0, %v740_v5  ;;  %v741_v9 = vmax.f32 %v677_v6, 0.0 }
 0x168   : > { %766 = vst.msk [vmem:[%s1174_s26 + $0x98] sm:$0xff] %vm746_vm0, %v715_v8  ;;  %792 = vst.msk [vmem:[%s1174_s26 + $0x168] sm:$0xff] %vm746_vm0, %v741_v9 }
 0x169   : > { %v577_v10 = vpop.f32.mrb[40].mxu0  ;;  %v681_v11 = vpop.f32.mrb[40].mxu1 }
 0x16a   : > { %v578_v12 = vadd.f32 %v1166_v39, %v577_v10  ;;  %v579_v13 = vpop.f32.mrb[41].mxu0  ;;  %v682_v14 = vadd.f32 %v1166_v39, %v681_v11  ;;  %v683_v15 = vpop.f32.mrb[41].mxu1 }
 0x16b   : > { %v580_v16 = vpop.f32.mrb[42].mxu0  ;;  %v684_v17 = vpop.f32.mrb[42].mxu1 }
 0x16c   : > { %v716_v18 = vmax.f32 %v578_v12, 0.0  ;;  %v581_v19 = vadd.f32 %v1166_v39, %v580_v16  ;;  %v582_v20 = vpop.f32.mrb[43].mxu0  ;;  %v742_v21 = vmax.f32 %v682_v14, 0.0  ;;  %v685_v22 = vadd.f32 %v1166_v39, %v684_v17  ;;  %v686_v23 = vpop.f32.mrb[43].mxu1 }
 0x16e   : > { %767 = vst.msk [vmem:[%s1174_s26 + $0xa0] sm:$0xff] %vm746_vm0, %v716_v18  ;;  %v717_v24 = vmax.f32 %v581_v19, 0.0  ;;  %793 = vst.msk [vmem:[%s1174_s26 + $0x170] sm:$0xff] %vm746_vm0, %v742_v21  ;;  %v743_v25 = vmax.f32 %v685_v22, 0.0 }
 0x170   : > { %768 = vst.msk [vmem:[%s1174_s26 + $0xa8] sm:$0xff] %vm746_vm0, %v717_v24  ;;  %794 = vst.msk [vmem:[%s1174_s26 + $0x178] sm:$0xff] %vm746_vm0, %v743_v25 }
 0x171   : > { %v585_v26 = vpop.f32.mrb[44].mxu0  ;;  %v689_v27 = vpop.f32.mrb[44].mxu1 }
 0x172   : > { %v586_v28 = vadd.f32 %v1166_v39, %v585_v26  ;;  %v587_v29 = vpop.f32.mrb[45].mxu0  ;;  %v690_v30 = vadd.f32 %v1166_v39, %v689_v27  ;;  %v691_v31 = vpop.f32.mrb[45].mxu1 }
 0x173   : > { %v588_v32 = vpop.f32.mrb[46].mxu0  ;;  %v692_v33 = vpop.f32.mrb[46].mxu1 }
 0x174   : > { %v718_v34 = vmax.f32 %v586_v28, 0.0  ;;  %v589_v35 = vadd.f32 %v1166_v39, %v588_v32  ;;  %v590_v36 = vpop.f32.mrb[47].mxu0  ;;  %v744_v37 = vmax.f32 %v690_v30, 0.0  ;;  %v693_v38 = vadd.f32 %v1166_v39, %v692_v33  ;;  %v694_v40 = vpop.f32.mrb[47].mxu1 }
 0x176   : > { %769 = vst.msk [vmem:[%s1174_s26 + $0xb0] sm:$0xff] %vm746_vm0, %v718_v34  ;;  %v719_v41 = vmax.f32 %v589_v35, 0.0  ;;  %795 = vst.msk [vmem:[%s1174_s26 + $0x180] sm:$0xff] %vm746_vm0, %v744_v37  ;;  %v745_v42 = vmax.f32 %v693_v38, 0.0 }
 0x178   : > { %770 = vst.msk [vmem:[%s1174_s26 + $0xb8] sm:$0xff] %vm746_vm0, %v719_v41  ;;  %796 = vst.msk [vmem:[%s1174_s26 + $0x188] sm:$0xff] %vm746_vm0, %v745_v42 }
 0x179   : > { %v593_v43 = vpop.f32.mrb[48].mxu0 }
 0x17a   : > { %v594_v44 = vadd.f32 %v1166_v39, %v593_v43  ;;  %v595_v45 = vpop.f32.mrb[49].mxu0 }
 0x17b   : > { %v596_v46 = vpop.f32.mrb[50].mxu0 }
 0x17c   : > { %v720_v47 = vmax.f32 %v594_v44, 0.0  ;;  %v597_v48 = vadd.f32 %v1166_v39, %v596_v46  ;;  %v598_v49 = vpop.f32.mrb[51].mxu0 }
 0x17e   : > { %771 = vst.msk [vmem:[%s1174_s26 + $0xc0] sm:$0xff] %vm746_vm0, %v720_v47  ;;  %v721_v50 = vmax.f32 %v597_v48, 0.0 }
 0x180   : > { %772 = vst.msk [vmem:[%s1174_s26 + $0xc8] sm:$0xff] %vm746_vm0, %v721_v50 }
 0x181 PF: > { %s13_s12 = sadd.s32 1, %s944_s12  }
 0x182   : > { %p10_p4 = scmp.ge.s32.totalorder %s13_s12, 4  }
 0x184   :  { %12 = sbr.rel (!%p10_p4) target bundleno = 1 (0x1), region = 62 }

// kernel: deep_q_forward.5
= control target key start
LH: loop header
LB: loop body
LE: loop exit
PB: predicated region body
PF: predicated region fallthrough
CT: control target
= control target key end

     0   :  { %vm667_vm0 = vcmask 523264   ;;  %vm688_vm1 = vcmask 517120   ;;  %s1400_s1 = inlined_call_operand.vmem [shape: bf16[512,64], index: 1, kind: input, shape index: {}]   ;;  %s1401_s0 = inlined_call_operand.vmem [shape: f32[162,512], index: 0, kind: input, shape index: {}]   ;;  %s1402_s2 = inlined_call_operand.vmem [shape: f32[1,64], index: 2, kind: input, shape index: {}]   ;;  %s1403_s3 = inlined_call_operand.vmem [shape: f32[162,64], index: 3, kind: output, shape index: {}]  }
   0x1   :  { %v891_v0 = vld [vmem:[%s1400_s1 + $0x40] sm:$0xff]   ;;  %v895_v4 = vld [vmem:[%s1400_s1 + $0x48] sm:$0xff]   ;;  %v899_v8 = vld [vmem:[%s1400_s1 + $0x50] sm:$0xff]  }
   0x2   :  { %v892_v1 = vld [vmem:[%s1400_s1 + $0xc0] sm:$0xff]   ;;  %727 = vmatprep.subr.bf16.mxu0 %v891_v0  ;;  %v896_v5 = vld [vmem:[%s1400_s1 + $0xc8] sm:$0xff]   ;;  %v900_v9 = vld [vmem:[%s1400_s1 + $0xd0] sm:$0xff]  }
   0x3   :  { %v893_v2 = vld [vmem:[%s1400_s1] sm:$0xff]   ;;  %809 = vmatprep.subr.bf16.mxu1 %v892_v1  ;;  %v897_v6 = vld [vmem:[%s1400_s1 + $0x8] sm:$0xff]   ;;  %v901_v10 = vld [vmem:[%s1400_s1 + $0x10] sm:$0xff]  }
   0x4   :  { %v894_v3 = vld [vmem:[%s1400_s1 + $0x80] sm:$0xff]   ;;  %728 = vmatpush3.bf16.msra.mxu0 %v893_v2  ;;  %v898_v7 = vld [vmem:[%s1400_s1 + $0x88] sm:$0xff]   ;;  %v902_v11 = vld [vmem:[%s1400_s1 + $0x90] sm:$0xff]  }
   0x5   :  { %810 = vmatpush3.bf16.msra.mxu1 %v894_v3  ;;  %729 = vmatprep.subr.bf16.mxu0 %v895_v4  ;;  %v903_v12 = vld [vmem:[%s1400_s1 + $0x58] sm:$0xff]   ;;  %v907_v16 = vld [vmem:[%s1400_s1 + $0x60] sm:$0xff]   ;;  %v911_v20 = vld [vmem:[%s1400_s1 + $0x68] sm:$0xff]  }
   0x6   :  { %811 = vmatprep.subr.bf16.mxu1 %v896_v5  ;;  %v904_v13 = vld [vmem:[%s1400_s1 + $0xd8] sm:$0xff]   ;;  %v908_v17 = vld [vmem:[%s1400_s1 + $0xe0] sm:$0xff]   ;;  %v912_v21 = vld [vmem:[%s1400_s1 + $0xe8] sm:$0xff]  }
   0x7   :  { %v905_v14 = vld [vmem:[%s1400_s1 + $0x18] sm:$0xff]   ;;  %v909_v18 = vld [vmem:[%s1400_s1 + $0x20] sm:$0xff]   ;;  %v913_v22 = vld [vmem:[%s1400_s1 + $0x28] sm:$0xff]  }
   0x8   :  { %730 = vmatpush3.bf16.msra.mxu0 %v897_v6  ;;  %v906_v15 = vld [vmem:[%s1400_s1 + $0x98] sm:$0xff]   ;;  %v910_v19 = vld [vmem:[%s1400_s1 + $0xa0] sm:$0xff]   ;;  %v914_v23 = vld [vmem:[%s1400_s1 + $0xa8] sm:$0xff]  }
   0x9   :  { %812 = vmatpush3.bf16.msra.mxu1 %v898_v7  ;;  %731 = vmatprep.subr.bf16.mxu0 %v899_v8  ;;  %v915_v24 = vld [vmem:[%s1400_s1 + $0x70] sm:$0xff]   ;;  %v919_v28 = vld [vmem:[%s1400_s1 + $0x78] sm:$0xff]   ;;  %v16_v32 = vld [vmem:[%s1401_s0 + $0x8] sm:$0xff] }
   0xa   :  { %813 = vmatprep.subr.bf16.mxu1 %v900_v9  ;;  %v916_v25 = vld [vmem:[%s1400_s1 + $0xf0] sm:$0xff]   ;;  %v920_v29 = vld [vmem:[%s1400_s1 + $0xf8] sm:$0xff]   ;;  %v20_v33 = vld [vmem:[%s1401_s0 + $0x28] sm:$0xff] }
   0xb   :  { %v917_v26 = vld [vmem:[%s1400_s1 + $0x30] sm:$0xff]   ;;  %v921_v30 = vld [vmem:[%s1400_s1 + $0x38] sm:$0xff]   ;;  %v100_v35 = vpack.c.bf16 %v20_v33, %v16_v32  ;;  %v15_v37 = vld [vmem:[%s1401_s0] sm:$0xff] }
   0xc   :  { %732 = vmatpush3.bf16.msra.mxu0 %v901_v10  ;;  %v918_v27 = vld [vmem:[%s1400_s1 + $0xb0] sm:$0xff]   ;;  %v922_v31 = vld [vmem:[%s1400_s1 + $0xb8] sm:$0xff]   ;;  %v19_v38 = vld [vmem:[%s1401_s0 + $0x20] sm:$0xff] }
   0xd   :  { %814 = vmatpush3.bf16.msra.mxu1 %v902_v11  ;;  %733 = vmatprep.subr.bf16.mxu0 %v903_v12  ;;  %v18_v34 = vld [vmem:[%s1401_s0 + $0x18] sm:$0xff]  ;;  %v99_v40 = vpack.c.bf16 %v19_v38, %v15_v37  ;;  %v17_v41 = vld [vmem:[%s1401_s0 + $0x10] sm:$0xff]  ;;  %v24_v43 = vld [vmem:[%s1401_s0 + $0x48] sm:$0xff] }
   0xe   :  { %815 = vmatprep.subr.bf16.mxu1 %v904_v13  ;;  %v22_v36 = vld [vmem:[%s1401_s0 + $0x38] sm:$0xff]  ;;  %v21_v42 = vld [vmem:[%s1401_s0 + $0x30] sm:$0xff]  ;;  %438 = vmatprep.mubr.bf16.mxu0 %v100_v35  ;;  %v28_v45 = vld [vmem:[%s1401_s0 + $0x68] sm:$0xff] }
   0xf   :  { %v102_v39 = vpack.c.bf16 %v22_v36, %v18_v34  ;;  %v101_v44 = vpack.c.bf16 %v21_v42, %v17_v41  ;;  %v26_v46 = vld [vmem:[%s1401_s0 + $0x58] sm:$0xff]  ;;  %v104_v48 = vpack.c.bf16 %v28_v45, %v24_v43  ;;  %v23_v50 = vld [vmem:[%s1401_s0 + $0x40] sm:$0xff]  ;;  %v25_v52 = vld [vmem:[%s1401_s0 + $0x50] sm:$0xff] }
  0x10   :  { %734 = vmatpush3.bf16.msra.mxu0 %v905_v14  ;;  %v30_v47 = vld [vmem:[%s1401_s0 + $0x78] sm:$0xff]  ;;  %v27_v51 = vld [vmem:[%s1401_s0 + $0x60] sm:$0xff]  ;;  %v29_v53 = vld [vmem:[%s1401_s0 + $0x70] sm:$0xff] }
  0x11   :  { %816 = vmatpush3.bf16.msra.mxu1 %v906_v15  ;;  %735 = vmatprep.subr.bf16.mxu0 %v907_v16  ;;  %v106_v49 = vpack.c.bf16 %v30_v47, %v26_v46  ;;  %v32_v54 = vld [vmem:[%s1401_s0 + $0x88] sm:$0xff]  ;;  %v34_v56 = vld [vmem:[%s1401_s0 + $0x98] sm:$0xff]  ;;  %v103_v58 = vpack.c.bf16 %v27_v51, %v23_v50  ;;  %v105_v59 = vpack.c.bf16 %v29_v53, %v25_v52  ;;  %v31_v62 = vld [vmem:[%s1401_s0 + $0x80] sm:$0xff] }
  0x12   :  { %817 = vmatprep.subr.bf16.mxu1 %v908_v17  ;;  %558 = vmatprep.mubr.bf16.mxu1 %v102_v39  ;;  %v36_v55 = vld [vmem:[%s1401_s0 + $0xa8] sm:$0xff]  ;;  %v38_v57 = vld [vmem:[%s1401_s0 + $0xb8] sm:$0xff]  ;;  %v35_v63 = vld [vmem:[%s1401_s0 + $0xa0] sm:$0xff] }
  0x13   :  { %v108_v60 = vpack.c.bf16 %v36_v55, %v32_v54  ;;  %v110_v61 = vpack.c.bf16 %v38_v57, %v34_v56  ;;  %v33_v0 = vld [vmem:[%s1401_s0 + $0x90] sm:$0xff]  ;;  %v40_v2 = vld [vmem:[%s1401_s0 + $0xc8] sm:$0xff]  ;;  %v42_v4 = vld [vmem:[%s1401_s0 + $0xd8] sm:$0xff]  ;;  %v107_v6 = vpack.c.bf16 %v35_v63, %v31_v62 }
  0x14   :  { %736 = vmatpush3.bf16.msra.mxu0 %v909_v18  ;;  %v37_v1 = vld [vmem:[%s1401_s0 + $0xb0] sm:$0xff]  ;;  %v44_v3 = vld [vmem:[%s1401_s0 + $0xe8] sm:$0xff]  ;;  %v46_v5 = vld [vmem:[%s1401_s0 + $0xf8] sm:$0xff] }
  0x15   :  { %818 = vmatpush3.bf16.msra.mxu1 %v910_v19  ;;  %737 = vmatprep.subr.bf16.mxu0 %v911_v20  ;;  %v109_v7 = vpack.c.bf16 %v37_v1, %v33_v0  ;;  %v112_v8 = vpack.c.bf16 %v44_v3, %v40_v2  ;;  %v114_v9 = vpack.c.bf16 %v46_v5, %v42_v4  ;;  %v39_v10 = vld [vmem:[%s1401_s0 + $0xc0] sm:$0xff]  ;;  %v41_v12 = vld [vmem:[%s1401_s0 + $0xd0] sm:$0xff]  ;;  %v48_v14 = vld [vmem:[%s1401_s0 + $0x108] sm:$0xff] }
  0x16   :  { %819 = vmatprep.subr.bf16.mxu1 %v912_v21  ;;  %v43_v11 = vld [vmem:[%s1401_s0 + $0xe0] sm:$0xff]  ;;  %v45_v13 = vld [vmem:[%s1401_s0 + $0xf0] sm:$0xff]  ;;  %v52_v15 = vld [vmem:[%s1401_s0 + $0x128] sm:$0xff] }
  0x17   :  { %v50_v16 = vld [vmem:[%s1401_s0 + $0x118] sm:$0xff]  ;;  %v111_v18 = vpack.c.bf16 %v43_v11, %v39_v10  ;;  %v113_v19 = vpack.c.bf16 %v45_v13, %v41_v12  ;;  %v116_v20 = vpack.c.bf16 %v52_v15, %v48_v14  ;;  %v55_v34 = vld [vmem:[%s1401_s0 + $0x140] sm:$0xff]  ;;  %v57_v36 = vld [vmem:[%s1401_s0 + $0x150] sm:$0xff] }
  0x18   :  { %738 = vmatpush3.bf16.msra.mxu0 %v913_v22  ;;  %v54_v17 = vld [vmem:[%s1401_s0 + $0x138] sm:$0xff]  ;;  %v47_v22 = vld [vmem:[%s1401_s0 + $0x100] sm:$0xff]  ;;  %v61_v37 = vld [vmem:[%s1401_s0 + $0x170] sm:$0xff] }
  0x19   :  { %820 = vmatpush3.bf16.msra.mxu1 %v914_v23  ;;  %739 = vmatprep.subr.bf16.mxu0 %v915_v24  ;;  %v118_v21 = vpack.c.bf16 %v54_v17, %v50_v16  ;;  %v51_v23 = vld [vmem:[%s1401_s0 + $0x120] sm:$0xff]  ;;  %v49_v24 = vld [vmem:[%s1401_s0 + $0x110] sm:$0xff]  ;;  %v64_v38 = vld [vmem:[%s1401_s0 + $0x188] sm:$0xff]  ;;  %v121_v43 = vpack.c.bf16 %v61_v37, %v57_v36 }
  0x1a   :  { %821 = vmatprep.subr.bf16.mxu1 %v916_v25  ;;  %v53_v25 = vld [vmem:[%s1401_s0 + $0x130] sm:$0xff]  ;;  %v59_v35 = vld [vmem:[%s1401_s0 + $0x160] sm:$0xff]  ;;  %v68_v39 = vld [vmem:[%s1401_s0 + $0x1a8] sm:$0xff] }
  0x1b   :  { %v70_v41 = vld [vmem:[%s1401_s0 + $0x1b8] sm:$0xff]  ;;  %v119_v42 = vpack.c.bf16 %v59_v35, %v55_v34  ;;  %v63_v46 = vld [vmem:[%s1401_s0 + $0x180] sm:$0xff]  ;;  %v72_v50 = vld [vmem:[%s1401_s0 + $0x1c8] sm:$0xff] }
  0x1c   :  { %740 = vmatpush3.bf16.msra.mxu0 %v917_v26  ;;  %v56_v26 = vld [vmem:[%s1401_s0 + $0x148] sm:$0xff]  ;;  %v67_v47 = vld [vmem:[%s1401_s0 + $0x1a0] sm:$0xff]  ;;  %v74_v52 = vld [vmem:[%s1401_s0 + $0x1d8] sm:$0xff] }
  0x1d   :  { %822 = vmatpush3.bf16.msra.mxu1 %v918_v27  ;;  %741 = vmatprep.subr.bf16.mxu0 %v919_v28  ;;  %v60_v27 = vld [vmem:[%s1401_s0 + $0x168] sm:$0xff]  ;;  %v58_v28 = vld [vmem:[%s1401_s0 + $0x158] sm:$0xff]  ;;  %v123_v54 = vpack.c.bf16 %v67_v47, %v63_v46  ;;  %v1294_v34 = vld [vmem:[%s1402_s2] ss:$0 sm:$0xff] }
  0x1e   :  { %823 = vmatprep.subr.bf16.mxu1 %v920_v29  ;;  %v62_v29 = vld [vmem:[%s1401_s0 + $0x178] sm:$0xff]  ;;  %v120_v32 = vpack.c.bf16 %v60_v27, %v56_v26  ;;  %v76_v51 = vld [vmem:[%s1401_s0 + $0x1e8] sm:$0xff] }
  0x1f   :  { %v122_v33 = vpack.c.bf16 %v62_v29, %v58_v28  ;;  %v78_v53 = vld [vmem:[%s1401_s0 + $0x1f8] sm:$0xff]  ;;  %v128_v56 = vpack.c.bf16 %v76_v51, %v72_v50  ;;  %v80_v62 = vld [vmem:[%s1401_s0 + $0x208] sm:$0xff]  ;;  %v95_v28 = vld [vmem:[%s1401_s0 + $0x280] sm:$0x3] }
  0x20   :  { %742 = vmatpush3.bf16.msra.mxu0 %v921_v30  ;;  %v115_v30 = vpack.c.bf16 %v51_v23, %v47_v22  ;;  %v130_v57 = vpack.c.bf16 %v78_v53, %v74_v52  ;;  %v84_v63 = vld [vmem:[%s1401_s0 + $0x228] sm:$0xff]  ;;  %v82_v0 = vld [vmem:[%s1401_s0 + $0x218] sm:$0xff]  ;;  %v97_v29 = vld [vmem:[%s1401_s0 + $0x290] sm:$0x3] }
  0x21   :  { %824 = vmatpush3.bf16.msra.mxu1 %v922_v31  ;;  %v117_v31 = vpack.c.bf16 %v53_v25, %v49_v24  ;;  %v86_v1 = vld [vmem:[%s1401_s0 + $0x238] sm:$0xff]  ;;  %v132_v4 = vpack.c.bf16 %v84_v63, %v80_v62  ;;  %v88_v10 = vld [vmem:[%s1401_s0 + $0x248] sm:$0xff] }
  0x22   :  { %v134_v5 = vpack.c.bf16 %v86_v1, %v82_v0  ;;  %v92_v11 = vld [vmem:[%s1401_s0 + $0x268] sm:$0xff]  ;;  %v90_v12 = vld [vmem:[%s1401_s0 + $0x258] sm:$0xff] }
  0x23   :  { %439 = vmatmul.mubr.bf16.vlgmr.msra.gmra.mrb[0].mxu0 %v99_v40  ;;  %v66_v40 = vld [vmem:[%s1401_s0 + $0x198] sm:$0xff]  ;;  %v136_v16 = vpack.c.bf16 %v92_v11, %v88_v10  ;;  %v96_v22 = vld [vmem:[%s1401_s0 + $0x288] sm:$0x3] }
  0x24   :  { %559 = vmatmul.mubr.bf16.vlgmr.msra.gmra.mrb[0].mxu1 %v101_v44  ;;  %446 = vmatprep.mubr.bf16.mxu0 %v104_v48  ;;  %v124_v44 = vpack.c.bf16 %v68_v39, %v64_v38  ;;  %v126_v45 = vpack.c.bf16 %v70_v41, %v66_v40  ;;  %v65_v48 = vld [vmem:[%s1401_s0 + $0x190] sm:$0xff]  ;;  %v94_v13 = vld [vmem:[%s1401_s0 + $0x278] sm:$0xff]  ;;  %v140_v26 = vpack.c.bf16 %v96_v22, %v96_v22 }
  0x25   :  { %566 = vmatprep.mubr.bf16.mxu1 %v106_v49  ;;  %v69_v49 = vld [vmem:[%s1401_s0 + $0x1b0] sm:$0xff]  ;;  %v138_v17 = vpack.c.bf16 %v94_v13, %v90_v12  ;;  %v98_v23 = vld [vmem:[%s1401_s0 + $0x298] sm:$0x3] }
  0x26   :  { %v125_v55 = vpack.c.bf16 %v69_v49, %v65_v48  ;;  %v142_v27 = vpack.c.bf16 %v98_v23, %v98_v23 }
  0x2b   :  { %447 = vmatmul.mubr.bf16.gmra.mrb[4].mxu0 %v103_v58  ;;  %v71_v58 = vld [vmem:[%s1401_s0 + $0x1c0] sm:$0xff] }
  0x2c   :  { %567 = vmatmul.mubr.bf16.gmra.mrb[4].mxu1 %v105_v59  ;;  %454 = vmatprep.mubr.bf16.mxu0 %v108_v60  ;;  %v75_v59 = vld [vmem:[%s1401_s0 + $0x1e0] sm:$0xff]  ;;  %v73_v60 = vld [vmem:[%s1401_s0 + $0x1d0] sm:$0xff] }
  0x2d   :  { %574 = vmatprep.mubr.bf16.mxu1 %v110_v61  ;;  %v77_v61 = vld [vmem:[%s1401_s0 + $0x1f0] sm:$0xff]  ;;  %v127_v2 = vpack.c.bf16 %v75_v59, %v71_v58 }
  0x2e   :  { %v129_v3 = vpack.c.bf16 %v77_v61, %v73_v60 }
  0x33   :  { %455 = vmatmul.mubr.bf16.gmra.mrb[8].mxu0 %v107_v6  ;;  %v79_v6 = vld [vmem:[%s1401_s0 + $0x200] sm:$0xff] }
  0x34   :  { %575 = vmatmul.mubr.bf16.gmra.mrb[8].mxu1 %v109_v7  ;;  %462 = vmatprep.mubr.bf16.mxu0 %v112_v8  ;;  %v83_v7 = vld [vmem:[%s1401_s0 + $0x220] sm:$0xff]  ;;  %v81_v8 = vld [vmem:[%s1401_s0 + $0x210] sm:$0xff] }
  0x35   :  { %582 = vmatprep.mubr.bf16.mxu1 %v114_v9  ;;  %v85_v9 = vld [vmem:[%s1401_s0 + $0x230] sm:$0xff]  ;;  %v131_v14 = vpack.c.bf16 %v83_v7, %v79_v6 }
  0x36   :  { %v133_v15 = vpack.c.bf16 %v85_v9, %v81_v8 }
  0x3b   :  { %463 = vmatmul.mubr.bf16.gmra.mrb[12].mxu0 %v111_v18  ;;  %v87_v18 = vld [vmem:[%s1401_s0 + $0x240] sm:$0xff] }
  0x3c   :  { %583 = vmatmul.mubr.bf16.gmra.mrb[12].mxu1 %v113_v19  ;;  %470 = vmatprep.mubr.bf16.mxu0 %v116_v20  ;;  %v91_v19 = vld [vmem:[%s1401_s0 + $0x260] sm:$0xff]  ;;  %v89_v20 = vld [vmem:[%s1401_s0 + $0x250] sm:$0xff] }
  0x3d   :  { %590 = vmatprep.mubr.bf16.mxu1 %v118_v21  ;;  %v93_v21 = vld [vmem:[%s1401_s0 + $0x270] sm:$0xff]  ;;  %v135_v24 = vpack.c.bf16 %v91_v19, %v87_v18 }
  0x3e   :  { %v137_v25 = vpack.c.bf16 %v93_v21, %v89_v20 }
  0x43   :  { %471 = vmatmul.mubr.bf16.gmra.mrb[16].mxu0 %v115_v30  ;;  %v139_v30 = vpack.c.bf16 %v95_v28, %v95_v28 }
  0x44   :  { %591 = vmatmul.mubr.bf16.gmra.mrb[16].mxu1 %v117_v31  ;;  %478 = vmatprep.mubr.bf16.mxu0 %v120_v32  ;;  %v141_v31 = vpack.c.bf16 %v97_v29, %v97_v29 }
  0x45   :  { %598 = vmatprep.mubr.bf16.mxu1 %v122_v33 }
  0x4b   :  { %479 = vmatmul.mubr.bf16.gmra.mrb[20].mxu0 %v119_v42 }
  0x4c   :  { %599 = vmatmul.mubr.bf16.gmra.mrb[20].mxu1 %v121_v43  ;;  %486 = vmatprep.mubr.bf16.mxu0 %v124_v44 }
  0x4d   :  { %606 = vmatprep.mubr.bf16.mxu1 %v126_v45 }
  0x53   :  { %487 = vmatmul.mubr.bf16.gmra.mrb[24].mxu0 %v123_v54 }
  0x54   :  { %607 = vmatmul.mubr.bf16.gmra.mrb[24].mxu1 %v125_v55  ;;  %494 = vmatprep.mubr.bf16.mxu0 %v128_v56 }
  0x55   :  { %614 = vmatprep.mubr.bf16.mxu1 %v130_v57 }
  0x5b   :  { %495 = vmatmul.mubr.bf16.gmra.mrb[28].mxu0 %v127_v2 }
  0x5c   :  { %615 = vmatmul.mubr.bf16.gmra.mrb[28].mxu1 %v129_v3  ;;  %502 = vmatprep.mubr.bf16.mxu0 %v132_v4 }
  0x5d   :  { %622 = vmatprep.mubr.bf16.mxu1 %v134_v5 }
  0x63   :  { %503 = vmatmul.mubr.bf16.gmra.mrb[32].mxu0 %v131_v14 }
  0x64   :  { %623 = vmatmul.mubr.bf16.gmra.mrb[32].mxu1 %v133_v15  ;;  %510 = vmatprep.mubr.bf16.mxu0 %v136_v16 }
  0x65   :  { %630 = vmatprep.mubr.bf16.mxu1 %v138_v17 }
  0x6b   :  { %511 = vmatmul.mubr.bf16.gmra.mrb[36].mxu0 %v135_v24 }
  0x6c   :  { %631 = vmatmul.mubr.bf16.gmra.mrb[36].mxu1 %v137_v25  ;;  %518 = vmatprep.mubr.bf16.mxu0 %v140_v26 }
  0x6d   :  { %638 = vmatprep.mubr.bf16.mxu1 %v142_v27 }
  0x73   :  { %519 = vmatmul.mubr.bf16.gmra.mrb[40].mxu0 %v139_v30 }
  0x74   :  { %639 = vmatmul.mubr.bf16.gmra.mrb[40].mxu1 %v141_v31 }
  0xf6   :  { %v743_v32 = vpop.f32.mrb[0].mxu0 }
  0xf7   :  { %v825_v33 = vpop.f32.mrb[0].mxu1  ;;  %v744_v35 = vpop.f32.mrb[1].mxu0 }
  0xf8   :  { %v745_v36 = vadd.f32 %v744_v35, %v743_v32  ;;  %v826_v37 = vpop.f32.mrb[1].mxu1  ;;  %v746_v38 = vpop.f32.mrb[2].mxu0 }
  0xf9   :  { %v827_v39 = vadd.f32 %v826_v37, %v825_v33  ;;  %v828_v40 = vpop.f32.mrb[2].mxu1  ;;  %v747_v41 = vpop.f32.mrb[3].mxu0 }
  0xfa   :  { %v441_v42 = vadd.f32 %v745_v36, %v1294_v34  ;;  %v748_v43 = vadd.f32 %v747_v41, %v746_v38  ;;  %v829_v44 = vpop.f32.mrb[3].mxu1 }
  0xfb   :  { %v830_v45 = vadd.f32 %v829_v44, %v828_v40 }
  0xfc   :  { %v561_v46 = vadd.f32 %v827_v39, %v441_v42  ;;  %v444_v47 = vadd.f32 %v748_v43, %v1294_v34 }
  0xfe   :  { %v646_v48 = vmax.f32 %v561_v46, 0.0  ;;  %v564_v49 = vadd.f32 %v830_v45, %v444_v47  ;;  %v749_v50 = vpop.f32.mrb[4].mxu0 }
  0xff   :  { %v831_v51 = vpop.f32.mrb[4].mxu1  ;;  %v750_v52 = vpop.f32.mrb[5].mxu0 }
 0x100   :  { %668 = vst.msk [vmem:[%s1403_s3] sm:$0xff] %vm667_vm0, %v646_v48  ;;  %v647_v53 = vmax.f32 %v564_v49, 0.0  ;;  %v751_v54 = vadd.f32 %v750_v52, %v749_v50  ;;  %v832_v55 = vpop.f32.mrb[5].mxu1  ;;  %v752_v56 = vpop.f32.mrb[6].mxu0 }
 0x101   :  { %v833_v57 = vadd.f32 %v832_v55, %v831_v51  ;;  %v834_v58 = vpop.f32.mrb[6].mxu1  ;;  %v753_v59 = vpop.f32.mrb[7].mxu0 }
 0x102   :  { %669 = vst.msk [vmem:[%s1403_s3 + $0x8] sm:$0xff] %vm667_vm0, %v647_v53  ;;  %v449_v60 = vadd.f32 %v751_v54, %v1294_v34  ;;  %v754_v61 = vadd.f32 %v753_v59, %v752_v56  ;;  %v835_v62 = vpop.f32.mrb[7].mxu1 }
 0x103   :  { %v836_v63 = vadd.f32 %v835_v62, %v834_v58 }
 0x104   :  { %v569_v0 = vadd.f32 %v833_v57, %v449_v60  ;;  %v452_v1 = vadd.f32 %v754_v61, %v1294_v34 }
 0x106   :  { %v648_v2 = vmax.f32 %v569_v0, 0.0  ;;  %v572_v3 = vadd.f32 %v836_v63, %v452_v1  ;;  %v755_v4 = vpop.f32.mrb[8].mxu0 }
 0x107   :  { %v837_v5 = vpop.f32.mrb[8].mxu1  ;;  %v756_v6 = vpop.f32.mrb[9].mxu0 }
 0x108   :  { %670 = vst.msk [vmem:[%s1403_s3 + $0x10] sm:$0xff] %vm667_vm0, %v648_v2  ;;  %v649_v7 = vmax.f32 %v572_v3, 0.0  ;;  %v757_v8 = vadd.f32 %v756_v6, %v755_v4  ;;  %v838_v9 = vpop.f32.mrb[9].mxu1  ;;  %v758_v10 = vpop.f32.mrb[10].mxu0 }
 0x109   :  { %v839_v11 = vadd.f32 %v838_v9, %v837_v5  ;;  %v840_v12 = vpop.f32.mrb[10].mxu1  ;;  %v759_v13 = vpop.f32.mrb[11].mxu0 }
 0x10a   :  { %671 = vst.msk [vmem:[%s1403_s3 + $0x18] sm:$0xff] %vm667_vm0, %v649_v7  ;;  %v457_v14 = vadd.f32 %v757_v8, %v1294_v34  ;;  %v760_v15 = vadd.f32 %v759_v13, %v758_v10  ;;  %v841_v16 = vpop.f32.mrb[11].mxu1 }
 0x10b   :  { %v842_v17 = vadd.f32 %v841_v16, %v840_v12 }
 0x10c   :  { %v577_v18 = vadd.f32 %v839_v11, %v457_v14  ;;  %v460_v19 = vadd.f32 %v760_v15, %v1294_v34 }
 0x10e   :  { %v650_v20 = vmax.f32 %v577_v18, 0.0  ;;  %v580_v21 = vadd.f32 %v842_v17, %v460_v19  ;;  %v761_v22 = vpop.f32.mrb[12].mxu0 }
 0x10f   :  { %v843_v23 = vpop.f32.mrb[12].mxu1  ;;  %v762_v24 = vpop.f32.mrb[13].mxu0 }
 0x110   :  { %672 = vst.msk [vmem:[%s1403_s3 + $0x20] sm:$0xff] %vm667_vm0, %v650_v20  ;;  %v651_v25 = vmax.f32 %v580_v21, 0.0  ;;  %v763_v26 = vadd.f32 %v762_v24, %v761_v22  ;;  %v844_v27 = vpop.f32.mrb[13].mxu1  ;;  %v764_v28 = vpop.f32.mrb[14].mxu0 }
 0x111   :  { %v845_v29 = vadd.f32 %v844_v27, %v843_v23  ;;  %v846_v30 = vpop.f32.mrb[14].mxu1  ;;  %v765_v31 = vpop.f32.mrb[15].mxu0 }
 0x112   :  { %673 = vst.msk [vmem:[%s1403_s3 + $0x28] sm:$0xff] %vm667_vm0, %v651_v25  ;;  %v465_v32 = vadd.f32 %v763_v26, %v1294_v34  ;;  %v766_v33 = vadd.f32 %v765_v31, %v764_v28  ;;  %v847_v35 = vpop.f32.mrb[15].mxu1 }
 0x113   :  { %v848_v36 = vadd.f32 %v847_v35, %v846_v30 }
 0x114   :  { %v585_v37 = vadd.f32 %v845_v29, %v465_v32  ;;  %v468_v38 = vadd.f32 %v766_v33, %v1294_v34 }
 0x116   :  { %v652_v39 = vmax.f32 %v585_v37, 0.0  ;;  %v588_v40 = vadd.f32 %v848_v36, %v468_v38  ;;  %v767_v41 = vpop.f32.mrb[16].mxu0 }
 0x117   :  { %v849_v42 = vpop.f32.mrb[16].mxu1  ;;  %v768_v43 = vpop.f32.mrb[17].mxu0 }
 0x118   :  { %674 = vst.msk [vmem:[%s1403_s3 + $0x30] sm:$0xff] %vm667_vm0, %v652_v39  ;;  %v653_v44 = vmax.f32 %v588_v40, 0.0  ;;  %v769_v45 = vadd.f32 %v768_v43, %v767_v41  ;;  %v850_v46 = vpop.f32.mrb[17].mxu1  ;;  %v770_v47 = vpop.f32.mrb[18].mxu0 }
 0x119   :  { %v851_v48 = vadd.f32 %v850_v46, %v849_v42  ;;  %v852_v49 = vpop.f32.mrb[18].mxu1  ;;  %v771_v50 = vpop.f32.mrb[19].mxu0 }
 0x11a   :  { %675 = vst.msk [vmem:[%s1403_s3 + $0x38] sm:$0xff] %vm667_vm0, %v653_v44  ;;  %v473_v51 = vadd.f32 %v769_v45, %v1294_v34  ;;  %v772_v52 = vadd.f32 %v771_v50, %v770_v47  ;;  %v853_v53 = vpop.f32.mrb[19].mxu1 }
 0x11b   :  { %v854_v54 = vadd.f32 %v853_v53, %v852_v49 }
 0x11c   :  { %v593_v55 = vadd.f32 %v851_v48, %v473_v51  ;;  %v476_v56 = vadd.f32 %v772_v52, %v1294_v34 }
 0x11e   :  { %v654_v57 = vmax.f32 %v593_v55, 0.0  ;;  %v596_v58 = vadd.f32 %v854_v54, %v476_v56  ;;  %v773_v59 = vpop.f32.mrb[20].mxu0 }
 0x11f   :  { %v855_v60 = vpop.f32.mrb[20].mxu1  ;;  %v774_v61 = vpop.f32.mrb[21].mxu0 }
 0x120   :  { %676 = vst.msk [vmem:[%s1403_s3 + $0x40] sm:$0xff] %vm667_vm0, %v654_v57  ;;  %v655_v62 = vmax.f32 %v596_v58, 0.0  ;;  %v775_v63 = vadd.f32 %v774_v61, %v773_v59  ;;  %v856_v0 = vpop.f32.mrb[21].mxu1  ;;  %v776_v1 = vpop.f32.mrb[22].mxu0 }
 0x121   :  { %v857_v2 = vadd.f32 %v856_v0, %v855_v60  ;;  %v858_v3 = vpop.f32.mrb[22].mxu1  ;;  %v777_v4 = vpop.f32.mrb[23].mxu0 }
 0x122   :  { %677 = vst.msk [vmem:[%s1403_s3 + $0x48] sm:$0xff] %vm667_vm0, %v655_v62  ;;  %v481_v5 = vadd.f32 %v775_v63, %v1294_v34  ;;  %v778_v6 = vadd.f32 %v777_v4, %v776_v1  ;;  %v859_v7 = vpop.f32.mrb[23].mxu1 }
 0x123   :  { %v860_v8 = vadd.f32 %v859_v7, %v858_v3 }
 0x124   :  { %v601_v9 = vadd.f32 %v857_v2, %v481_v5  ;;  %v484_v10 = vadd.f32 %v778_v6, %v1294_v34 }
 0x126   :  { %v656_v11 = vmax.f32 %v601_v9, 0.0  ;;  %v604_v12 = vadd.f32 %v860_v8, %v484_v10  ;;  %v779_v13 = vpop.f32.mrb[24].mxu0 }
 0x127   :  { %v861_v14 = vpop.f32.mrb[24].mxu1  ;;  %v780_v15 = vpop.f32.mrb[25].mxu0 }
 0x128   :  { %678 = vst.msk [vmem:[%s1403_s3 + $0x50] sm:$0xff] %vm667_vm0, %v656_v11  ;;  %v657_v16 = vmax.f32 %v604_v12, 0.0  ;;  %v781_v17 = vadd.f32 %v780_v15, %v779_v13  ;;  %v862_v18 = vpop.f32.mrb[25].mxu1  ;;  %v782_v19 = vpop.f32.mrb[26].mxu0 }
 0x129   :  { %v863_v20 = vadd.f32 %v862_v18, %v861_v14  ;;  %v864_v21 = vpop.f32.mrb[26].mxu1  ;;  %v783_v22 = vpop.f32.mrb[27].mxu0 }
 0x12a   :  { %679 = vst.msk [vmem:[%s1403_s3 + $0x58] sm:$0xff] %vm667_vm0, %v657_v16  ;;  %v489_v23 = vadd.f32 %v781_v17, %v1294_v34  ;;  %v784_v24 = vadd.f32 %v783_v22, %v782_v19  ;;  %v865_v25 = vpop.f32.mrb[27].mxu1 }
 0x12b   :  { %v866_v26 = vadd.f32 %v865_v25, %v864_v21 }
 0x12c   :  { %v609_v27 = vadd.f32 %v863_v20, %v489_v23  ;;  %v492_v28 = vadd.f32 %v784_v24, %v1294_v34 }
 0x12e   :  { %v658_v29 = vmax.f32 %v609_v27, 0.0  ;;  %v612_v30 = vadd.f32 %v866_v26, %v492_v28  ;;  %v785_v31 = vpop.f32.mrb[28].mxu0 }
 0x12f   :  { %v867_v32 = vpop.f32.mrb[28].mxu1  ;;  %v786_v33 = vpop.f32.mrb[29].mxu0 }
 0x130   :  { %680 = vst.msk [vmem:[%s1403_s3 + $0x60] sm:$0xff] %vm667_vm0, %v658_v29  ;;  %v659_v35 = vmax.f32 %v612_v30, 0.0  ;;  %v787_v36 = vadd.f32 %v786_v33, %v785_v31  ;;  %v868_v37 = vpop.f32.mrb[29].mxu1  ;;  %v788_v38 = vpop.f32.mrb[30].mxu0 }
 0x131   :  { %v869_v39 = vadd.f32 %v868_v37, %v867_v32  ;;  %v870_v40 = vpop.f32.mrb[30].mxu1  ;;  %v789_v41 = vpop.f32.mrb[31].mxu0 }
 0x132   :  { %681 = vst.msk [vmem:[%s1403_s3 + $0x68] sm:$0xff] %vm667_vm0, %v659_v35  ;;  %v497_v42 = vadd.f32 %v787_v36, %v1294_v34  ;;  %v790_v43 = vadd.f32 %v789_v41, %v788_v38  ;;  %v871_v44 = vpop.f32.mrb[31].mxu1 }
 0x133   :  { %v872_v45 = vadd.f32 %v871_v44, %v870_v40 }
 0x134   :  { %v617_v46 = vadd.f32 %v869_v39, %v497_v42  ;;  %v500_v47 = vadd.f32 %v790_v43, %v1294_v34 }
 0x136   :  { %v660_v48 = vmax.f32 %v617_v46, 0.0  ;;  %v620_v49 = vadd.f32 %v872_v45, %v500_v47  ;;  %v791_v50 = vpop.f32.mrb[32].mxu0 }
 0x137   :  { %v873_v51 = vpop.f32.mrb[32].mxu1  ;;  %v792_v52 = vpop.f32.mrb[33].mxu0 }
 0x138   :  { %682 = vst.msk [vmem:[%s1403_s3 + $0x70] sm:$0xff] %vm667_vm0, %v660_v48  ;;  %v661_v53 = vmax.f32 %v620_v49, 0.0  ;;  %v793_v54 = vadd.f32 %v792_v52, %v791_v50  ;;  %v874_v55 = vpop.f32.mrb[33].mxu1  ;;  %v794_v56 = vpop.f32.mrb[34].mxu0 }
 0x139   :  { %v875_v57 = vadd.f32 %v874_v55, %v873_v51  ;;  %v876_v58 = vpop.f32.mrb[34].mxu1  ;;  %v795_v59 = vpop.f32.mrb[35].mxu0 }
 0x13a   :  { %683 = vst.msk [vmem:[%s1403_s3 + $0x78] sm:$0xff] %vm667_vm0, %v661_v53  ;;  %v505_v60 = vadd.f32 %v793_v54, %v1294_v34  ;;  %v796_v61 = vadd.f32 %v795_v59, %v794_v56  ;;  %v877_v62 = vpop.f32.mrb[35].mxu1 }
 0x13b   :  { %v878_v63 = vadd.f32 %v877_v62, %v876_v58 }
 0x13c   :  { %v625_v0 = vadd.f32 %v875_v57, %v505_v60  ;;  %v508_v1 = vadd.f32 %v796_v61, %v1294_v34 }
 0x13e   :  { %v662_v2 = vmax.f32 %v625_v0, 0.0  ;;  %v628_v3 = vadd.f32 %v878_v63, %v508_v1  ;;  %v797_v4 = vpop.f32.mrb[36].mxu0 }
 0x13f   :  { %v879_v5 = vpop.f32.mrb[36].mxu1  ;;  %v798_v6 = vpop.f32.mrb[37].mxu0 }
 0x140   :  { %684 = vst.msk [vmem:[%s1403_s3 + $0x80] sm:$0xff] %vm667_vm0, %v662_v2  ;;  %v663_v7 = vmax.f32 %v628_v3, 0.0  ;;  %v799_v8 = vadd.f32 %v798_v6, %v797_v4  ;;  %v880_v9 = vpop.f32.mrb[37].mxu1  ;;  %v800_v10 = vpop.f32.mrb[38].mxu0 }
 0x141   :  { %v881_v11 = vadd.f32 %v880_v9, %v879_v5  ;;  %v882_v12 = vpop.f32.mrb[38].mxu1  ;;  %v801_v13 = vpop.f32.mrb[39].mxu0 }
 0x142   :  { %685 = vst.msk [vmem:[%s1403_s3 + $0x88] sm:$0xff] %vm667_vm0, %v663_v7  ;;  %v513_v14 = vadd.f32 %v799_v8, %v1294_v34  ;;  %v802_v15 = vadd.f32 %v801_v13, %v800_v10  ;;  %v883_v16 = vpop.f32.mrb[39].mxu1 }
 0x143   :  { %v884_v17 = vadd.f32 %v883_v16, %v882_v12 }
 0x144   :  { %v633_v18 = vadd.f32 %v881_v11, %v513_v14  ;;  %v516_v19 = vadd.f32 %v802_v15, %v1294_v34 }
 0x146   :  { %v664_v20 = vmax.f32 %v633_v18, 0.0  ;;  %v636_v21 = vadd.f32 %v884_v17, %v516_v19  ;;  %v803_v22 = vpop.f32.mrb[40].mxu0 }
 0x147   :  { %v885_v23 = vpop.f32.mrb[40].mxu1  ;;  %v804_v24 = vpop.f32.mrb[41].mxu0 }
 0x148   :  { %686 = vst.msk [vmem:[%s1403_s3 + $0x90] sm:$0xff] %vm667_vm0, %v664_v20  ;;  %v665_v25 = vmax.f32 %v636_v21, 0.0  ;;  %v805_v26 = vadd.f32 %v804_v24, %v803_v22  ;;  %v886_v27 = vpop.f32.mrb[41].mxu1  ;;  %v806_v28 = vpop.f32.mrb[42].mxu0 }
 0x149   :  { %v887_v29 = vadd.f32 %v886_v27, %v885_v23  ;;  %v888_v30 = vpop.f32.mrb[42].mxu1  ;;  %v807_v31 = vpop.f32.mrb[43].mxu0 }
 0x14a   :  { %687 = vst.msk [vmem:[%s1403_s3 + $0x98] sm:$0xff] %vm667_vm0, %v665_v25  ;;  %v521_v32 = vadd.f32 %v805_v26, %v1294_v34  ;;  %v889_v33 = vpop.f32.mrb[43].mxu1 }
 0x14c   :  { %v641_v35 = vadd.f32 %v887_v29, %v521_v32 }
 0x14e   :  { %v666_v36 = vmax.f32 %v641_v35, 0.0 }
 0x150   :  { %689 = vst.msk [vmem:[%s1403_s3 + $0xa0] sm:$0x3] %vm688_vm1, %v666_v36 }

// kernel: deep_q_forward.6
= control target key start
LH: loop header
LB: loop body
LE: loop exit
PB: predicated region body
PF: predicated region fallthrough
CT: control target
= control target key end

     0   :  { %v980_v39 = vmov 0.0   ;;  %vm981_vm0 = vmmov 0   ;;  %vm410_vm1 = vcmask 523264   ;;  %vm721_vm2 = vcmask 517120   ;;  %s1427_s1 = inlined_call_operand.vmem [shape: bf16[576,64], index: 1, kind: input, shape index: {}]   ;;  %s1428_s0 = inlined_call_operand.vmem [shape: f32[98,576], index: 0, kind: input, shape index: {}]   ;;  %s1429_s2 = inlined_call_operand.vmem [shape: f32[1,64], index: 2, kind: input, shape index: {}]   ;;  %s1430_s3 = inlined_call_operand.vmem [shape: f32[98,64], index: 3, kind: output, shape index: {}]  }
   0x1   :  { %v944_v0 = vld [vmem:[%s1427_s1 + $0x40] sm:$0xff]   ;;  %v948_v4 = vld [vmem:[%s1427_s1 + $0x48] sm:$0xff]   ;;  %v952_v8 = vld [vmem:[%s1427_s1 + $0x50] sm:$0xff]  }
   0x2   :  { %v945_v1 = vld [vmem:[%s1427_s1 + $0xc0] sm:$0xff]   ;;  %771 = vmatprep.subr.bf16.mxu0 %v944_v0  ;;  %v949_v5 = vld [vmem:[%s1427_s1 + $0xc8] sm:$0xff]   ;;  %v953_v9 = vld [vmem:[%s1427_s1 + $0xd0] sm:$0xff]  }
   0x3   :  { %v946_v2 = vld [vmem:[%s1427_s1] sm:$0xff]   ;;  %829 = vmatprep.subr.bf16.mxu1 %v945_v1  ;;  %v950_v6 = vld [vmem:[%s1427_s1 + $0x8] sm:$0xff]   ;;  %v954_v10 = vld [vmem:[%s1427_s1 + $0x10] sm:$0xff]  }
   0x4   :  { %v947_v3 = vld [vmem:[%s1427_s1 + $0x80] sm:$0xff]   ;;  %772 = vmatpush3.bf16.msra.mxu0 %v946_v2  ;;  %v951_v7 = vld [vmem:[%s1427_s1 + $0x88] sm:$0xff]   ;;  %v955_v11 = vld [vmem:[%s1427_s1 + $0x90] sm:$0xff]  }
   0x5   :  { %830 = vmatpush3.bf16.msra.mxu1 %v947_v3  ;;  %773 = vmatprep.subr.bf16.mxu0 %v948_v4  ;;  %v956_v12 = vld [vmem:[%s1427_s1 + $0x58] sm:$0xff]   ;;  %v960_v16 = vld [vmem:[%s1427_s1 + $0x60] sm:$0xff]   ;;  %v964_v20 = vld [vmem:[%s1427_s1 + $0x68] sm:$0xff]  }
   0x6   :  { %831 = vmatprep.subr.bf16.mxu1 %v949_v5  ;;  %v957_v13 = vld [vmem:[%s1427_s1 + $0xd8] sm:$0xff]   ;;  %v961_v17 = vld [vmem:[%s1427_s1 + $0xe0] sm:$0xff]   ;;  %v965_v21 = vld [vmem:[%s1427_s1 + $0xe8] sm:$0xff]  }
   0x7   :  { %v958_v14 = vld [vmem:[%s1427_s1 + $0x18] sm:$0xff]   ;;  %v962_v18 = vld [vmem:[%s1427_s1 + $0x20] sm:$0xff]   ;;  %v966_v22 = vld [vmem:[%s1427_s1 + $0x28] sm:$0xff]  }
   0x8   :  { %774 = vmatpush3.bf16.msra.mxu0 %v950_v6  ;;  %v959_v15 = vld [vmem:[%s1427_s1 + $0x98] sm:$0xff]   ;;  %v963_v19 = vld [vmem:[%s1427_s1 + $0xa0] sm:$0xff]   ;;  %v967_v23 = vld [vmem:[%s1427_s1 + $0xa8] sm:$0xff]  }
   0x9   :  { %832 = vmatpush3.bf16.msra.mxu1 %v951_v7  ;;  %775 = vmatprep.subr.bf16.mxu0 %v952_v8  ;;  %v968_v24 = vld [vmem:[%s1427_s1 + $0x70] sm:$0xff]   ;;  %v972_v28 = vld [vmem:[%s1427_s1 + $0x78] sm:$0xff]   ;;  %v16_v32 = vld [vmem:[%s1428_s0 + $0x8] sm:$0xff] }
   0xa   :  { %833 = vmatprep.subr.bf16.mxu1 %v953_v9  ;;  %v969_v25 = vld [vmem:[%s1427_s1 + $0xf0] sm:$0xff]   ;;  %v973_v29 = vld [vmem:[%s1427_s1 + $0xf8] sm:$0xff]   ;;  %v23_v36 = vld [vmem:[%s1428_s0 + $0x40] sm:$0xff] }
   0xb   :  { %v970_v26 = vld [vmem:[%s1427_s1 + $0x30] sm:$0xff]   ;;  %v974_v30 = vld [vmem:[%s1427_s1 + $0x38] sm:$0xff]   ;;  %v15_v37 = vld [vmem:[%s1428_s0] sm:$0xff] }
   0xc   :  { %776 = vmatpush3.bf16.msra.mxu0 %v954_v10  ;;  %v971_v27 = vld [vmem:[%s1427_s1 + $0xb0] sm:$0xff]   ;;  %v975_v31 = vld [vmem:[%s1427_s1 + $0xb8] sm:$0xff]   ;;  %v20_v38 = vld [vmem:[%s1428_s0 + $0x28] sm:$0xff] }
   0xd   :  { %834 = vmatpush3.bf16.msra.mxu1 %v955_v11  ;;  %777 = vmatprep.subr.bf16.mxu0 %v956_v12  ;;  %v21_v33 = vld [vmem:[%s1428_s0 + $0x30] sm:$0xff]  ;;  %v18_v34 = vld [vmem:[%s1428_s0 + $0x18] sm:$0xff]  ;;  %v80_v41 = vpack.c.bf16 %v20_v38, %v15_v37  ;;  %v976_v45 = vld [vmem:[%s1427_s1 + $0x100] sm:$0xff]  }
   0xe   :  { %835 = vmatprep.subr.bf16.mxu1 %v957_v13  ;;  %v81_v35 = vpack.c.bf16 %v21_v33, %v16_v32  ;;  %v83_v40 = vpack.c.bf16 %v23_v36, %v18_v34  ;;  %v17_v42 = vld [vmem:[%s1428_s0 + $0x10] sm:$0xff]  ;;  %v22_v43 = vld [vmem:[%s1428_s0 + $0x38] sm:$0xff]  ;;  %v31_v47 = vld [vmem:[%s1428_s0 + $0x80] sm:$0xff] }
   0xf   :  { %v82_v44 = vpack.c.bf16 %v22_v43, %v17_v42  ;;  %v26_v46 = vld [vmem:[%s1428_s0 + $0x58] sm:$0xff]  ;;  %v28_v48 = vld [vmem:[%s1428_s0 + $0x68] sm:$0xff]  ;;  %v33_v49 = vld [vmem:[%s1428_s0 + $0x90] sm:$0xff] }
  0x10   :  { %778 = vmatpush3.bf16.msra.mxu0 %v958_v14  ;;  %464 = vmatprep.mubr.bf16.mxu0 %v81_v35  ;;  %v86_v50 = vpack.c.bf16 %v31_v47, %v26_v46  ;;  %v88_v51 = vpack.c.bf16 %v33_v49, %v28_v48  ;;  %v25_v52 = vld [vmem:[%s1428_s0 + $0x50] sm:$0xff]  ;;  %v30_v53 = vld [vmem:[%s1428_s0 + $0x78] sm:$0xff]  ;;  %v27_v54 = vld [vmem:[%s1428_s0 + $0x60] sm:$0xff] }
  0x11   :  { %836 = vmatpush3.bf16.msra.mxu1 %v959_v15  ;;  %779 = vmatprep.subr.bf16.mxu0 %v960_v16  ;;  %v32_v55 = vld [vmem:[%s1428_s0 + $0x88] sm:$0xff]  ;;  %v41_v57 = vld [vmem:[%s1428_s0 + $0xd0] sm:$0xff]  ;;  %v38_v58 = vld [vmem:[%s1428_s0 + $0xb8] sm:$0xff]  ;;  %v85_v60 = vpack.c.bf16 %v30_v53, %v25_v52 }
  0x12   :  { %837 = vmatprep.subr.bf16.mxu1 %v961_v17  ;;  %552 = vmatprep.mubr.bf16.mxu1 %v83_v40  ;;  %v36_v56 = vld [vmem:[%s1428_s0 + $0xa8] sm:$0xff]  ;;  %v43_v59 = vld [vmem:[%s1428_s0 + $0xe0] sm:$0xff]  ;;  %v87_v62 = vpack.c.bf16 %v32_v55, %v27_v54  ;;  %v37_v3 = vld [vmem:[%s1428_s0 + $0xb0] sm:$0xff] }
  0x13   :  { %v977_v61 = vld [vmem:[%s1427_s1 + $0x108] sm:$0xff]   ;;  %v91_v63 = vpack.c.bf16 %v41_v57, %v36_v56  ;;  %v93_v0 = vpack.c.bf16 %v43_v59, %v38_v58  ;;  %v35_v1 = vld [vmem:[%s1428_s0 + $0xa0] sm:$0xff]  ;;  %v978_v4 = vld [vmem:[%s1427_s1 + $0x110] sm:$0xff]  }
  0x14   :  { %780 = vmatpush3.bf16.msra.mxu0 %v962_v18  ;;  %v40_v2 = vld [vmem:[%s1428_s0 + $0xc8] sm:$0xff]  ;;  %v42_v5 = vld [vmem:[%s1428_s0 + $0xd8] sm:$0xff]  ;;  %v51_v7 = vld [vmem:[%s1428_s0 + $0x120] sm:$0xff] }
  0x15   :  { %838 = vmatpush3.bf16.msra.mxu1 %v963_v19  ;;  %781 = vmatprep.subr.bf16.mxu0 %v964_v20  ;;  %v46_v6 = vld [vmem:[%s1428_s0 + $0xf8] sm:$0xff]  ;;  %v48_v8 = vld [vmem:[%s1428_s0 + $0x108] sm:$0xff]  ;;  %v53_v9 = vld [vmem:[%s1428_s0 + $0x130] sm:$0xff]  ;;  %v90_v10 = vpack.c.bf16 %v40_v2, %v35_v1  ;;  %v92_v11 = vpack.c.bf16 %v42_v5, %v37_v3 }
  0x16   :  { %839 = vmatprep.subr.bf16.mxu1 %v965_v21  ;;  %v96_v12 = vpack.c.bf16 %v51_v7, %v46_v6  ;;  %v98_v13 = vpack.c.bf16 %v53_v9, %v48_v8  ;;  %v979_v14 = vld [vmem:[%s1427_s1 + $0x118] sm:$0xff]   ;;  %v45_v15 = vld [vmem:[%s1428_s0 + $0xf0] sm:$0xff]  ;;  %v47_v17 = vld [vmem:[%s1428_s0 + $0x100] sm:$0xff] }
  0x17   :  { %v50_v16 = vld [vmem:[%s1428_s0 + $0x118] sm:$0xff]  ;;  %v52_v18 = vld [vmem:[%s1428_s0 + $0x128] sm:$0xff]  ;;  %v61_v20 = vld [vmem:[%s1428_s0 + $0x170] sm:$0xff] }
  0x18   :  { %782 = vmatpush3.bf16.msra.mxu0 %v966_v22  ;;  %v56_v19 = vld [vmem:[%s1428_s0 + $0x148] sm:$0xff]  ;;  %v58_v21 = vld [vmem:[%s1428_s0 + $0x158] sm:$0xff]  ;;  %v63_v22 = vld [vmem:[%s1428_s0 + $0x180] sm:$0xff] }
  0x19   :  { %840 = vmatpush3.bf16.msra.mxu1 %v967_v23  ;;  %783 = vmatprep.subr.bf16.mxu0 %v968_v24  ;;  %v95_v23 = vpack.c.bf16 %v50_v16, %v45_v15  ;;  %v97_v24 = vpack.c.bf16 %v52_v18, %v47_v17  ;;  %v71_v32 = vld [vmem:[%s1428_s0 + $0x1c0] sm:$0xff]  ;;  %v68_v33 = vld [vmem:[%s1428_s0 + $0x1a8] sm:$0xff]  ;;  %v73_v34 = vld [vmem:[%s1428_s0 + $0x1d0] sm:$0xff] }
  0x1a   :  { %841 = vmatprep.subr.bf16.mxu1 %v969_v25  ;;  %v101_v25 = vpack.c.bf16 %v61_v20, %v56_v19  ;;  %v108_v38 = vpack.c.bf16 %v73_v34, %v68_v33  ;;  %v65_v40 = vld [vmem:[%s1428_s0 + $0x190] sm:$0xff]  ;;  %v67_v42 = vld [vmem:[%s1428_s0 + $0x1a0] sm:$0xff]  ;;  %v72_v43 = vld [vmem:[%s1428_s0 + $0x1c8] sm:$0xff] }
  0x1b   :  { %v107_v47 = vpack.c.bf16 %v72_v43, %v67_v42  ;;  %v19_v54 = vld [vmem:[%s1428_s0 + $0x20] sm:$0xff]  ;;  %v24_v55 = vld [vmem:[%s1428_s0 + $0x48] sm:$0xff]  ;;  %v49_v7 = vld [vmem:[%s1428_s0 + $0x110] sm:$0xff] }
  0x1c   :  { %784 = vmatpush3.bf16.msra.mxu0 %v970_v26  ;;  %v103_v26 = vpack.c.bf16 %v63_v22, %v58_v21  ;;  %v59_v56 = vld [vmem:[%s1428_s0 + $0x160] sm:$0xff]  ;;  %v64_v57 = vld [vmem:[%s1428_s0 + $0x188] sm:$0xff]  ;;  %v84_v58 = vpack.c.bf16 %v24_v55, %v19_v54  ;;  %v54_v8 = vld [vmem:[%s1428_s0 + $0x138] sm:$0xff] }
  0x1d   :  { %842 = vmatpush3.bf16.msra.mxu1 %v971_v27  ;;  %785 = vmatprep.subr.bf16.mxu0 %v972_v28  ;;  %v55_v27 = vld [vmem:[%s1428_s0 + $0x140] sm:$0xff]  ;;  %v60_v28 = vld [vmem:[%s1428_s0 + $0x168] sm:$0xff]  ;;  %v104_v59 = vpack.c.bf16 %v64_v57, %v59_v56  ;;  %v99_v9 = vpack.c.bf16 %v54_v8, %v49_v7 }
  0x1e   :  { %843 = vmatprep.subr.bf16.mxu1 %v973_v29  ;;  %v57_v29 = vld [vmem:[%s1428_s0 + $0x150] sm:$0xff]  ;;  %v100_v35 = vpack.c.bf16 %v60_v28, %v55_v27  ;;  %v39_v2 = vld [vmem:[%s1428_s0 + $0xc0] sm:$0xff]  ;;  %v44_v3 = vld [vmem:[%s1428_s0 + $0xe8] sm:$0xff] }
  0x1f   :  { %v94_v5 = vpack.c.bf16 %v44_v3, %v39_v2 }
  0x20   :  { %786 = vmatpush3.bf16.msra.mxu0 %v974_v30  ;;  %v62_v30 = vld [vmem:[%s1428_s0 + $0x178] sm:$0xff] }
  0x21   :  { %844 = vmatpush3.bf16.msra.mxu1 %v975_v31  ;;  %898 = vmatprep.subr.bf16.mxu0 %v980_v39  ;;  %v66_v31 = vld [vmem:[%s1428_s0 + $0x198] sm:$0xff]  ;;  %v102_v36 = vpack.c.bf16 %v62_v30, %v57_v29 }
  0x22   :  { %934 = vmatprep.subr.bf16.mxu1 %v980_v39  ;;  %v106_v37 = vpack.c.bf16 %v71_v32, %v66_v31 }
  0x23   :  { %465 = vmatmul.mubr.bf16.vlgmr.msra.gmra.mrb[0].mxu0 %v80_v41  ;;  %v70_v41 = vld [vmem:[%s1428_s0 + $0x1b8] sm:$0xff] }
  0x24   :  { %553 = vmatmul.mubr.bf16.vlgmr.msra.gmra.mrb[0].mxu1 %v82_v44  ;;  %899 = vmatpush3.bf16.msra.mxu0 %v976_v45  ;;  %v76_v44 = vld [vmem:[%s1428_s0 + $0x1e8] sm:$0x3]  ;;  %v105_v46 = vpack.c.bf16 %v70_v41, %v65_v40 }
  0x25   :  { %938 = vmatpush3.bf16.msra.mxu1 %v976_v45  ;;  %900 = vmatprep.subr.bf16.mxu0 %v980_v39  ;;  %v78_v45 = vld [vmem:[%s1428_s0 + $0x1f8] sm:$0x3]  ;;  %v111_v48 = vpack.c.bf16 %v76_v44, %v76_v44 }
  0x26   :  { %472 = vmatprep.mubr.bf16.mxu0 %v86_v50  ;;  %560 = vmatprep.mubr.bf16.mxu1 %v88_v51  ;;  %v113_v49 = vpack.c.bf16 %v78_v45, %v78_v45  ;;  %v75_v50 = vld [vmem:[%s1428_s0 + $0x1e0] sm:$0x3]  ;;  %v77_v51 = vld [vmem:[%s1428_s0 + $0x1f0] sm:$0x3] }
  0x27   :  { %935 = vmatprep.subr.bf16.mxu1 %v980_v39  ;;  %v110_v52 = vpack.c.bf16 %v75_v50, %v75_v50  ;;  %v112_v53 = vpack.c.bf16 %v77_v51, %v77_v51 }
  0x28   :  { %901 = vmatpush3.bf16.msra.mxu0 %v977_v61 }
  0x29   :  { %939 = vmatpush3.bf16.msra.mxu1 %v977_v61  ;;  %902 = vmatprep.subr.bf16.mxu0 %v980_v39  ;;  %v34_v61 = vld [vmem:[%s1428_s0 + $0x98] sm:$0xff] }
  0x2a   :  { %936 = vmatprep.subr.bf16.mxu1 %v980_v39 }
  0x2b   :  { %473 = vmatmul.mubr.bf16.gmra.mrb[4].mxu0 %v85_v60  ;;  %v29_v60 = vld [vmem:[%s1428_s0 + $0x70] sm:$0xff] }
  0x2c   :  { %561 = vmatmul.mubr.bf16.gmra.mrb[4].mxu1 %v87_v62  ;;  %480 = vmatprep.mubr.bf16.mxu0 %v91_v63  ;;  %v69_v62 = vld [vmem:[%s1428_s0 + $0x1b0] sm:$0xff]  ;;  %v74_v63 = vld [vmem:[%s1428_s0 + $0x1d8] sm:$0xff] }
  0x2d   :  { %568 = vmatprep.mubr.bf16.mxu1 %v93_v0  ;;  %903 = vmatpush3.bf16.msra.mxu0 %v978_v4  ;;  %v89_v0 = vpack.c.bf16 %v34_v61, %v29_v60  ;;  %v109_v1 = vpack.c.bf16 %v74_v63, %v69_v62 }
  0x2e   :  { %940 = vmatpush3.bf16.msra.mxu1 %v978_v4  ;;  %904 = vmatprep.subr.bf16.mxu0 %v980_v39  ;;  %v79_v4 = vld [vmem:[%s1428_s0 + $0x200] sm:$0x3] }
  0x2f   :  { %937 = vmatprep.subr.bf16.mxu1 %v980_v39  ;;  %v114_v6 = vpack.c.bf16 %v79_v4, %v79_v4 }
  0x31   :  { %905 = vmatpush3.bf16.msra.mxu0 %v979_v14 }
  0x32   :  { %941 = vmatpush3.bf16.msra.mxu1 %v979_v14 }
  0x33   :  { %481 = vmatmul.mubr.bf16.gmra.mrb[8].mxu0 %v90_v10 }
  0x34   :  { %569 = vmatmul.mubr.bf16.gmra.mrb[8].mxu1 %v92_v11  ;;  %488 = vmatprep.mubr.bf16.mxu0 %v96_v12  ;;  %v1337_v11 = vld [vmem:[%s1429_s2] ss:$0 sm:$0xff] }
  0x35   :  { %576 = vmatprep.mubr.bf16.mxu1 %v98_v13 }
  0x3b   :  { %489 = vmatmul.mubr.bf16.gmra.mrb[12].mxu0 %v95_v23 }
  0x3c   :  { %577 = vmatmul.mubr.bf16.gmra.mrb[12].mxu1 %v97_v24  ;;  %496 = vmatprep.mubr.bf16.mxu0 %v101_v25 }
  0x3d   :  { %584 = vmatprep.mubr.bf16.mxu1 %v103_v26 }
  0x43   :  { %497 = vmatmul.mubr.bf16.gmra.mrb[16].mxu0 %v100_v35 }
  0x44   :  { %585 = vmatmul.mubr.bf16.gmra.mrb[16].mxu1 %v102_v36  ;;  %504 = vmatprep.mubr.bf16.mxu0 %v106_v37 }
  0x45   :  { %592 = vmatprep.mubr.bf16.mxu1 %v108_v38 }
  0x4b   :  { %505 = vmatmul.mubr.bf16.gmra.mrb[20].mxu0 %v105_v46 }
  0x4c   :  { %593 = vmatmul.mubr.bf16.gmra.mrb[20].mxu1 %v107_v47  ;;  %512 = vmatprep.mubr.bf16.mxu0 %v111_v48 }
  0x4d   :  { %600 = vmatprep.mubr.bf16.mxu1 %v113_v49 }
  0x53   :  { %513 = vmatmul.mubr.bf16.gmra.mrb[24].mxu0 %v110_v52 }
  0x54   :  { %601 = vmatmul.mubr.bf16.gmra.mrb[24].mxu1 %v112_v53  ;;  %906 = vmatprep.mubr.msk.bf16.mxu0 %vm981_vm0, %v980_v39 }
  0x55   :  { %922 = vmatprep.mubr.msk.bf16.mxu1 %vm981_vm0, %v980_v39 }
  0x5b   :  { %907 = vmatmul.mubr.msk.bf16.vlgmr.msra.gmra.mrb[28].mxu0 %vm410_vm1, %v84_v58 }
  0x5c   :  { %923 = vmatmul.mubr.msk.bf16.vlgmr.msra.gmra.mrb[28].mxu1 %vm410_vm1, %v104_v59  ;;  %910 = vmatprep.mubr.msk.bf16.mxu0 %vm981_vm0, %v980_v39 }
  0x5d   :  { %926 = vmatprep.mubr.msk.bf16.mxu1 %vm981_vm0, %v980_v39 }
  0x63   :  { %911 = vmatmul.mubr.msk.bf16.gmra.mrb[32].mxu0 %vm410_vm1, %v89_v0 }
  0x64   :  { %927 = vmatmul.mubr.msk.bf16.gmra.mrb[32].mxu1 %vm410_vm1, %v109_v1  ;;  %914 = vmatprep.mubr.msk.bf16.mxu0 %vm981_vm0, %v980_v39 }
  0x65   :  { %930 = vmatprep.mubr.msk.bf16.mxu1 %vm981_vm0, %v980_v39 }
  0x6b   :  { %915 = vmatmul.mubr.msk.bf16.gmra.mrb[36].mxu0 %vm410_vm1, %v94_v5 }
  0x6c   :  { %931 = vmatmul.mubr.msk.bf16.gmra.mrb[36].mxu1 %vm410_vm1, %v114_v6  ;;  %918 = vmatprep.mubr.msk.bf16.mxu0 %vm981_vm0, %v980_v39 }
  0x73   :  { %919 = vmatmul.mubr.msk.bf16.gmra.mrb[40].mxu0 %vm410_vm1, %v99_v9 }
  0xf6   :  { %v787_v10 = vpop.f32.mrb[0].mxu0 }
  0xf7   :  { %v788_v12 = vpop.f32.mrb[1].mxu0  ;;  %v845_v13 = vpop.f32.mrb[0].mxu1 }
  0xf8   :  { %v789_v39 = vadd.f32 %v788_v12, %v787_v10  ;;  %v790_v14 = vpop.f32.mrb[2].mxu0  ;;  %v846_v15 = vpop.f32.mrb[1].mxu1 }
  0xf9   :  { %v791_v16 = vpop.f32.mrb[3].mxu0  ;;  %v847_v17 = vadd.f32 %v846_v15, %v845_v13  ;;  %v848_v18 = vpop.f32.mrb[2].mxu1 }
  0xfa   :  { %v467_v19 = vadd.f32 %v789_v39, %v1337_v11  ;;  %v792_v20 = vadd.f32 %v791_v16, %v790_v14  ;;  %v849_v21 = vpop.f32.mrb[3].mxu1 }
  0xfb   :  { %v850_v22 = vadd.f32 %v849_v21, %v848_v18 }
  0xfc   :  { %v470_v23 = vadd.f32 %v792_v20, %v1337_v11  ;;  %v1341_v24 = vadd.f32 %v847_v17, %v467_v19 }
  0xfe   :  { %v793_v25 = vpop.f32.mrb[4].mxu0  ;;  %v1343_v26 = vadd.f32 %v850_v22, %v470_v23 }
  0xff   :  { %v794_v27 = vpop.f32.mrb[5].mxu0  ;;  %v851_v28 = vpop.f32.mrb[4].mxu1 }
 0x100   :  { %v795_v29 = vadd.f32 %v794_v27, %v793_v25  ;;  %v796_v30 = vpop.f32.mrb[6].mxu0  ;;  %v852_v31 = vpop.f32.mrb[5].mxu1 }
 0x101   :  { %v797_v32 = vpop.f32.mrb[7].mxu0  ;;  %v853_v33 = vadd.f32 %v852_v31, %v851_v28  ;;  %v854_v34 = vpop.f32.mrb[6].mxu1 }
 0x102   :  { %v475_v35 = vadd.f32 %v795_v29, %v1337_v11  ;;  %v798_v36 = vadd.f32 %v797_v32, %v796_v30  ;;  %v855_v37 = vpop.f32.mrb[7].mxu1 }
 0x103   :  { %v856_v38 = vadd.f32 %v855_v37, %v854_v34 }
 0x104   :  { %v478_v40 = vadd.f32 %v798_v36, %v1337_v11  ;;  %v1347_v41 = vadd.f32 %v853_v33, %v475_v35 }
 0x106   :  { %v799_v42 = vpop.f32.mrb[8].mxu0  ;;  %v1349_v43 = vadd.f32 %v856_v38, %v478_v40 }
 0x107   :  { %v800_v44 = vpop.f32.mrb[9].mxu0  ;;  %v857_v45 = vpop.f32.mrb[8].mxu1 }
 0x108   :  { %v801_v46 = vadd.f32 %v800_v44, %v799_v42  ;;  %v802_v47 = vpop.f32.mrb[10].mxu0  ;;  %v858_v48 = vpop.f32.mrb[9].mxu1 }
 0x109   :  { %v803_v49 = vpop.f32.mrb[11].mxu0  ;;  %v859_v50 = vadd.f32 %v858_v48, %v857_v45  ;;  %v860_v51 = vpop.f32.mrb[10].mxu1 }
 0x10a   :  { %v483_v52 = vadd.f32 %v801_v46, %v1337_v11  ;;  %v804_v53 = vadd.f32 %v803_v49, %v802_v47  ;;  %v861_v54 = vpop.f32.mrb[11].mxu1 }
 0x10b   :  { %v862_v55 = vadd.f32 %v861_v54, %v860_v51 }
 0x10c   :  { %v486_v56 = vadd.f32 %v804_v53, %v1337_v11  ;;  %v1353_v57 = vadd.f32 %v859_v50, %v483_v52 }
 0x10e   :  { %v805_v58 = vpop.f32.mrb[12].mxu0  ;;  %v1355_v59 = vadd.f32 %v862_v55, %v486_v56 }
 0x10f   :  { %v806_v60 = vpop.f32.mrb[13].mxu0  ;;  %v863_v61 = vpop.f32.mrb[12].mxu1 }
 0x110   :  { %v807_v62 = vadd.f32 %v806_v60, %v805_v58  ;;  %v808_v63 = vpop.f32.mrb[14].mxu0  ;;  %v864_v0 = vpop.f32.mrb[13].mxu1 }
 0x111   :  { %v809_v1 = vpop.f32.mrb[15].mxu0  ;;  %v865_v2 = vadd.f32 %v864_v0, %v863_v61  ;;  %v866_v3 = vpop.f32.mrb[14].mxu1 }
 0x112   :  { %v491_v4 = vadd.f32 %v807_v62, %v1337_v11  ;;  %v810_v5 = vadd.f32 %v809_v1, %v808_v63  ;;  %v867_v6 = vpop.f32.mrb[15].mxu1 }
 0x113   :  { %v868_v7 = vadd.f32 %v867_v6, %v866_v3 }
 0x114   :  { %v494_v8 = vadd.f32 %v810_v5, %v1337_v11  ;;  %v1359_v9 = vadd.f32 %v865_v2, %v491_v4 }
 0x116   :  { %v811_v10 = vpop.f32.mrb[16].mxu0  ;;  %v1361_v12 = vadd.f32 %v868_v7, %v494_v8 }
 0x117   :  { %v812_v13 = vpop.f32.mrb[17].mxu0  ;;  %v869_v39 = vpop.f32.mrb[16].mxu1 }
 0x118   :  { %v813_v14 = vadd.f32 %v812_v13, %v811_v10  ;;  %v814_v15 = vpop.f32.mrb[18].mxu0  ;;  %v870_v16 = vpop.f32.mrb[17].mxu1 }
 0x119   :  { %v815_v17 = vpop.f32.mrb[19].mxu0  ;;  %v871_v18 = vadd.f32 %v870_v16, %v869_v39  ;;  %v872_v19 = vpop.f32.mrb[18].mxu1 }
 0x11a   :  { %v499_v20 = vadd.f32 %v813_v14, %v1337_v11  ;;  %v816_v21 = vadd.f32 %v815_v17, %v814_v15  ;;  %v873_v22 = vpop.f32.mrb[19].mxu1 }
 0x11b   :  { %v874_v23 = vadd.f32 %v873_v22, %v872_v19 }
 0x11c   :  { %v502_v25 = vadd.f32 %v816_v21, %v1337_v11  ;;  %v587_v27 = vadd.f32 %v871_v18, %v499_v20 }
 0x11e   :  { %v817_v28 = vpop.f32.mrb[20].mxu0  ;;  %v590_v29 = vadd.f32 %v874_v23, %v502_v25 }
 0x11f   :  { %v818_v30 = vpop.f32.mrb[21].mxu0  ;;  %v875_v31 = vpop.f32.mrb[20].mxu1 }
 0x120   :  { %v819_v32 = vadd.f32 %v818_v30, %v817_v28  ;;  %v820_v33 = vpop.f32.mrb[22].mxu0  ;;  %v876_v34 = vpop.f32.mrb[21].mxu1 }
 0x121   :  { %v821_v35 = vpop.f32.mrb[23].mxu0  ;;  %v877_v36 = vadd.f32 %v876_v34, %v875_v31  ;;  %v878_v37 = vpop.f32.mrb[22].mxu1 }
 0x122   :  { %v507_v38 = vadd.f32 %v819_v32, %v1337_v11  ;;  %v822_v40 = vadd.f32 %v821_v35, %v820_v33  ;;  %v879_v42 = vpop.f32.mrb[23].mxu1 }
 0x123   :  { %v880_v44 = vadd.f32 %v879_v42, %v878_v37 }
 0x124   :  { %v510_v45 = vadd.f32 %v822_v40, %v1337_v11  ;;  %v595_v46 = vadd.f32 %v877_v36, %v507_v38 }
 0x126   :  { %v823_v47 = vpop.f32.mrb[24].mxu0  ;;  %v598_v48 = vadd.f32 %v880_v44, %v510_v45 }
 0x127   :  { %v824_v49 = vpop.f32.mrb[25].mxu0  ;;  %v881_v50 = vpop.f32.mrb[24].mxu1 }
 0x128   :  { %v825_v51 = vadd.f32 %v824_v49, %v823_v47  ;;  %v826_v52 = vpop.f32.mrb[26].mxu0  ;;  %v882_v53 = vpop.f32.mrb[25].mxu1 }
 0x129   :  { %v827_v54 = vpop.f32.mrb[27].mxu0  ;;  %v883_v55 = vadd.f32 %v882_v53, %v881_v50  ;;  %v884_v56 = vpop.f32.mrb[26].mxu1 }
 0x12a   :  { %v515_v58 = vadd.f32 %v825_v51, %v1337_v11  ;;  %v885_v60 = vpop.f32.mrb[27].mxu1 }
 0x12c   :  { %v603_v61 = vadd.f32 %v883_v55, %v515_v58 }
 0x12e   :  { %v642_v62 = vpop.f32.mrb[28].mxu0 }
 0x12f   :  { %v643_v63 = vadd.f32 %v642_v62, %v1341_v24  ;;  %v674_v0 = vpop.f32.mrb[28].mxu1  ;;  %v908_v1 = vpop.f32.mrb[29].mxu0 }
 0x130   :  { %v675_v2 = vadd.f32 %v674_v0, %v587_v27  ;;  %v924_v3 = vpop.f32.mrb[29].mxu1  ;;  %v645_v4 = vpop.f32.mrb[30].mxu0 }
 0x131   :  { %v696_v5 = vmax.f32 %v643_v63, 0.0  ;;  %v646_v6 = vadd.f32 %v645_v4, %v1343_v26  ;;  %v677_v7 = vpop.f32.mrb[30].mxu1  ;;  %v909_v8 = vpop.f32.mrb[31].mxu0 }
 0x132   :  { %v704_v10 = vmax.f32 %v675_v2, 0.0  ;;  %v678_v13 = vadd.f32 %v677_v7, %v590_v29  ;;  %v925_v39 = vpop.f32.mrb[31].mxu1 }
 0x133   :  { %709 = vst.msk [vmem:[%s1430_s3] sm:$0xff] %vm410_vm1, %v696_v5  ;;  %v697_v11 = vmax.f32 %v646_v6, 0.0 }
 0x134   :  { %717 = vst.msk [vmem:[%s1430_s3 + $0x40] sm:$0xff] %vm410_vm1, %v704_v10  ;;  %v705_v24 = vmax.f32 %v678_v13, 0.0 }
 0x135   :  { %710 = vst.msk [vmem:[%s1430_s3 + $0x8] sm:$0xff] %vm410_vm1, %v697_v11 }
 0x136   :  { %718 = vst.msk [vmem:[%s1430_s3 + $0x48] sm:$0xff] %vm410_vm1, %v705_v24  ;;  %v650_v26 = vpop.f32.mrb[32].mxu0 }
 0x137   :  { %v651_v14 = vadd.f32 %v650_v26, %v1347_v41  ;;  %v682_v15 = vpop.f32.mrb[32].mxu1  ;;  %v912_v16 = vpop.f32.mrb[33].mxu0 }
 0x138   :  { %v683_v17 = vadd.f32 %v682_v15, %v595_v46  ;;  %v928_v18 = vpop.f32.mrb[33].mxu1  ;;  %v653_v19 = vpop.f32.mrb[34].mxu0 }
 0x139   :  { %v698_v20 = vmax.f32 %v651_v14, 0.0  ;;  %v654_v21 = vadd.f32 %v653_v19, %v1349_v43  ;;  %v685_v22 = vpop.f32.mrb[34].mxu1  ;;  %v913_v23 = vpop.f32.mrb[35].mxu0 }
 0x13a   :  { %v706_v25 = vmax.f32 %v683_v17, 0.0  ;;  %v686_v27 = vadd.f32 %v685_v22, %v598_v48  ;;  %v929_v28 = vpop.f32.mrb[35].mxu1 }
 0x13b   :  { %711 = vst.msk [vmem:[%s1430_s3 + $0x10] sm:$0xff] %vm410_vm1, %v698_v20  ;;  %v699_v29 = vmax.f32 %v654_v21, 0.0 }
 0x13c   :  { %719 = vst.msk [vmem:[%s1430_s3 + $0x50] sm:$0xff] %vm410_vm1, %v706_v25  ;;  %v707_v41 = vmax.f32 %v686_v27, 0.0 }
 0x13d   :  { %712 = vst.msk [vmem:[%s1430_s3 + $0x18] sm:$0xff] %vm410_vm1, %v699_v29 }
 0x13e   :  { %720 = vst.msk [vmem:[%s1430_s3 + $0x58] sm:$0xff] %vm410_vm1, %v707_v41  ;;  %v658_v43 = vpop.f32.mrb[36].mxu0 }
 0x13f   :  { %v659_v30 = vadd.f32 %v658_v43, %v1353_v57  ;;  %v690_v31 = vpop.f32.mrb[36].mxu1  ;;  %v916_v32 = vpop.f32.mrb[37].mxu0 }
 0x140   :  { %v691_v33 = vadd.f32 %v690_v31, %v603_v61  ;;  %v661_v34 = vpop.f32.mrb[38].mxu0  ;;  %v932_v35 = vpop.f32.mrb[37].mxu1 }
 0x141   :  { %v700_v36 = vmax.f32 %v659_v30, 0.0  ;;  %v662_v37 = vadd.f32 %v661_v34, %v1355_v59  ;;  %v917_v38 = vpop.f32.mrb[39].mxu0  ;;  %v693_v40 = vpop.f32.mrb[38].mxu1 }
 0x142   :  { %v708_v42 = vmax.f32 %v691_v33, 0.0  ;;  %v933_v44 = vpop.f32.mrb[39].mxu1 }
 0x143   :  { %713 = vst.msk [vmem:[%s1430_s3 + $0x20] sm:$0xff] %vm410_vm1, %v700_v36  ;;  %v701_v45 = vmax.f32 %v662_v37, 0.0 }
 0x144   :  { %722 = vst.msk [vmem:[%s1430_s3 + $0x60] sm:$0x3] %vm721_vm2, %v708_v42 }
 0x145   :  { %714 = vst.msk [vmem:[%s1430_s3 + $0x28] sm:$0xff] %vm410_vm1, %v701_v45 }
 0x146   :  { %v666_v57 = vpop.f32.mrb[40].mxu0 }
 0x147   :  { %v667_v59 = vadd.f32 %v666_v57, %v1359_v9  ;;  %v920_v46 = vpop.f32.mrb[41].mxu0 }
 0x148   :  { %v669_v47 = vpop.f32.mrb[42].mxu0 }
 0x149   :  { %v702_v48 = vmax.f32 %v667_v59, 0.0  ;;  %v670_v49 = vadd.f32 %v669_v47, %v1361_v12  ;;  %v921_v50 = vpop.f32.mrb[43].mxu0 }
 0x14b   :  { %715 = vst.msk [vmem:[%s1430_s3 + $0x30] sm:$0xff] %vm410_vm1, %v702_v48  ;;  %v703_v51 = vmax.f32 %v670_v49, 0.0 }
 0x14d   :  { %716 = vst.msk [vmem:[%s1430_s3 + $0x38] sm:$0xff] %vm410_vm1, %v703_v51 }

// kernel: deep_q_forward.7
= control target key start
LH: loop header
LB: loop body
LE: loop exit
PB: predicated region body
PF: predicated region fallthrough
CT: control target
= control target key end

     0   :  { %v8563_v36 = vmov 1983009808   ;;  %v40_v38 = vlaneseq  ;;  %s11195_s0 = inlined_call_operand.vmem [shape: f32[2,3136], index: 0, kind: input, shape index: {}]   ;;  %s11196_s1 = inlined_call_operand.vmem [shape: bf16[3136,512], index: 1, kind: input, shape index: {}]   ;;  %s11197_s2 = inlined_call_operand.vmem [shape: f32[1,512], index: 2, kind: input, shape index: {}]   ;;  %s11198_s3 = inlined_call_operand.vmem [shape: bf16[512,2], index: 3, kind: input, shape index: {}]   ;;  %s11199_s4 = inlined_call_operand.vmem [shape: f32[1,2], index: 4, kind: input, shape index: {}]   ;;  %s11200_s5 = inlined_call_operand.hbm [shape: f32[2,2], index: 5, kind: output, shape index: {}]  }
   0x1   :  { %v7325_v0 = vld [vmem:[%s11196_s1 + $0x4] ss:$16 sps:$4 sm:$0xff]   ;;  %v7327_v1 = vld [vmem:[%s11196_s1 + $0xc] ss:$16 sps:$4 sm:$0xff]   ;;  %v7329_v2 = vld [vmem:[%s11196_s1] ss:$16 sps:$4 sm:$0xff]   ;;  %v38_v37 = vunpack.c.l.s4 %v8563_v36 }
   0x2   :  { %4925 = vmatprep.subr.bf16.mxu0 %v7325_v0  ;;  %v7330_v3 = vld [vmem:[%s11196_s1 + $0x8] ss:$16 sps:$4 sm:$0xff]   ;;  %5458 = vmatprep.subr.bf16.mxu1 %v7327_v1  ;;  %v7331_v4 = vld [vmem:[%s11196_s1 + $0x24] ss:$16 sps:$4 sm:$0xff]   ;;  %v7333_v5 = vld [vmem:[%s11196_s1 + $0x2c] ss:$16 sps:$4 sm:$0xff]  }
   0x3   :  { %4926 = vmatpush1.bf16.msra.mxu0 %v7329_v2  ;;  %5459 = vmatpush1.bf16.msra.mxu1 %v7330_v3  ;;  %v7335_v6 = vld [vmem:[%s11196_s1 + $0x20] ss:$16 sps:$4 sm:$0xff]   ;;  %v7336_v7 = vld [vmem:[%s11196_s1 + $0x28] ss:$16 sps:$4 sm:$0xff]   ;;  %v7337_v8 = vld [vmem:[%s11196_s1 + $0x44] ss:$16 sps:$4 sm:$0xff]   ;;  %v39_v42 = vunpack.c.0.s8 %v38_v37 }
   0x4   :  { %4927 = vmatprep.subr.bf16.mxu0 %v7331_v4  ;;  %5460 = vmatprep.subr.bf16.mxu1 %v7333_v5  ;;  %v7339_v9 = vld [vmem:[%s11196_s1 + $0x4c] ss:$16 sps:$4 sm:$0xff]   ;;  %v7341_v10 = vld [vmem:[%s11196_s1 + $0x40] ss:$16 sps:$4 sm:$0xff]   ;;  %v7342_v11 = vld [vmem:[%s11196_s1 + $0x48] ss:$16 sps:$4 sm:$0xff]  }
   0x5   :  { %v7343_v12 = vld [vmem:[%s11196_s1 + $0x64] ss:$16 sps:$4 sm:$0xff]   ;;  %v7345_v13 = vld [vmem:[%s11196_s1 + $0x6c] ss:$16 sps:$4 sm:$0xff]   ;;  %v7347_v14 = vld [vmem:[%s11196_s1 + $0x60] ss:$16 sps:$4 sm:$0xff]  }
   0x6   :  { %v7348_v15 = vld [vmem:[%s11196_s1 + $0x68] ss:$16 sps:$4 sm:$0xff]   ;;  %v7349_v16 = vld [vmem:[%s11196_s1 + $0x84] ss:$16 sps:$4 sm:$0xff]   ;;  %v7351_v17 = vld [vmem:[%s11196_s1 + $0x8c] ss:$16 sps:$4 sm:$0xff]  }
   0x7   :  { %4928 = vmatpush1.bf16.msra.mxu0 %v7335_v6  ;;  %5461 = vmatpush1.bf16.msra.mxu1 %v7336_v7  ;;  %v7353_v18 = vld [vmem:[%s11196_s1 + $0x80] ss:$16 sps:$4 sm:$0xff]   ;;  %v7354_v19 = vld [vmem:[%s11196_s1 + $0x88] ss:$16 sps:$4 sm:$0xff]   ;;  %v7355_v20 = vld [vmem:[%s11196_s1 + $0xa4] ss:$16 sps:$4 sm:$0xff]  }
   0x8   :  { %4929 = vmatprep.subr.bf16.mxu0 %v7337_v8  ;;  %5462 = vmatprep.subr.bf16.mxu1 %v7339_v9  ;;  %v7357_v21 = vld [vmem:[%s11196_s1 + $0xac] ss:$16 sps:$4 sm:$0xff]   ;;  %v7359_v22 = vld [vmem:[%s11196_s1 + $0xa0] ss:$16 sps:$4 sm:$0xff]   ;;  %v7360_v23 = vld [vmem:[%s11196_s1 + $0xa8] ss:$16 sps:$4 sm:$0xff]  }
   0x9   :  { %v7361_v24 = vld [vmem:[%s11196_s1 + $0xc4] ss:$16 sps:$4 sm:$0xff]   ;;  %v7363_v25 = vld [vmem:[%s11196_s1 + $0xcc] ss:$16 sps:$4 sm:$0xff]   ;;  %v7365_v26 = vld [vmem:[%s11196_s1 + $0xc0] ss:$16 sps:$4 sm:$0xff]  }
   0xa   :  { %v7366_v27 = vld [vmem:[%s11196_s1 + $0xc8] ss:$16 sps:$4 sm:$0xff]   ;;  %v7367_v28 = vld [vmem:[%s11196_s1 + $0xe4] ss:$16 sps:$4 sm:$0xff]   ;;  %v7369_v29 = vld [vmem:[%s11196_s1 + $0xec] ss:$16 sps:$4 sm:$0xff]  }
   0xb   :  { %4930 = vmatpush1.bf16.msra.mxu0 %v7341_v10  ;;  %5463 = vmatpush1.bf16.msra.mxu1 %v7342_v11  ;;  %v7371_v30 = vld [vmem:[%s11196_s1 + $0xe0] ss:$16 sps:$4 sm:$0xff]   ;;  %v7372_v31 = vld [vmem:[%s11196_s1 + $0xe8] ss:$16 sps:$4 sm:$0xff]   ;;  %v7373_v32 = vld [vmem:[%s11196_s1 + $0x104] ss:$16 sps:$4 sm:$0xff]  }
   0xc   :  { %4931 = vmatprep.subr.bf16.mxu0 %v7343_v12  ;;  %5464 = vmatprep.subr.bf16.mxu1 %v7345_v13  ;;  %v7375_v33 = vld [vmem:[%s11196_s1 + $0x10c] ss:$16 sps:$4 sm:$0xff]   ;;  %v7377_v34 = vld [vmem:[%s11196_s1 + $0x100] ss:$16 sps:$4 sm:$0xff]   ;;  %v7378_v35 = vld [vmem:[%s11196_s1 + $0x108] ss:$16 sps:$4 sm:$0xff]  }
   0xd   :  { %v7379_v39 = vld [vmem:[%s11196_s1 + $0x124] ss:$16 sps:$4 sm:$0xff]   ;;  %v7381_v40 = vld [vmem:[%s11196_s1 + $0x12c] ss:$16 sps:$4 sm:$0xff]   ;;  %v7383_v41 = vld [vmem:[%s11196_s1 + $0x120] ss:$16 sps:$4 sm:$0xff]  }
   0xe   :  { %v8713_v43 = vshrl.u32 %v40_v38, 7  ;;  %v7384_v44 = vld [vmem:[%s11196_s1 + $0x128] ss:$16 sps:$4 sm:$0xff]   ;;  %v7385_v45 = vld [vmem:[%s11196_s1 + $0x144] ss:$16 sps:$4 sm:$0xff]  }
   0xf   :  { %4932 = vmatpush1.bf16.msra.mxu0 %v7347_v14  ;;  %5465 = vmatpush1.bf16.msra.mxu1 %v7348_v15  ;;  %v7387_v46 = vld [vmem:[%s11196_s1 + $0x14c] ss:$16 sps:$4 sm:$0xff]   ;;  %v7389_v47 = vld [vmem:[%s11196_s1 + $0x140] ss:$16 sps:$4 sm:$0xff]   ;;  %v7390_v48 = vld [vmem:[%s11196_s1 + $0x148] ss:$16 sps:$4 sm:$0xff]  }
  0x10   :  { %4933 = vmatprep.subr.bf16.mxu0 %v7349_v16  ;;  %5466 = vmatprep.subr.bf16.mxu1 %v7351_v17  ;;  %v8731_v49 = vsub.s32 %v39_v42, %v8713_v43  ;;  %v7391_v50 = vld [vmem:[%s11196_s1 + $0x164] ss:$16 sps:$4 sm:$0xff]   ;;  %v7393_v51 = vld [vmem:[%s11196_s1 + $0x16c] ss:$16 sps:$4 sm:$0xff]   ;;  %v7395_v53 = vld [vmem:[%s11196_s1 + $0x160] ss:$16 sps:$4 sm:$0xff]  }
  0x11   :  { %v22_v52 = vld [vmem:[%s11195_s0] sm:$0xff]  ;;  %v7396_v55 = vld [vmem:[%s11196_s1 + $0x168] ss:$16 sps:$4 sm:$0xff]   ;;  %v7399_v57 = vld [vmem:[%s11196_s1 + $0x18c] ss:$16 sps:$4 sm:$0xff]  }
  0x12   :  { %v43_v54 = vrot.slane %v22_v52, %v8731_v49  ;;  %v7397_v56 = vld [vmem:[%s11196_s1 + $0x184] ss:$16 sps:$4 sm:$0xff]   ;;  %v7401_v59 = vld [vmem:[%s11196_s1 + $0x180] ss:$16 sps:$4 sm:$0xff]   ;;  %v7402_v61 = vld [vmem:[%s11196_s1 + $0x188] ss:$16 sps:$4 sm:$0xff]   ;;  %v36_v4 = vcombine.high %v22_v52, %v22_v52 }
  0x13   :  { %4934 = vmatpush1.bf16.msra.mxu0 %v7353_v18  ;;  %5467 = vmatpush1.bf16.msra.mxu1 %v7354_v19  ;;  %v7403_v62 = vld [vmem:[%s11196_s1 + $0x1a4] ss:$16 sps:$4 sm:$0xff]   ;;  %v7405_v63 = vld [vmem:[%s11196_s1 + $0x1ac] ss:$16 sps:$4 sm:$0xff]   ;;  %v7407_v0 = vld [vmem:[%s11196_s1 + $0x1a0] ss:$16 sps:$4 sm:$0xff]  }
  0x14   :  { %4935 = vmatprep.subr.bf16.mxu0 %v7355_v20  ;;  %5468 = vmatprep.subr.bf16.mxu1 %v7357_v21  ;;  %v51_v58 = vcombine.high %v43_v54, %v43_v54  ;;  %v7408_v1 = vld [vmem:[%s11196_s1 + $0x1a8] ss:$16 sps:$4 sm:$0xff]   ;;  %v7409_v2 = vld [vmem:[%s11196_s1 + $0x1c4] ss:$16 sps:$4 sm:$0xff]   ;;  %v7411_v3 = vld [vmem:[%s11196_s1 + $0x1cc] ss:$16 sps:$4 sm:$0xff]   ;;  %v8792_v9 = vrot.slane %v36_v4, %v8731_v49  ;;  %v170_v16 = vpack.c.bf16 %v43_v54, %v43_v54 }
  0x15   :  { %v7413_v5 = vld [vmem:[%s11196_s1 + $0x1c0] ss:$16 sps:$4 sm:$0xff]   ;;  %v7414_v6 = vld [vmem:[%s11196_s1 + $0x1c8] ss:$16 sps:$4 sm:$0xff]   ;;  %v7415_v7 = vld [vmem:[%s11196_s1 + $0x1e4] ss:$16 sps:$4 sm:$0xff]  }
  0x16   :  { %v171_v60 = vpack.c.bf16 %v51_v58, %v51_v58  ;;  %v7417_v8 = vld [vmem:[%s11196_s1 + $0x1ec] ss:$16 sps:$4 sm:$0xff]   ;;  %v7419_v10 = vld [vmem:[%s11196_s1 + $0x1e0] ss:$16 sps:$4 sm:$0xff]   ;;  %v7420_v11 = vld [vmem:[%s11196_s1 + $0x1e8] ss:$16 sps:$4 sm:$0xff]   ;;  %v52_v14 = vcombine.high %v8792_v9, %v8792_v9 }
  0x17   :  { %4936 = vmatpush1.bf16.msra.mxu0 %v7359_v22  ;;  %5469 = vmatpush1.bf16.msra.mxu1 %v7360_v23  ;;  %v7424_v12 = vld [vmem:[%s11196_s1 + $0x204] ss:$16 sps:$4 sm:$0xff]   ;;  %v7427_v13 = vld [vmem:[%s11196_s1 + $0x20c] ss:$16 sps:$4 sm:$0xff]   ;;  %v7422_v15 = vld [vmem:[%s11196_s1 + $0x200] ss:$16 sps:$4 sm:$0xff]  }
  0x18   :  { %4937 = vmatprep.subr.bf16.mxu0 %v7361_v24  ;;  %5470 = vmatprep.subr.bf16.mxu1 %v7363_v25  ;;  %v7425_v17 = vld [vmem:[%s11196_s1 + $0x208] ss:$16 sps:$4 sm:$0xff]   ;;  %v7430_v18 = vld [vmem:[%s11196_s1 + $0x224] ss:$16 sps:$4 sm:$0xff]   ;;  %v7433_v19 = vld [vmem:[%s11196_s1 + $0x22c] ss:$16 sps:$4 sm:$0xff]   ;;  %v173_v20 = vpack.c.bf16 %v52_v14, %v52_v14 }
  0x19   :  { %4957 = vmatprep.mubr.bf16.mxu0 %v171_v60  ;;  %5490 = vmatprep.mubr.bf16.mxu1 %v171_v60  ;;  %v7428_v21 = vld [vmem:[%s11196_s1 + $0x220] ss:$16 sps:$4 sm:$0xff]   ;;  %v7431_v22 = vld [vmem:[%s11196_s1 + $0x228] ss:$16 sps:$4 sm:$0xff]   ;;  %v7436_v23 = vld [vmem:[%s11196_s1 + $0x244] ss:$16 sps:$4 sm:$0xff]  }
  0x1a   :  { %v7439_v24 = vld [vmem:[%s11196_s1 + $0x24c] ss:$16 sps:$4 sm:$0xff]   ;;  %v7434_v25 = vld [vmem:[%s11196_s1 + $0x240] ss:$16 sps:$4 sm:$0xff]   ;;  %v7455_v38 = vld [vmem:[%s11196_s1 + $0x2a8] ss:$16 sps:$4 sm:$0xff]  }
  0x1b   :  { %4938 = vmatpush1.bf16.msra.mxu0 %v7365_v26  ;;  %5471 = vmatpush1.bf16.msra.mxu1 %v7366_v27  ;;  %v7437_v26 = vld [vmem:[%s11196_s1 + $0x248] ss:$16 sps:$4 sm:$0xff]   ;;  %v7442_v27 = vld [vmem:[%s11196_s1 + $0x264] ss:$16 sps:$4 sm:$0xff]   ;;  %v7457_v36 = vld [vmem:[%s11196_s1 + $0x2ac] ss:$16 sps:$4 sm:$0xff]  }
  0x1c   :  { %4939 = vmatprep.subr.bf16.mxu0 %v7367_v28  ;;  %5472 = vmatprep.subr.bf16.mxu1 %v7369_v29  ;;  %v7445_v28 = vld [vmem:[%s11196_s1 + $0x26c] ss:$16 sps:$4 sm:$0xff]   ;;  %v7440_v29 = vld [vmem:[%s11196_s1 + $0x260] ss:$16 sps:$4 sm:$0xff]   ;;  %v7461_v42 = vld [vmem:[%s11196_s1 + $0x2c8] ss:$16 sps:$4 sm:$0xff]  }
  0x1d   :  { %v7452_v37 = vld [vmem:[%s11196_s1 + $0x2a0] ss:$16 sps:$4 sm:$0xff]   ;;  %v7473_v52 = vld [vmem:[%s11196_s1 + $0x308] ss:$16 sps:$4 sm:$0xff]   ;;  %v7481_v54 = vld [vmem:[%s11196_s1 + $0x32c] ss:$16 sps:$4 sm:$0xff]  }
  0x1e   :  { %v7487_v58 = vld [vmem:[%s11196_s1 + $0x34c] ss:$16 sps:$4 sm:$0xff]   ;;  %v7485_v60 = vld [vmem:[%s11196_s1 + $0x348] ss:$16 sps:$4 sm:$0xff]   ;;  %v7514_v14 = vld [vmem:[%s11196_s1 + $0x3e4] ss:$16 sps:$4 sm:$0xff]  }
  0x1f   :  { %4940 = vmatpush1.bf16.msra.mxu0 %v7371_v30  ;;  %5473 = vmatpush1.bf16.msra.mxu1 %v7372_v31  ;;  %v7443_v30 = vld [vmem:[%s11196_s1 + $0x268] ss:$16 sps:$4 sm:$0xff]   ;;  %v7448_v31 = vld [vmem:[%s11196_s1 + $0x284] ss:$16 sps:$4 sm:$0xff]  }
  0x20   :  { %4941 = vmatprep.subr.bf16.mxu0 %v7373_v32  ;;  %5474 = vmatprep.subr.bf16.mxu1 %v7375_v33  ;;  %v7451_v32 = vld [vmem:[%s11196_s1 + $0x28c] ss:$16 sps:$4 sm:$0xff]   ;;  %v7446_v33 = vld [vmem:[%s11196_s1 + $0x280] ss:$16 sps:$4 sm:$0xff]   ;;  %v7497_v4 = vld [vmem:[%s11196_s1 + $0x388] ss:$16 sps:$4 sm:$0xff]  }
  0x23   :  { %4942 = vmatpush1.bf16.msra.mxu0 %v7377_v34  ;;  %5475 = vmatpush1.bf16.msra.mxu1 %v7378_v35  ;;  %v7449_v34 = vld [vmem:[%s11196_s1 + $0x288] ss:$16 sps:$4 sm:$0xff]   ;;  %v7454_v35 = vld [vmem:[%s11196_s1 + $0x2a4] ss:$16 sps:$4 sm:$0xff]  }
  0x24   :  { %4943 = vmatprep.subr.bf16.mxu0 %v7379_v39  ;;  %5476 = vmatprep.subr.bf16.mxu1 %v7381_v40  ;;  %v7460_v39 = vld [vmem:[%s11196_s1 + $0x2c4] ss:$16 sps:$4 sm:$0xff]   ;;  %v7463_v40 = vld [vmem:[%s11196_s1 + $0x2cc] ss:$16 sps:$4 sm:$0xff]  }
  0x27   :  { %4944 = vmatpush1.bf16.msra.mxu0 %v7383_v41  ;;  %5477 = vmatpush1.bf16.msra.mxu1 %v7384_v44  ;;  %v7458_v41 = vld [vmem:[%s11196_s1 + $0x2c0] ss:$16 sps:$4 sm:$0xff]   ;;  %v7466_v44 = vld [vmem:[%s11196_s1 + $0x2e4] ss:$16 sps:$4 sm:$0xff]  }
  0x28   :  { %4945 = vmatprep.subr.bf16.mxu0 %v7385_v45  ;;  %5478 = vmatprep.subr.bf16.mxu1 %v7387_v46  ;;  %v7469_v45 = vld [vmem:[%s11196_s1 + $0x2ec] ss:$16 sps:$4 sm:$0xff]   ;;  %v7464_v46 = vld [vmem:[%s11196_s1 + $0x2e0] ss:$16 sps:$4 sm:$0xff]  }
  0x2b   :  { %4946 = vmatpush1.bf16.msra.mxu0 %v7389_v47  ;;  %5479 = vmatpush1.bf16.msra.mxu1 %v7390_v48  ;;  %v7467_v47 = vld [vmem:[%s11196_s1 + $0x2e8] ss:$16 sps:$4 sm:$0xff]   ;;  %v7472_v48 = vld [vmem:[%s11196_s1 + $0x304] ss:$16 sps:$4 sm:$0xff]  }
  0x2c   :  { %4947 = vmatprep.subr.bf16.mxu0 %v7391_v50  ;;  %5480 = vmatprep.subr.bf16.mxu1 %v7393_v51  ;;  %v7475_v50 = vld [vmem:[%s11196_s1 + $0x30c] ss:$16 sps:$4 sm:$0xff]   ;;  %v7470_v51 = vld [vmem:[%s11196_s1 + $0x300] ss:$16 sps:$4 sm:$0xff]  }
  0x2f   :  { %4948 = vmatpush1.bf16.msra.mxu0 %v7395_v53  ;;  %5481 = vmatpush1.bf16.msra.mxu1 %v7396_v55  ;;  %v7478_v53 = vld [vmem:[%s11196_s1 + $0x324] ss:$16 sps:$4 sm:$0xff]   ;;  %v7476_v55 = vld [vmem:[%s11196_s1 + $0x320] ss:$16 sps:$4 sm:$0xff]  }
  0x30   :  { %4949 = vmatprep.subr.bf16.mxu0 %v7397_v56  ;;  %5482 = vmatprep.subr.bf16.mxu1 %v7399_v57  ;;  %v7479_v56 = vld [vmem:[%s11196_s1 + $0x328] ss:$16 sps:$4 sm:$0xff]   ;;  %v7484_v57 = vld [vmem:[%s11196_s1 + $0x344] ss:$16 sps:$4 sm:$0xff]  }
  0x33   :  { %4950 = vmatpush1.bf16.msra.mxu0 %v7401_v59  ;;  %5483 = vmatpush1.bf16.msra.mxu1 %v7402_v61  ;;  %v7482_v59 = vld [vmem:[%s11196_s1 + $0x340] ss:$16 sps:$4 sm:$0xff]   ;;  %v7490_v61 = vld [vmem:[%s11196_s1 + $0x364] ss:$16 sps:$4 sm:$0xff]  }
  0x34   :  { %4951 = vmatprep.subr.bf16.mxu0 %v7403_v62  ;;  %5484 = vmatprep.subr.bf16.mxu1 %v7405_v63  ;;  %v7493_v62 = vld [vmem:[%s11196_s1 + $0x36c] ss:$16 sps:$4 sm:$0xff]   ;;  %v7488_v63 = vld [vmem:[%s11196_s1 + $0x360] ss:$16 sps:$4 sm:$0xff]  }
  0x37   :  { %4952 = vmatpush1.bf16.msra.mxu0 %v7407_v0  ;;  %5485 = vmatpush1.bf16.msra.mxu1 %v7408_v1  ;;  %v7491_v0 = vld [vmem:[%s11196_s1 + $0x368] ss:$16 sps:$4 sm:$0xff]   ;;  %v7496_v1 = vld [vmem:[%s11196_s1 + $0x384] ss:$16 sps:$4 sm:$0xff]  }
  0x38   :  { %4953 = vmatprep.subr.bf16.mxu0 %v7409_v2  ;;  %5486 = vmatprep.subr.bf16.mxu1 %v7411_v3  ;;  %v7499_v2 = vld [vmem:[%s11196_s1 + $0x38c] ss:$16 sps:$4 sm:$0xff]   ;;  %v7494_v3 = vld [vmem:[%s11196_s1 + $0x380] ss:$16 sps:$4 sm:$0xff]  }
  0x3b   :  { %4954 = vmatpush1.bf16.msra.mxu0 %v7413_v5  ;;  %5487 = vmatpush1.bf16.msra.mxu1 %v7414_v6  ;;  %v7502_v5 = vld [vmem:[%s11196_s1 + $0x3a4] ss:$16 sps:$4 sm:$0xff]   ;;  %v7505_v6 = vld [vmem:[%s11196_s1 + $0x3ac] ss:$16 sps:$4 sm:$0xff]  }
  0x3c   :  { %4955 = vmatprep.subr.bf16.mxu0 %v7415_v7  ;;  %5488 = vmatprep.subr.bf16.mxu1 %v7417_v8  ;;  %v7500_v7 = vld [vmem:[%s11196_s1 + $0x3a0] ss:$16 sps:$4 sm:$0xff]   ;;  %v7503_v8 = vld [vmem:[%s11196_s1 + $0x3a8] ss:$16 sps:$4 sm:$0xff]  }
  0x3f   :  { %4956 = vmatpush1.bf16.msra.mxu0 %v7419_v10  ;;  %5489 = vmatpush1.bf16.msra.mxu1 %v7420_v11  ;;  %v7508_v10 = vld [vmem:[%s11196_s1 + $0x3c4] ss:$16 sps:$4 sm:$0xff]   ;;  %v7511_v11 = vld [vmem:[%s11196_s1 + $0x3cc] ss:$16 sps:$4 sm:$0xff]  }
  0x40   :  { %4966 = vmatprep.subr.bf16.mxu0 %v7424_v12  ;;  %5499 = vmatprep.subr.bf16.mxu1 %v7427_v13  ;;  %v7506_v12 = vld [vmem:[%s11196_s1 + $0x3c0] ss:$16 sps:$4 sm:$0xff]   ;;  %v7509_v13 = vld [vmem:[%s11196_s1 + $0x3c8] ss:$16 sps:$4 sm:$0xff]  }
  0x42   :  { %4958 = vmatmul.mubr.bf16.vlgmr.msra.gmra.mrb[0].mxu0 %v170_v16  ;;  %5491 = vmatmul.mubr.bf16.vlgmr.msra.gmra.mrb[0].mxu1 %v170_v16  ;;  %v7512_v16 = vld [vmem:[%s11196_s1 + $0x3e0] ss:$16 sps:$4 sm:$0xff]  }
  0x43   :  { %4967 = vmatpush1.bf16.msra.mxu0 %v7422_v15  ;;  %5500 = vmatpush1.bf16.msra.mxu1 %v7425_v17  ;;  %v7517_v15 = vld [vmem:[%s11196_s1 + $0x3ec] ss:$16 sps:$4 sm:$0xff]   ;;  %v7515_v17 = vld [vmem:[%s11196_s1 + $0x3e8] ss:$16 sps:$4 sm:$0xff]  }
  0x44   :  { %4968 = vmatprep.subr.bf16.mxu0 %v7430_v18  ;;  %5501 = vmatprep.subr.bf16.mxu1 %v7433_v19  ;;  %v7520_v18 = vld [vmem:[%s11196_s1 + $0x404] ss:$16 sps:$4 sm:$0xff]   ;;  %v7523_v19 = vld [vmem:[%s11196_s1 + $0x40c] ss:$16 sps:$4 sm:$0xff]  }
  0x45   :  { %4998 = vmatprep.mubr.bf16.mxu0 %v173_v20  ;;  %5531 = vmatprep.mubr.bf16.mxu1 %v173_v20  ;;  %v7518_v20 = vld [vmem:[%s11196_s1 + $0x400] ss:$16 sps:$4 sm:$0xff]  }
  0x47   :  { %4969 = vmatpush1.bf16.msra.mxu0 %v7428_v21  ;;  %5502 = vmatpush1.bf16.msra.mxu1 %v7431_v22  ;;  %v172_v21 = vpack.c.bf16 %v8792_v9, %v8792_v9  ;;  %v7521_v22 = vld [vmem:[%s11196_s1 + $0x408] ss:$16 sps:$4 sm:$0xff]   ;;  %v7529_v9 = vld [vmem:[%s11196_s1 + $0x42c] ss:$16 sps:$4 sm:$0xff]  }
  0x48   :  { %4970 = vmatprep.subr.bf16.mxu0 %v7436_v23  ;;  %5503 = vmatprep.subr.bf16.mxu1 %v7439_v24  ;;  %v9011_v23 = vld [vmem:[%s11195_s0 + $0x8] sm:$0xff]  ;;  %v7526_v24 = vld [vmem:[%s11196_s1 + $0x424] ss:$16 sps:$4 sm:$0xff]  }
  0x4b   :  { %4971 = vmatpush1.bf16.msra.mxu0 %v7434_v25  ;;  %5504 = vmatpush1.bf16.msra.mxu1 %v7437_v26  ;;  %v9021_v25 = vrot.slane %v9011_v23, %v8731_v49 }
  0x4c   :  { %4972 = vmatprep.subr.bf16.mxu0 %v7442_v27  ;;  %5505 = vmatprep.subr.bf16.mxu1 %v7445_v28  ;;  %v7524_v27 = vld [vmem:[%s11196_s1 + $0x420] ss:$16 sps:$4 sm:$0xff]   ;;  %v7527_v28 = vld [vmem:[%s11196_s1 + $0x428] ss:$16 sps:$4 sm:$0xff]  }
  0x4d   :  { %v68_v26 = vcombine.high %v9021_v25, %v9021_v25 }
  0x4f   :  { %4973 = vmatpush1.bf16.msra.mxu0 %v7440_v29  ;;  %5506 = vmatpush1.bf16.msra.mxu1 %v7443_v30  ;;  %v7532_v29 = vld [vmem:[%s11196_s1 + $0x444] ss:$16 sps:$4 sm:$0xff]   ;;  %v7535_v30 = vld [vmem:[%s11196_s1 + $0x44c] ss:$16 sps:$4 sm:$0xff]  }
  0x50   :  { %4974 = vmatprep.subr.bf16.mxu0 %v7448_v31  ;;  %5507 = vmatprep.subr.bf16.mxu1 %v7451_v32  ;;  %v175_v31 = vpack.c.bf16 %v68_v26, %v68_v26  ;;  %v7530_v32 = vld [vmem:[%s11196_s1 + $0x440] ss:$16 sps:$4 sm:$0xff]   ;;  %v7611_v26 = vld [vmem:[%s11196_s1 + $0x5e8] ss:$16 sps:$4 sm:$0xff]  }
  0x53   :  { %4975 = vmatpush1.bf16.msra.mxu0 %v7446_v33  ;;  %5508 = vmatpush1.bf16.msra.mxu1 %v7449_v34  ;;  %v7533_v33 = vld [vmem:[%s11196_s1 + $0x448] ss:$16 sps:$4 sm:$0xff]   ;;  %v7538_v34 = vld [vmem:[%s11196_s1 + $0x464] ss:$16 sps:$4 sm:$0xff]  }
  0x54   :  { %4976 = vmatprep.subr.bf16.mxu0 %v7454_v35  ;;  %5509 = vmatprep.subr.bf16.mxu1 %v7457_v36  ;;  %v7541_v35 = vld [vmem:[%s11196_s1 + $0x46c] ss:$16 sps:$4 sm:$0xff]   ;;  %v7536_v36 = vld [vmem:[%s11196_s1 + $0x460] ss:$16 sps:$4 sm:$0xff]  }
  0x57   :  { %4977 = vmatpush1.bf16.msra.mxu0 %v7452_v37  ;;  %5510 = vmatpush1.bf16.msra.mxu1 %v7455_v38  ;;  %v7539_v37 = vld [vmem:[%s11196_s1 + $0x468] ss:$16 sps:$4 sm:$0xff]   ;;  %v7544_v38 = vld [vmem:[%s11196_s1 + $0x484] ss:$16 sps:$4 sm:$0xff]  }
  0x58   :  { %4978 = vmatprep.subr.bf16.mxu0 %v7460_v39  ;;  %5511 = vmatprep.subr.bf16.mxu1 %v7463_v40  ;;  %v7547_v39 = vld [vmem:[%s11196_s1 + $0x48c] ss:$16 sps:$4 sm:$0xff]   ;;  %v7542_v40 = vld [vmem:[%s11196_s1 + $0x480] ss:$16 sps:$4 sm:$0xff]  }
  0x5b   :  { %4979 = vmatpush1.bf16.msra.mxu0 %v7458_v41  ;;  %5512 = vmatpush1.bf16.msra.mxu1 %v7461_v42  ;;  %v7545_v41 = vld [vmem:[%s11196_s1 + $0x488] ss:$16 sps:$4 sm:$0xff]   ;;  %v7550_v42 = vld [vmem:[%s11196_s1 + $0x4a4] ss:$16 sps:$4 sm:$0xff]  }
  0x5c   :  { %4980 = vmatprep.subr.bf16.mxu0 %v7466_v44  ;;  %5513 = vmatprep.subr.bf16.mxu1 %v7469_v45  ;;  %v7553_v44 = vld [vmem:[%s11196_s1 + $0x4ac] ss:$16 sps:$4 sm:$0xff]   ;;  %v7548_v45 = vld [vmem:[%s11196_s1 + $0x4a0] ss:$16 sps:$4 sm:$0xff]  }
  0x5f   :  { %4981 = vmatpush1.bf16.msra.mxu0 %v7464_v46  ;;  %5514 = vmatpush1.bf16.msra.mxu1 %v7467_v47  ;;  %v7551_v46 = vld [vmem:[%s11196_s1 + $0x4a8] ss:$16 sps:$4 sm:$0xff]   ;;  %v7556_v47 = vld [vmem:[%s11196_s1 + $0x4c4] ss:$16 sps:$4 sm:$0xff]  }
  0x60   :  { %4982 = vmatprep.subr.bf16.mxu0 %v7472_v48  ;;  %5515 = vmatprep.subr.bf16.mxu1 %v7475_v50  ;;  %v7559_v48 = vld [vmem:[%s11196_s1 + $0x4cc] ss:$16 sps:$4 sm:$0xff]   ;;  %v7554_v50 = vld [vmem:[%s11196_s1 + $0x4c0] ss:$16 sps:$4 sm:$0xff]  }
  0x63   :  { %4983 = vmatpush1.bf16.msra.mxu0 %v7470_v51  ;;  %5516 = vmatpush1.bf16.msra.mxu1 %v7473_v52  ;;  %v7557_v51 = vld [vmem:[%s11196_s1 + $0x4c8] ss:$16 sps:$4 sm:$0xff]   ;;  %v7562_v52 = vld [vmem:[%s11196_s1 + $0x4e4] ss:$16 sps:$4 sm:$0xff]  }
  0x64   :  { %4984 = vmatprep.subr.bf16.mxu0 %v7478_v53  ;;  %5517 = vmatprep.subr.bf16.mxu1 %v7481_v54  ;;  %v7565_v53 = vld [vmem:[%s11196_s1 + $0x4ec] ss:$16 sps:$4 sm:$0xff]   ;;  %v7560_v54 = vld [vmem:[%s11196_s1 + $0x4e0] ss:$16 sps:$4 sm:$0xff]  }
  0x67   :  { %4985 = vmatpush1.bf16.msra.mxu0 %v7476_v55  ;;  %5518 = vmatpush1.bf16.msra.mxu1 %v7479_v56  ;;  %v7563_v55 = vld [vmem:[%s11196_s1 + $0x4e8] ss:$16 sps:$4 sm:$0xff]   ;;  %v7568_v56 = vld [vmem:[%s11196_s1 + $0x504] ss:$16 sps:$4 sm:$0xff]  }
  0x68   :  { %4986 = vmatprep.subr.bf16.mxu0 %v7484_v57  ;;  %5519 = vmatprep.subr.bf16.mxu1 %v7487_v58  ;;  %v7571_v57 = vld [vmem:[%s11196_s1 + $0x50c] ss:$16 sps:$4 sm:$0xff]   ;;  %v7566_v58 = vld [vmem:[%s11196_s1 + $0x500] ss:$16 sps:$4 sm:$0xff]  }
  0x6b   :  { %4987 = vmatpush1.bf16.msra.mxu0 %v7482_v59  ;;  %5520 = vmatpush1.bf16.msra.mxu1 %v7485_v60  ;;  %v7569_v59 = vld [vmem:[%s11196_s1 + $0x508] ss:$16 sps:$4 sm:$0xff]   ;;  %v7574_v60 = vld [vmem:[%s11196_s1 + $0x524] ss:$16 sps:$4 sm:$0xff]  }
  0x6c   :  { %4988 = vmatprep.subr.bf16.mxu0 %v7490_v61  ;;  %5521 = vmatprep.subr.bf16.mxu1 %v7493_v62  ;;  %v7577_v61 = vld [vmem:[%s11196_s1 + $0x52c] ss:$16 sps:$4 sm:$0xff]   ;;  %v7572_v62 = vld [vmem:[%s11196_s1 + $0x520] ss:$16 sps:$4 sm:$0xff]  }
  0x6f   :  { %4989 = vmatpush1.bf16.msra.mxu0 %v7488_v63  ;;  %5522 = vmatpush1.bf16.msra.mxu1 %v7491_v0  ;;  %v7575_v63 = vld [vmem:[%s11196_s1 + $0x528] ss:$16 sps:$4 sm:$0xff]   ;;  %v7580_v0 = vld [vmem:[%s11196_s1 + $0x544] ss:$16 sps:$4 sm:$0xff]  }
  0x70   :  { %4990 = vmatprep.subr.bf16.mxu0 %v7496_v1  ;;  %5523 = vmatprep.subr.bf16.mxu1 %v7499_v2  ;;  %v7583_v1 = vld [vmem:[%s11196_s1 + $0x54c] ss:$16 sps:$4 sm:$0xff]   ;;  %v7578_v2 = vld [vmem:[%s11196_s1 + $0x540] ss:$16 sps:$4 sm:$0xff]  }
  0x73   :  { %4991 = vmatpush1.bf16.msra.mxu0 %v7494_v3  ;;  %5524 = vmatpush1.bf16.msra.mxu1 %v7497_v4  ;;  %v7581_v3 = vld [vmem:[%s11196_s1 + $0x548] ss:$16 sps:$4 sm:$0xff]   ;;  %v7586_v4 = vld [vmem:[%s11196_s1 + $0x564] ss:$16 sps:$4 sm:$0xff]  }
  0x74   :  { %4992 = vmatprep.subr.bf16.mxu0 %v7502_v5  ;;  %5525 = vmatprep.subr.bf16.mxu1 %v7505_v6  ;;  %v7589_v5 = vld [vmem:[%s11196_s1 + $0x56c] ss:$16 sps:$4 sm:$0xff]   ;;  %v7584_v6 = vld [vmem:[%s11196_s1 + $0x560] ss:$16 sps:$4 sm:$0xff]  }
  0x77   :  { %4993 = vmatpush1.bf16.msra.mxu0 %v7500_v7  ;;  %5526 = vmatpush1.bf16.msra.mxu1 %v7503_v8  ;;  %v7587_v7 = vld [vmem:[%s11196_s1 + $0x568] ss:$16 sps:$4 sm:$0xff]   ;;  %v7592_v8 = vld [vmem:[%s11196_s1 + $0x584] ss:$16 sps:$4 sm:$0xff]  }
  0x78   :  { %4994 = vmatprep.subr.bf16.mxu0 %v7508_v10  ;;  %5527 = vmatprep.subr.bf16.mxu1 %v7511_v11  ;;  %v7595_v10 = vld [vmem:[%s11196_s1 + $0x58c] ss:$16 sps:$4 sm:$0xff]   ;;  %v7590_v11 = vld [vmem:[%s11196_s1 + $0x580] ss:$16 sps:$4 sm:$0xff]  }
  0x7b   :  { %4995 = vmatpush1.bf16.msra.mxu0 %v7506_v12  ;;  %5528 = vmatpush1.bf16.msra.mxu1 %v7509_v13  ;;  %v7593_v12 = vld [vmem:[%s11196_s1 + $0x588] ss:$16 sps:$4 sm:$0xff]   ;;  %v7598_v13 = vld [vmem:[%s11196_s1 + $0x5a4] ss:$16 sps:$4 sm:$0xff]  }
  0x7c   :  { %4996 = vmatprep.subr.bf16.mxu0 %v7514_v14  ;;  %5529 = vmatprep.subr.bf16.mxu1 %v7517_v15  ;;  %v7601_v14 = vld [vmem:[%s11196_s1 + $0x5ac] ss:$16 sps:$4 sm:$0xff]   ;;  %v7596_v15 = vld [vmem:[%s11196_s1 + $0x5a0] ss:$16 sps:$4 sm:$0xff]  }
  0x7f   :  { %4997 = vmatpush1.bf16.msra.mxu0 %v7512_v16  ;;  %5530 = vmatpush1.bf16.msra.mxu1 %v7515_v17  ;;  %v7599_v16 = vld [vmem:[%s11196_s1 + $0x5a8] ss:$16 sps:$4 sm:$0xff]   ;;  %v7604_v17 = vld [vmem:[%s11196_s1 + $0x5c4] ss:$16 sps:$4 sm:$0xff]  }
  0x80   :  { %5007 = vmatprep.subr.bf16.mxu0 %v7520_v18  ;;  %5540 = vmatprep.subr.bf16.mxu1 %v7523_v19  ;;  %v7607_v18 = vld [vmem:[%s11196_s1 + $0x5cc] ss:$16 sps:$4 sm:$0xff]   ;;  %v53_v19 = vcombine.high %v9011_v23, %v9011_v23 }
  0x81   :  { %v7613_v23 = vld [vmem:[%s11196_s1 + $0x5ec] ss:$16 sps:$4 sm:$0xff]  }
  0x82   :  { %4999 = vmatmul.mubr.bf16.vlgmr.msra.gmra.mrb[0].mxu0 %v172_v21  ;;  %5532 = vmatmul.mubr.bf16.vlgmr.msra.gmra.mrb[0].mxu1 %v172_v21  ;;  %v7605_v21 = vld [vmem:[%s11196_s1 + $0x5c8] ss:$16 sps:$4 sm:$0xff]  }
  0x83   :  { %5008 = vmatpush1.bf16.msra.mxu0 %v7518_v20  ;;  %5541 = vmatpush1.bf16.msra.mxu1 %v7521_v22  ;;  %v7602_v20 = vld [vmem:[%s11196_s1 + $0x5c0] ss:$16 sps:$4 sm:$0xff]   ;;  %v7610_v22 = vld [vmem:[%s11196_s1 + $0x5e4] ss:$16 sps:$4 sm:$0xff]  }
  0x84   :  { %5009 = vmatprep.subr.bf16.mxu0 %v7526_v24  ;;  %5542 = vmatprep.subr.bf16.mxu1 %v7529_v9  ;;  %v9196_v24 = vrot.slane %v53_v19, %v8731_v49  ;;  %v7608_v9 = vld [vmem:[%s11196_s1 + $0x5e0] ss:$16 sps:$4 sm:$0xff]   ;;  %v7689_v19 = vld [vmem:[%s11196_s1 + $0x788] ss:$16 sps:$4 sm:$0xff]  }
  0x85   :  { %5039 = vmatprep.mubr.bf16.mxu0 %v175_v31  ;;  %5572 = vmatprep.mubr.bf16.mxu1 %v175_v31  ;;  %v7614_v31 = vld [vmem:[%s11196_s1 + $0x600] ss:$16 sps:$4 sm:$0xff]  }
  0x87   :  { %5010 = vmatpush1.bf16.msra.mxu0 %v7524_v27  ;;  %5543 = vmatpush1.bf16.msra.mxu1 %v7527_v28  ;;  %v7616_v27 = vld [vmem:[%s11196_s1 + $0x604] ss:$16 sps:$4 sm:$0xff]   ;;  %v7619_v28 = vld [vmem:[%s11196_s1 + $0x60c] ss:$16 sps:$4 sm:$0xff]  }
  0x88   :  { %5011 = vmatprep.subr.bf16.mxu0 %v7532_v29  ;;  %5544 = vmatprep.subr.bf16.mxu1 %v7535_v30  ;;  %v69_v29 = vcombine.high %v9196_v24, %v9196_v24  ;;  %v174_v30 = vpack.c.bf16 %v9021_v25, %v9021_v25  ;;  %v7625_v25 = vld [vmem:[%s11196_s1 + $0x62c] ss:$16 sps:$4 sm:$0xff]  }
  0x8b   :  { %5012 = vmatpush1.bf16.msra.mxu0 %v7530_v32  ;;  %5545 = vmatpush1.bf16.msra.mxu1 %v7533_v33  ;;  %v7617_v32 = vld [vmem:[%s11196_s1 + $0x608] ss:$16 sps:$4 sm:$0xff]   ;;  %v7622_v33 = vld [vmem:[%s11196_s1 + $0x624] ss:$16 sps:$4 sm:$0xff]  }
  0x8c   :  { %5013 = vmatprep.subr.bf16.mxu0 %v7538_v34  ;;  %5546 = vmatprep.subr.bf16.mxu1 %v7541_v35  ;;  %v177_v34 = vpack.c.bf16 %v69_v29, %v69_v29  ;;  %v7620_v35 = vld [vmem:[%s11196_s1 + $0x620] ss:$16 sps:$4 sm:$0xff]   ;;  %v7701_v29 = vld [vmem:[%s11196_s1 + $0x7c8] ss:$16 sps:$4 sm:$0xff]  }
  0x8f   :  { %5014 = vmatpush1.bf16.msra.mxu0 %v7536_v36  ;;  %5547 = vmatpush1.bf16.msra.mxu1 %v7539_v37  ;;  %v7623_v36 = vld [vmem:[%s11196_s1 + $0x628] ss:$16 sps:$4 sm:$0xff]   ;;  %v7628_v37 = vld [vmem:[%s11196_s1 + $0x644] ss:$16 sps:$4 sm:$0xff]  }
  0x90   :  { %5015 = vmatprep.subr.bf16.mxu0 %v7544_v38  ;;  %5548 = vmatprep.subr.bf16.mxu1 %v7547_v39  ;;  %v7631_v38 = vld [vmem:[%s11196_s1 + $0x64c] ss:$16 sps:$4 sm:$0xff]   ;;  %v7626_v39 = vld [vmem:[%s11196_s1 + $0x640] ss:$16 sps:$4 sm:$0xff]  }
  0x93   :  { %5016 = vmatpush1.bf16.msra.mxu0 %v7542_v40  ;;  %5549 = vmatpush1.bf16.msra.mxu1 %v7545_v41  ;;  %v7629_v40 = vld [vmem:[%s11196_s1 + $0x648] ss:$16 sps:$4 sm:$0xff]   ;;  %v7634_v41 = vld [vmem:[%s11196_s1 + $0x664] ss:$16 sps:$4 sm:$0xff]  }
  0x94   :  { %5017 = vmatprep.subr.bf16.mxu0 %v7550_v42  ;;  %5550 = vmatprep.subr.bf16.mxu1 %v7553_v44  ;;  %v7637_v42 = vld [vmem:[%s11196_s1 + $0x66c] ss:$16 sps:$4 sm:$0xff]   ;;  %v7632_v44 = vld [vmem:[%s11196_s1 + $0x660] ss:$16 sps:$4 sm:$0xff]  }
  0x97   :  { %5018 = vmatpush1.bf16.msra.mxu0 %v7548_v45  ;;  %5551 = vmatpush1.bf16.msra.mxu1 %v7551_v46  ;;  %v7635_v45 = vld [vmem:[%s11196_s1 + $0x668] ss:$16 sps:$4 sm:$0xff]   ;;  %v7640_v46 = vld [vmem:[%s11196_s1 + $0x684] ss:$16 sps:$4 sm:$0xff]  }
  0x98   :  { %5019 = vmatprep.subr.bf16.mxu0 %v7556_v47  ;;  %5552 = vmatprep.subr.bf16.mxu1 %v7559_v48  ;;  %v7643_v47 = vld [vmem:[%s11196_s1 + $0x68c] ss:$16 sps:$4 sm:$0xff]   ;;  %v7638_v48 = vld [vmem:[%s11196_s1 + $0x680] ss:$16 sps:$4 sm:$0xff]  }
  0x9b   :  { %5020 = vmatpush1.bf16.msra.mxu0 %v7554_v50  ;;  %5553 = vmatpush1.bf16.msra.mxu1 %v7557_v51  ;;  %v7641_v50 = vld [vmem:[%s11196_s1 + $0x688] ss:$16 sps:$4 sm:$0xff]   ;;  %v7646_v51 = vld [vmem:[%s11196_s1 + $0x6a4] ss:$16 sps:$4 sm:$0xff]  }
  0x9c   :  { %5021 = vmatprep.subr.bf16.mxu0 %v7562_v52  ;;  %5554 = vmatprep.subr.bf16.mxu1 %v7565_v53  ;;  %v7649_v52 = vld [vmem:[%s11196_s1 + $0x6ac] ss:$16 sps:$4 sm:$0xff]   ;;  %v7644_v53 = vld [vmem:[%s11196_s1 + $0x6a0] ss:$16 sps:$4 sm:$0xff]  }
  0x9f   :  { %5022 = vmatpush1.bf16.msra.mxu0 %v7560_v54  ;;  %5555 = vmatpush1.bf16.msra.mxu1 %v7563_v55  ;;  %v7647_v54 = vld [vmem:[%s11196_s1 + $0x6a8] ss:$16 sps:$4 sm:$0xff]   ;;  %v7652_v55 = vld [vmem:[%s11196_s1 + $0x6c4] ss:$16 sps:$4 sm:$0xff]  }
  0xa0   :  { %5023 = vmatprep.subr.bf16.mxu0 %v7568_v56  ;;  %5556 = vmatprep.subr.bf16.mxu1 %v7571_v57  ;;  %v7655_v56 = vld [vmem:[%s11196_s1 + $0x6cc] ss:$16 sps:$4 sm:$0xff]   ;;  %v7650_v57 = vld [vmem:[%s11196_s1 + $0x6c0] ss:$16 sps:$4 sm:$0xff]  }
  0xa3   :  { %5024 = vmatpush1.bf16.msra.mxu0 %v7566_v58  ;;  %5557 = vmatpush1.bf16.msra.mxu1 %v7569_v59  ;;  %v7653_v58 = vld [vmem:[%s11196_s1 + $0x6c8] ss:$16 sps:$4 sm:$0xff]   ;;  %v7658_v59 = vld [vmem:[%s11196_s1 + $0x6e4] ss:$16 sps:$4 sm:$0xff]  }
  0xa4   :  { %5025 = vmatprep.subr.bf16.mxu0 %v7574_v60  ;;  %5558 = vmatprep.subr.bf16.mxu1 %v7577_v61  ;;  %v7661_v60 = vld [vmem:[%s11196_s1 + $0x6ec] ss:$16 sps:$4 sm:$0xff]   ;;  %v7656_v61 = vld [vmem:[%s11196_s1 + $0x6e0] ss:$16 sps:$4 sm:$0xff]  }
  0xa7   :  { %5026 = vmatpush1.bf16.msra.mxu0 %v7572_v62  ;;  %5559 = vmatpush1.bf16.msra.mxu1 %v7575_v63  ;;  %v7659_v62 = vld [vmem:[%s11196_s1 + $0x6e8] ss:$16 sps:$4 sm:$0xff]   ;;  %v7664_v63 = vld [vmem:[%s11196_s1 + $0x704] ss:$16 sps:$4 sm:$0xff]  }
  0xa8   :  { %5027 = vmatprep.subr.bf16.mxu0 %v7580_v0  ;;  %5560 = vmatprep.subr.bf16.mxu1 %v7583_v1  ;;  %v7667_v0 = vld [vmem:[%s11196_s1 + $0x70c] ss:$16 sps:$4 sm:$0xff]   ;;  %v7662_v1 = vld [vmem:[%s11196_s1 + $0x700] ss:$16 sps:$4 sm:$0xff]  }
  0xab   :  { %5028 = vmatpush1.bf16.msra.mxu0 %v7578_v2  ;;  %5561 = vmatpush1.bf16.msra.mxu1 %v7581_v3  ;;  %v7665_v2 = vld [vmem:[%s11196_s1 + $0x708] ss:$16 sps:$4 sm:$0xff]   ;;  %v7670_v3 = vld [vmem:[%s11196_s1 + $0x724] ss:$16 sps:$4 sm:$0xff]  }
  0xac   :  { %5029 = vmatprep.subr.bf16.mxu0 %v7586_v4  ;;  %5562 = vmatprep.subr.bf16.mxu1 %v7589_v5  ;;  %v7673_v4 = vld [vmem:[%s11196_s1 + $0x72c] ss:$16 sps:$4 sm:$0xff]   ;;  %v7668_v5 = vld [vmem:[%s11196_s1 + $0x720] ss:$16 sps:$4 sm:$0xff]  }
  0xaf   :  { %5030 = vmatpush1.bf16.msra.mxu0 %v7584_v6  ;;  %5563 = vmatpush1.bf16.msra.mxu1 %v7587_v7  ;;  %v7671_v6 = vld [vmem:[%s11196_s1 + $0x728] ss:$16 sps:$4 sm:$0xff]   ;;  %v7676_v7 = vld [vmem:[%s11196_s1 + $0x744] ss:$16 sps:$4 sm:$0xff]  }
  0xb0   :  { %5031 = vmatprep.subr.bf16.mxu0 %v7592_v8  ;;  %5564 = vmatprep.subr.bf16.mxu1 %v7595_v10  ;;  %v7679_v8 = vld [vmem:[%s11196_s1 + $0x74c] ss:$16 sps:$4 sm:$0xff]   ;;  %v7674_v10 = vld [vmem:[%s11196_s1 + $0x740] ss:$16 sps:$4 sm:$0xff]  }
  0xb3   :  { %5032 = vmatpush1.bf16.msra.mxu0 %v7590_v11  ;;  %5565 = vmatpush1.bf16.msra.mxu1 %v7593_v12  ;;  %v7677_v11 = vld [vmem:[%s11196_s1 + $0x748] ss:$16 sps:$4 sm:$0xff]   ;;  %v7682_v12 = vld [vmem:[%s11196_s1 + $0x764] ss:$16 sps:$4 sm:$0xff]  }
  0xb4   :  { %5033 = vmatprep.subr.bf16.mxu0 %v7598_v13  ;;  %5566 = vmatprep.subr.bf16.mxu1 %v7601_v14  ;;  %v7685_v13 = vld [vmem:[%s11196_s1 + $0x76c] ss:$16 sps:$4 sm:$0xff]   ;;  %v7680_v14 = vld [vmem:[%s11196_s1 + $0x760] ss:$16 sps:$4 sm:$0xff]  }
  0xb7   :  { %5034 = vmatpush1.bf16.msra.mxu0 %v7596_v15  ;;  %5567 = vmatpush1.bf16.msra.mxu1 %v7599_v16  ;;  %v7683_v15 = vld [vmem:[%s11196_s1 + $0x768] ss:$16 sps:$4 sm:$0xff]   ;;  %v7688_v16 = vld [vmem:[%s11196_s1 + $0x784] ss:$16 sps:$4 sm:$0xff]  }
  0xb8   :  { %5035 = vmatprep.subr.bf16.mxu0 %v7604_v17  ;;  %5568 = vmatprep.subr.bf16.mxu1 %v7607_v18  ;;  %v7691_v17 = vld [vmem:[%s11196_s1 + $0x78c] ss:$16 sps:$4 sm:$0xff]   ;;  %v7686_v18 = vld [vmem:[%s11196_s1 + $0x780] ss:$16 sps:$4 sm:$0xff]  }
  0xbb   :  { %5036 = vmatpush1.bf16.msra.mxu0 %v7602_v20  ;;  %5569 = vmatpush1.bf16.msra.mxu1 %v7605_v21  ;;  %v7694_v20 = vld [vmem:[%s11196_s1 + $0x7a4] ss:$16 sps:$4 sm:$0xff]   ;;  %v7697_v21 = vld [vmem:[%s11196_s1 + $0x7ac] ss:$16 sps:$4 sm:$0xff]  }
  0xbc   :  { %5037 = vmatprep.subr.bf16.mxu0 %v7610_v22  ;;  %5570 = vmatprep.subr.bf16.mxu1 %v7613_v23  ;;  %v7692_v22 = vld [vmem:[%s11196_s1 + $0x7a0] ss:$16 sps:$4 sm:$0xff]   ;;  %v7695_v23 = vld [vmem:[%s11196_s1 + $0x7a8] ss:$16 sps:$4 sm:$0xff]  }
  0xbf   :  { %5038 = vmatpush1.bf16.msra.mxu0 %v7608_v9  ;;  %5571 = vmatpush1.bf16.msra.mxu1 %v7611_v26  ;;  %v7700_v9 = vld [vmem:[%s11196_s1 + $0x7c4] ss:$16 sps:$4 sm:$0xff]   ;;  %v7703_v26 = vld [vmem:[%s11196_s1 + $0x7cc] ss:$16 sps:$4 sm:$0xff]  }
  0xc0   :  { %5048 = vmatprep.subr.bf16.mxu0 %v7616_v27  ;;  %5581 = vmatprep.subr.bf16.mxu1 %v7619_v28  ;;  %v7698_v27 = vld [vmem:[%s11196_s1 + $0x7c0] ss:$16 sps:$4 sm:$0xff]  }
  0xc1   :  { %v9388_v28 = vld [vmem:[%s11195_s0 + $0x10] sm:$0xff] }
  0xc2   :  { %5040 = vmatmul.mubr.bf16.vlgmr.msra.gmra.mrb[0].mxu0 %v174_v30  ;;  %5573 = vmatmul.mubr.bf16.vlgmr.msra.gmra.mrb[0].mxu1 %v174_v30  ;;  %v7706_v30 = vld [vmem:[%s11196_s1 + $0x7e4] ss:$16 sps:$4 sm:$0xff]  }
  0xc3   :  { %5049 = vmatpush1.bf16.msra.mxu0 %v7614_v31  ;;  %5582 = vmatpush1.bf16.msra.mxu1 %v7617_v32  ;;  %v7709_v31 = vld [vmem:[%s11196_s1 + $0x7ec] ss:$16 sps:$4 sm:$0xff]   ;;  %v9401_v32 = vrot.slane %v9388_v28, %v8731_v49 }
  0xc4   :  { %5050 = vmatprep.subr.bf16.mxu0 %v7622_v33  ;;  %5583 = vmatprep.subr.bf16.mxu1 %v7625_v25  ;;  %v7704_v33 = vld [vmem:[%s11196_s1 + $0x7e0] ss:$16 sps:$4 sm:$0xff]   ;;  %v7707_v25 = vld [vmem:[%s11196_s1 + $0x7e8] ss:$16 sps:$4 sm:$0xff]  }
  0xc5   :  { %5080 = vmatprep.mubr.bf16.mxu0 %v177_v34  ;;  %5613 = vmatprep.mubr.bf16.mxu1 %v177_v34  ;;  %v7713_v34 = vld [vmem:[%s11196_s1 + $0x804] ss:$16 sps:$4 sm:$0xff]  }
  0xc7   :  { %5051 = vmatpush1.bf16.msra.mxu0 %v7620_v35  ;;  %5584 = vmatpush1.bf16.msra.mxu1 %v7623_v36  ;;  %v7716_v35 = vld [vmem:[%s11196_s1 + $0x80c] ss:$16 sps:$4 sm:$0xff]   ;;  %v85_v36 = vcombine.high %v9401_v32, %v9401_v32 }
  0xc8   :  { %5052 = vmatprep.subr.bf16.mxu0 %v7628_v37  ;;  %5585 = vmatprep.subr.bf16.mxu1 %v7631_v38  ;;  %v7711_v37 = vld [vmem:[%s11196_s1 + $0x800] ss:$16 sps:$4 sm:$0xff]   ;;  %v176_v38 = vpack.c.bf16 %v9196_v24, %v9196_v24 }
  0xc9   :  { %v7717_v24 = vld [vmem:[%s11196_s1 + $0x820] ss:$16 sps:$4 sm:$0xff]  }
  0xcb   :  { %5053 = vmatpush1.bf16.msra.mxu0 %v7626_v39  ;;  %5586 = vmatpush1.bf16.msra.mxu1 %v7629_v40  ;;  %v7714_v39 = vld [vmem:[%s11196_s1 + $0x808] ss:$16 sps:$4 sm:$0xff]   ;;  %v7719_v40 = vld [vmem:[%s11196_s1 + $0x824] ss:$16 sps:$4 sm:$0xff]  }
  0xcc   :  { %5054 = vmatprep.subr.bf16.mxu0 %v7634_v41  ;;  %5587 = vmatprep.subr.bf16.mxu1 %v7637_v42  ;;  %v7722_v41 = vld [vmem:[%s11196_s1 + $0x82c] ss:$16 sps:$4 sm:$0xff]   ;;  %v179_v42 = vpack.c.bf16 %v85_v36, %v85_v36  ;;  %v7795_v36 = vld [vmem:[%s11196_s1 + $0x9c0] ss:$16 sps:$4 sm:$0xff]  }
  0xcf   :  { %5055 = vmatpush1.bf16.msra.mxu0 %v7632_v44  ;;  %5588 = vmatpush1.bf16.msra.mxu1 %v7635_v45  ;;  %v7720_v44 = vld [vmem:[%s11196_s1 + $0x828] ss:$16 sps:$4 sm:$0xff]   ;;  %v7725_v45 = vld [vmem:[%s11196_s1 + $0x844] ss:$16 sps:$4 sm:$0xff]  }
  0xd0   :  { %5056 = vmatprep.subr.bf16.mxu0 %v7640_v46  ;;  %5589 = vmatprep.subr.bf16.mxu1 %v7643_v47  ;;  %v7728_v46 = vld [vmem:[%s11196_s1 + $0x84c] ss:$16 sps:$4 sm:$0xff]   ;;  %v7723_v47 = vld [vmem:[%s11196_s1 + $0x840] ss:$16 sps:$4 sm:$0xff]  }
  0xd3   :  { %5057 = vmatpush1.bf16.msra.mxu0 %v7638_v48  ;;  %5590 = vmatpush1.bf16.msra.mxu1 %v7641_v50  ;;  %v7726_v48 = vld [vmem:[%s11196_s1 + $0x848] ss:$16 sps:$4 sm:$0xff]   ;;  %v7731_v50 = vld [vmem:[%s11196_s1 + $0x864] ss:$16 sps:$4 sm:$0xff]  }
  0xd4   :  { %5058 = vmatprep.subr.bf16.mxu0 %v7646_v51  ;;  %5591 = vmatprep.subr.bf16.mxu1 %v7649_v52  ;;  %v7734_v51 = vld [vmem:[%s11196_s1 + $0x86c] ss:$16 sps:$4 sm:$0xff]   ;;  %v7729_v52 = vld [vmem:[%s11196_s1 + $0x860] ss:$16 sps:$4 sm:$0xff]  }
  0xd7   :  { %5059 = vmatpush1.bf16.msra.mxu0 %v7644_v53  ;;  %5592 = vmatpush1.bf16.msra.mxu1 %v7647_v54  ;;  %v7732_v53 = vld [vmem:[%s11196_s1 + $0x868] ss:$16 sps:$4 sm:$0xff]   ;;  %v7737_v54 = vld [vmem:[%s11196_s1 + $0x884] ss:$16 sps:$4 sm:$0xff]  }
  0xd8   :  { %5060 = vmatprep.subr.bf16.mxu0 %v7652_v55  ;;  %5593 = vmatprep.subr.bf16.mxu1 %v7655_v56  ;;  %v7740_v55 = vld [vmem:[%s11196_s1 + $0x88c] ss:$16 sps:$4 sm:$0xff]   ;;  %v7735_v56 = vld [vmem:[%s11196_s1 + $0x880] ss:$16 sps:$4 sm:$0xff]  }
  0xdb   :  { %5061 = vmatpush1.bf16.msra.mxu0 %v7650_v57  ;;  %5594 = vmatpush1.bf16.msra.mxu1 %v7653_v58  ;;  %v7738_v57 = vld [vmem:[%s11196_s1 + $0x888] ss:$16 sps:$4 sm:$0xff]   ;;  %v7743_v58 = vld [vmem:[%s11196_s1 + $0x8a4] ss:$16 sps:$4 sm:$0xff]  }
  0xdc   :  { %5062 = vmatprep.subr.bf16.mxu0 %v7658_v59  ;;  %5595 = vmatprep.subr.bf16.mxu1 %v7661_v60  ;;  %v7746_v59 = vld [vmem:[%s11196_s1 + $0x8ac] ss:$16 sps:$4 sm:$0xff]   ;;  %v7741_v60 = vld [vmem:[%s11196_s1 + $0x8a0] ss:$16 sps:$4 sm:$0xff]  }
  0xdf   :  { %5063 = vmatpush1.bf16.msra.mxu0 %v7656_v61  ;;  %5596 = vmatpush1.bf16.msra.mxu1 %v7659_v62  ;;  %v7744_v61 = vld [vmem:[%s11196_s1 + $0x8a8] ss:$16 sps:$4 sm:$0xff]   ;;  %v7749_v62 = vld [vmem:[%s11196_s1 + $0x8c4] ss:$16 sps:$4 sm:$0xff]  }
  0xe0   :  { %5064 = vmatprep.subr.bf16.mxu0 %v7664_v63  ;;  %5597 = vmatprep.subr.bf16.mxu1 %v7667_v0  ;;  %v7752_v63 = vld [vmem:[%s11196_s1 + $0x8cc] ss:$16 sps:$4 sm:$0xff]   ;;  %v7747_v0 = vld [vmem:[%s11196_s1 + $0x8c0] ss:$16 sps:$4 sm:$0xff]  }
  0xe3   :  { %5065 = vmatpush1.bf16.msra.mxu0 %v7662_v1  ;;  %5598 = vmatpush1.bf16.msra.mxu1 %v7665_v2  ;;  %v7750_v1 = vld [vmem:[%s11196_s1 + $0x8c8] ss:$16 sps:$4 sm:$0xff]   ;;  %v7755_v2 = vld [vmem:[%s11196_s1 + $0x8e4] ss:$16 sps:$4 sm:$0xff]  }
  0xe4   :  { %5066 = vmatprep.subr.bf16.mxu0 %v7670_v3  ;;  %5599 = vmatprep.subr.bf16.mxu1 %v7673_v4  ;;  %v7758_v3 = vld [vmem:[%s11196_s1 + $0x8ec] ss:$16 sps:$4 sm:$0xff]   ;;  %v7753_v4 = vld [vmem:[%s11196_s1 + $0x8e0] ss:$16 sps:$4 sm:$0xff]  }
  0xe7   :  { %5067 = vmatpush1.bf16.msra.mxu0 %v7668_v5  ;;  %5600 = vmatpush1.bf16.msra.mxu1 %v7671_v6  ;;  %v7756_v5 = vld [vmem:[%s11196_s1 + $0x8e8] ss:$16 sps:$4 sm:$0xff]   ;;  %v7761_v6 = vld [vmem:[%s11196_s1 + $0x904] ss:$16 sps:$4 sm:$0xff]  }
  0xe8   :  { %5068 = vmatprep.subr.bf16.mxu0 %v7676_v7  ;;  %5601 = vmatprep.subr.bf16.mxu1 %v7679_v8  ;;  %v7764_v7 = vld [vmem:[%s11196_s1 + $0x90c] ss:$16 sps:$4 sm:$0xff]   ;;  %v7759_v8 = vld [vmem:[%s11196_s1 + $0x900] ss:$16 sps:$4 sm:$0xff]  }
  0xeb   :  { %5069 = vmatpush1.bf16.msra.mxu0 %v7674_v10  ;;  %5602 = vmatpush1.bf16.msra.mxu1 %v7677_v11  ;;  %v7762_v10 = vld [vmem:[%s11196_s1 + $0x908] ss:$16 sps:$4 sm:$0xff]   ;;  %v7767_v11 = vld [vmem:[%s11196_s1 + $0x924] ss:$16 sps:$4 sm:$0xff]  }
  0xec   :  { %5070 = vmatprep.subr.bf16.mxu0 %v7682_v12  ;;  %5603 = vmatprep.subr.bf16.mxu1 %v7685_v13  ;;  %v7770_v12 = vld [vmem:[%s11196_s1 + $0x92c] ss:$16 sps:$4 sm:$0xff]   ;;  %v7765_v13 = vld [vmem:[%s11196_s1 + $0x920] ss:$16 sps:$4 sm:$0xff]  }
  0xef   :  { %5071 = vmatpush1.bf16.msra.mxu0 %v7680_v14  ;;  %5604 = vmatpush1.bf16.msra.mxu1 %v7683_v15  ;;  %v7768_v14 = vld [vmem:[%s11196_s1 + $0x928] ss:$16 sps:$4 sm:$0xff]   ;;  %v7773_v15 = vld [vmem:[%s11196_s1 + $0x944] ss:$16 sps:$4 sm:$0xff]  }
  0xf0   :  { %5072 = vmatprep.subr.bf16.mxu0 %v7688_v16  ;;  %5605 = vmatprep.subr.bf16.mxu1 %v7691_v17  ;;  %v7776_v16 = vld [vmem:[%s11196_s1 + $0x94c] ss:$16 sps:$4 sm:$0xff]   ;;  %v7771_v17 = vld [vmem:[%s11196_s1 + $0x940] ss:$16 sps:$4 sm:$0xff]  }
  0xf3   :  { %5073 = vmatpush1.bf16.msra.mxu0 %v7686_v18  ;;  %5606 = vmatpush1.bf16.msra.mxu1 %v7689_v19  ;;  %v7774_v18 = vld [vmem:[%s11196_s1 + $0x948] ss:$16 sps:$4 sm:$0xff]   ;;  %v7779_v19 = vld [vmem:[%s11196_s1 + $0x964] ss:$16 sps:$4 sm:$0xff]  }
  0xf4   :  { %5074 = vmatprep.subr.bf16.mxu0 %v7694_v20  ;;  %5607 = vmatprep.subr.bf16.mxu1 %v7697_v21  ;;  %v7782_v20 = vld [vmem:[%s11196_s1 + $0x96c] ss:$16 sps:$4 sm:$0xff]   ;;  %v7777_v21 = vld [vmem:[%s11196_s1 + $0x960] ss:$16 sps:$4 sm:$0xff]  }
  0xf7   :  { %5075 = vmatpush1.bf16.msra.mxu0 %v7692_v22  ;;  %5608 = vmatpush1.bf16.msra.mxu1 %v7695_v23  ;;  %v7780_v22 = vld [vmem:[%s11196_s1 + $0x968] ss:$16 sps:$4 sm:$0xff]   ;;  %v7785_v23 = vld [vmem:[%s11196_s1 + $0x984] ss:$16 sps:$4 sm:$0xff]  }
  0xf8   :  { %5076 = vmatprep.subr.bf16.mxu0 %v7700_v9  ;;  %5609 = vmatprep.subr.bf16.mxu1 %v7703_v26  ;;  %v7788_v9 = vld [vmem:[%s11196_s1 + $0x98c] ss:$16 sps:$4 sm:$0xff]   ;;  %v7783_v26 = vld [vmem:[%s11196_s1 + $0x980] ss:$16 sps:$4 sm:$0xff]  }
  0xfb   :  { %5077 = vmatpush1.bf16.msra.mxu0 %v7698_v27  ;;  %5610 = vmatpush1.bf16.msra.mxu1 %v7701_v29  ;;  %v7786_v27 = vld [vmem:[%s11196_s1 + $0x988] ss:$16 sps:$4 sm:$0xff]   ;;  %v7791_v29 = vld [vmem:[%s11196_s1 + $0x9a4] ss:$16 sps:$4 sm:$0xff]  }
  0xfc   :  { %5078 = vmatprep.subr.bf16.mxu0 %v7706_v30  ;;  %5611 = vmatprep.subr.bf16.mxu1 %v7709_v31  ;;  %v7794_v30 = vld [vmem:[%s11196_s1 + $0x9ac] ss:$16 sps:$4 sm:$0xff]   ;;  %v7789_v31 = vld [vmem:[%s11196_s1 + $0x9a0] ss:$16 sps:$4 sm:$0xff]  }
  0xff   :  { %5079 = vmatpush1.bf16.msra.mxu0 %v7704_v33  ;;  %5612 = vmatpush1.bf16.msra.mxu1 %v7707_v25  ;;  %v7792_v33 = vld [vmem:[%s11196_s1 + $0x9a8] ss:$16 sps:$4 sm:$0xff]   ;;  %v7797_v25 = vld [vmem:[%s11196_s1 + $0x9c4] ss:$16 sps:$4 sm:$0xff]  }
 0x100   :  { %5089 = vmatprep.subr.bf16.mxu0 %v7713_v34  ;;  %5622 = vmatprep.subr.bf16.mxu1 %v7716_v35  ;;  %v7800_v34 = vld [vmem:[%s11196_s1 + $0x9cc] ss:$16 sps:$4 sm:$0xff]   ;;  %v70_v35 = vcombine.high %v9388_v28, %v9388_v28 }
 0x101   :  { %v7806_v28 = vld [vmem:[%s11196_s1 + $0x9ec] ss:$16 sps:$4 sm:$0xff]  }
 0x102   :  { %5081 = vmatmul.mubr.bf16.vlgmr.msra.gmra.mrb[0].mxu0 %v176_v38  ;;  %5614 = vmatmul.mubr.bf16.vlgmr.msra.gmra.mrb[0].mxu1 %v176_v38  ;;  %v7803_v38 = vld [vmem:[%s11196_s1 + $0x9e4] ss:$16 sps:$4 sm:$0xff]  }
 0x103   :  { %5090 = vmatpush1.bf16.msra.mxu0 %v7711_v37  ;;  %5623 = vmatpush1.bf16.msra.mxu1 %v7714_v39  ;;  %v7798_v37 = vld [vmem:[%s11196_s1 + $0x9c8] ss:$16 sps:$4 sm:$0xff]   ;;  %v9602_v39 = vrot.slane %v70_v35, %v8731_v49 }
 0x104   :  { %5091 = vmatprep.subr.bf16.mxu0 %v7719_v40  ;;  %5624 = vmatprep.subr.bf16.mxu1 %v7722_v41  ;;  %v7801_v40 = vld [vmem:[%s11196_s1 + $0x9e0] ss:$16 sps:$4 sm:$0xff]   ;;  %v7804_v41 = vld [vmem:[%s11196_s1 + $0x9e8] ss:$16 sps:$4 sm:$0xff]  }
 0x105   :  { %5121 = vmatprep.mubr.bf16.mxu0 %v179_v42  ;;  %5654 = vmatprep.mubr.bf16.mxu1 %v179_v42  ;;  %v7809_v42 = vld [vmem:[%s11196_s1 + $0xa04] ss:$16 sps:$4 sm:$0xff]   ;;  %v7882_v35 = vld [vmem:[%s11196_s1 + $0xb88] ss:$16 sps:$4 sm:$0xff]  }
 0x107   :  { %5092 = vmatpush1.bf16.msra.mxu0 %v7717_v24  ;;  %5625 = vmatpush1.bf16.msra.mxu1 %v7720_v44  ;;  %v7812_v24 = vld [vmem:[%s11196_s1 + $0xa0c] ss:$16 sps:$4 sm:$0xff]   ;;  %v86_v44 = vcombine.high %v9602_v39, %v9602_v39 }
 0x108   :  { %5093 = vmatprep.subr.bf16.mxu0 %v7725_v45  ;;  %5626 = vmatprep.subr.bf16.mxu1 %v7728_v46  ;;  %v178_v45 = vpack.c.bf16 %v9401_v32, %v9401_v32  ;;  %v7807_v46 = vld [vmem:[%s11196_s1 + $0xa00] ss:$16 sps:$4 sm:$0xff]   ;;  %v7818_v32 = vld [vmem:[%s11196_s1 + $0xa2c] ss:$16 sps:$4 sm:$0xff]  }
 0x10b   :  { %5094 = vmatpush1.bf16.msra.mxu0 %v7723_v47  ;;  %5627 = vmatpush1.bf16.msra.mxu1 %v7726_v48  ;;  %v7810_v47 = vld [vmem:[%s11196_s1 + $0xa08] ss:$16 sps:$4 sm:$0xff]   ;;  %v7815_v48 = vld [vmem:[%s11196_s1 + $0xa24] ss:$16 sps:$4 sm:$0xff]  }
 0x10c   :  { %5095 = vmatprep.subr.bf16.mxu0 %v7731_v50  ;;  %5628 = vmatprep.subr.bf16.mxu1 %v7734_v51  ;;  %v181_v50 = vpack.c.bf16 %v86_v44, %v86_v44  ;;  %v7813_v51 = vld [vmem:[%s11196_s1 + $0xa20] ss:$16 sps:$4 sm:$0xff]   ;;  %v7894_v44 = vld [vmem:[%s11196_s1 + $0xbc8] ss:$16 sps:$4 sm:$0xff]  }
 0x10f   :  { %5096 = vmatpush1.bf16.msra.mxu0 %v7729_v52  ;;  %5629 = vmatpush1.bf16.msra.mxu1 %v7732_v53  ;;  %v7816_v52 = vld [vmem:[%s11196_s1 + $0xa28] ss:$16 sps:$4 sm:$0xff]   ;;  %v7821_v53 = vld [vmem:[%s11196_s1 + $0xa44] ss:$16 sps:$4 sm:$0xff]  }
 0x110   :  { %5097 = vmatprep.subr.bf16.mxu0 %v7737_v54  ;;  %5630 = vmatprep.subr.bf16.mxu1 %v7740_v55  ;;  %v7824_v54 = vld [vmem:[%s11196_s1 + $0xa4c] ss:$16 sps:$4 sm:$0xff]   ;;  %v7819_v55 = vld [vmem:[%s11196_s1 + $0xa40] ss:$16 sps:$4 sm:$0xff]  }
 0x113   :  { %5098 = vmatpush1.bf16.msra.mxu0 %v7735_v56  ;;  %5631 = vmatpush1.bf16.msra.mxu1 %v7738_v57  ;;  %v7822_v56 = vld [vmem:[%s11196_s1 + $0xa48] ss:$16 sps:$4 sm:$0xff]   ;;  %v7827_v57 = vld [vmem:[%s11196_s1 + $0xa64] ss:$16 sps:$4 sm:$0xff]  }
 0x114   :  { %5099 = vmatprep.subr.bf16.mxu0 %v7743_v58  ;;  %5632 = vmatprep.subr.bf16.mxu1 %v7746_v59  ;;  %v7830_v58 = vld [vmem:[%s11196_s1 + $0xa6c] ss:$16 sps:$4 sm:$0xff]   ;;  %v7825_v59 = vld [vmem:[%s11196_s1 + $0xa60] ss:$16 sps:$4 sm:$0xff]  }
 0x117   :  { %5100 = vmatpush1.bf16.msra.mxu0 %v7741_v60  ;;  %5633 = vmatpush1.bf16.msra.mxu1 %v7744_v61  ;;  %v7828_v60 = vld [vmem:[%s11196_s1 + $0xa68] ss:$16 sps:$4 sm:$0xff]   ;;  %v7833_v61 = vld [vmem:[%s11196_s1 + $0xa84] ss:$16 sps:$4 sm:$0xff]  }
 0x118   :  { %5101 = vmatprep.subr.bf16.mxu0 %v7749_v62  ;;  %5634 = vmatprep.subr.bf16.mxu1 %v7752_v63  ;;  %v7836_v62 = vld [vmem:[%s11196_s1 + $0xa8c] ss:$16 sps:$4 sm:$0xff]   ;;  %v7831_v63 = vld [vmem:[%s11196_s1 + $0xa80] ss:$16 sps:$4 sm:$0xff]  }
 0x11b   :  { %5102 = vmatpush1.bf16.msra.mxu0 %v7747_v0  ;;  %5635 = vmatpush1.bf16.msra.mxu1 %v7750_v1  ;;  %v7834_v0 = vld [vmem:[%s11196_s1 + $0xa88] ss:$16 sps:$4 sm:$0xff]   ;;  %v7839_v1 = vld [vmem:[%s11196_s1 + $0xaa4] ss:$16 sps:$4 sm:$0xff]  }
 0x11c   :  { %5103 = vmatprep.subr.bf16.mxu0 %v7755_v2  ;;  %5636 = vmatprep.subr.bf16.mxu1 %v7758_v3  ;;  %v7842_v2 = vld [vmem:[%s11196_s1 + $0xaac] ss:$16 sps:$4 sm:$0xff]   ;;  %v7837_v3 = vld [vmem:[%s11196_s1 + $0xaa0] ss:$16 sps:$4 sm:$0xff]  }
 0x11f   :  { %5104 = vmatpush1.bf16.msra.mxu0 %v7753_v4  ;;  %5637 = vmatpush1.bf16.msra.mxu1 %v7756_v5  ;;  %v7840_v4 = vld [vmem:[%s11196_s1 + $0xaa8] ss:$16 sps:$4 sm:$0xff]   ;;  %v7845_v5 = vld [vmem:[%s11196_s1 + $0xac4] ss:$16 sps:$4 sm:$0xff]  }
 0x120   :  { %5105 = vmatprep.subr.bf16.mxu0 %v7761_v6  ;;  %5638 = vmatprep.subr.bf16.mxu1 %v7764_v7  ;;  %v7848_v6 = vld [vmem:[%s11196_s1 + $0xacc] ss:$16 sps:$4 sm:$0xff]   ;;  %v7843_v7 = vld [vmem:[%s11196_s1 + $0xac0] ss:$16 sps:$4 sm:$0xff]  }
 0x123   :  { %5106 = vmatpush1.bf16.msra.mxu0 %v7759_v8  ;;  %5639 = vmatpush1.bf16.msra.mxu1 %v7762_v10  ;;  %v7846_v8 = vld [vmem:[%s11196_s1 + $0xac8] ss:$16 sps:$4 sm:$0xff]   ;;  %v7851_v10 = vld [vmem:[%s11196_s1 + $0xae4] ss:$16 sps:$4 sm:$0xff]  }
 0x124   :  { %5107 = vmatprep.subr.bf16.mxu0 %v7767_v11  ;;  %5640 = vmatprep.subr.bf16.mxu1 %v7770_v12  ;;  %v7854_v11 = vld [vmem:[%s11196_s1 + $0xaec] ss:$16 sps:$4 sm:$0xff]   ;;  %v7849_v12 = vld [vmem:[%s11196_s1 + $0xae0] ss:$16 sps:$4 sm:$0xff]  }
 0x127   :  { %5108 = vmatpush1.bf16.msra.mxu0 %v7765_v13  ;;  %5641 = vmatpush1.bf16.msra.mxu1 %v7768_v14  ;;  %v7852_v13 = vld [vmem:[%s11196_s1 + $0xae8] ss:$16 sps:$4 sm:$0xff]   ;;  %v7857_v14 = vld [vmem:[%s11196_s1 + $0xb04] ss:$16 sps:$4 sm:$0xff]  }
 0x128   :  { %5109 = vmatprep.subr.bf16.mxu0 %v7773_v15  ;;  %5642 = vmatprep.subr.bf16.mxu1 %v7776_v16  ;;  %v7860_v15 = vld [vmem:[%s11196_s1 + $0xb0c] ss:$16 sps:$4 sm:$0xff]   ;;  %v7855_v16 = vld [vmem:[%s11196_s1 + $0xb00] ss:$16 sps:$4 sm:$0xff]  }
 0x12b   :  { %5110 = vmatpush1.bf16.msra.mxu0 %v7771_v17  ;;  %5643 = vmatpush1.bf16.msra.mxu1 %v7774_v18  ;;  %v7858_v17 = vld [vmem:[%s11196_s1 + $0xb08] ss:$16 sps:$4 sm:$0xff]   ;;  %v7863_v18 = vld [vmem:[%s11196_s1 + $0xb24] ss:$16 sps:$4 sm:$0xff]  }
 0x12c   :  { %5111 = vmatprep.subr.bf16.mxu0 %v7779_v19  ;;  %5644 = vmatprep.subr.bf16.mxu1 %v7782_v20  ;;  %v7866_v19 = vld [vmem:[%s11196_s1 + $0xb2c] ss:$16 sps:$4 sm:$0xff]   ;;  %v7861_v20 = vld [vmem:[%s11196_s1 + $0xb20] ss:$16 sps:$4 sm:$0xff]  }
 0x12f   :  { %5112 = vmatpush1.bf16.msra.mxu0 %v7777_v21  ;;  %5645 = vmatpush1.bf16.msra.mxu1 %v7780_v22  ;;  %v7864_v21 = vld [vmem:[%s11196_s1 + $0xb28] ss:$16 sps:$4 sm:$0xff]   ;;  %v7869_v22 = vld [vmem:[%s11196_s1 + $0xb44] ss:$16 sps:$4 sm:$0xff]  }
 0x130   :  { %5113 = vmatprep.subr.bf16.mxu0 %v7785_v23  ;;  %5646 = vmatprep.subr.bf16.mxu1 %v7788_v9  ;;  %v7872_v23 = vld [vmem:[%s11196_s1 + $0xb4c] ss:$16 sps:$4 sm:$0xff]   ;;  %v7867_v9 = vld [vmem:[%s11196_s1 + $0xb40] ss:$16 sps:$4 sm:$0xff]  }
 0x133   :  { %5114 = vmatpush1.bf16.msra.mxu0 %v7783_v26  ;;  %5647 = vmatpush1.bf16.msra.mxu1 %v7786_v27  ;;  %v7870_v26 = vld [vmem:[%s11196_s1 + $0xb48] ss:$16 sps:$4 sm:$0xff]   ;;  %v7875_v27 = vld [vmem:[%s11196_s1 + $0xb64] ss:$16 sps:$4 sm:$0xff]  }
 0x134   :  { %5115 = vmatprep.subr.bf16.mxu0 %v7791_v29  ;;  %5648 = vmatprep.subr.bf16.mxu1 %v7794_v30  ;;  %v7878_v29 = vld [vmem:[%s11196_s1 + $0xb6c] ss:$16 sps:$4 sm:$0xff]   ;;  %v7873_v30 = vld [vmem:[%s11196_s1 + $0xb60] ss:$16 sps:$4 sm:$0xff]  }
 0x137   :  { %5116 = vmatpush1.bf16.msra.mxu0 %v7789_v31  ;;  %5649 = vmatpush1.bf16.msra.mxu1 %v7792_v33  ;;  %v7876_v31 = vld [vmem:[%s11196_s1 + $0xb68] ss:$16 sps:$4 sm:$0xff]   ;;  %v7881_v33 = vld [vmem:[%s11196_s1 + $0xb84] ss:$16 sps:$4 sm:$0xff]  }
 0x138   :  { %5117 = vmatprep.subr.bf16.mxu0 %v7797_v25  ;;  %5650 = vmatprep.subr.bf16.mxu1 %v7800_v34  ;;  %v7884_v25 = vld [vmem:[%s11196_s1 + $0xb8c] ss:$16 sps:$4 sm:$0xff]   ;;  %v7879_v34 = vld [vmem:[%s11196_s1 + $0xb80] ss:$16 sps:$4 sm:$0xff]  }
 0x13b   :  { %5118 = vmatpush1.bf16.msra.mxu0 %v7795_v36  ;;  %5651 = vmatpush1.bf16.msra.mxu1 %v7798_v37  ;;  %v7887_v36 = vld [vmem:[%s11196_s1 + $0xba4] ss:$16 sps:$4 sm:$0xff]   ;;  %v7890_v37 = vld [vmem:[%s11196_s1 + $0xbac] ss:$16 sps:$4 sm:$0xff]  }
 0x13c   :  { %5119 = vmatprep.subr.bf16.mxu0 %v7803_v38  ;;  %5652 = vmatprep.subr.bf16.mxu1 %v7806_v28  ;;  %v7885_v38 = vld [vmem:[%s11196_s1 + $0xba0] ss:$16 sps:$4 sm:$0xff]   ;;  %v7888_v28 = vld [vmem:[%s11196_s1 + $0xba8] ss:$16 sps:$4 sm:$0xff]  }
 0x13f   :  { %5120 = vmatpush1.bf16.msra.mxu0 %v7801_v40  ;;  %5653 = vmatpush1.bf16.msra.mxu1 %v7804_v41  ;;  %v7893_v40 = vld [vmem:[%s11196_s1 + $0xbc4] ss:$16 sps:$4 sm:$0xff]   ;;  %v7896_v41 = vld [vmem:[%s11196_s1 + $0xbcc] ss:$16 sps:$4 sm:$0xff]  }
 0x140   :  { %5130 = vmatprep.subr.bf16.mxu0 %v7809_v42  ;;  %5663 = vmatprep.subr.bf16.mxu1 %v7812_v24  ;;  %v9791_v42 = vld [vmem:[%s11195_s0 + $0x18] sm:$0xff]  ;;  %v7891_v24 = vld [vmem:[%s11196_s1 + $0xbc0] ss:$16 sps:$4 sm:$0xff]  }
 0x142   :  { %5122 = vmatmul.mubr.bf16.vlgmr.msra.gmra.mrb[0].mxu0 %v178_v45  ;;  %5655 = vmatmul.mubr.bf16.vlgmr.msra.gmra.mrb[0].mxu1 %v178_v45  ;;  %v7899_v45 = vld [vmem:[%s11196_s1 + $0xbe4] ss:$16 sps:$4 sm:$0xff]  }
 0x143   :  { %5131 = vmatpush1.bf16.msra.mxu0 %v7807_v46  ;;  %5664 = vmatpush1.bf16.msra.mxu1 %v7810_v47  ;;  %v7902_v46 = vld [vmem:[%s11196_s1 + $0xbec] ss:$16 sps:$4 sm:$0xff]   ;;  %v9807_v47 = vrot.slane %v9791_v42, %v8731_v49 }
 0x144   :  { %5132 = vmatprep.subr.bf16.mxu0 %v7815_v48  ;;  %5665 = vmatprep.subr.bf16.mxu1 %v7818_v32  ;;  %v7897_v48 = vld [vmem:[%s11196_s1 + $0xbe0] ss:$16 sps:$4 sm:$0xff]   ;;  %v7900_v32 = vld [vmem:[%s11196_s1 + $0xbe8] ss:$16 sps:$4 sm:$0xff]  }
 0x145   :  { %5162 = vmatprep.mubr.bf16.mxu0 %v181_v50  ;;  %5695 = vmatprep.mubr.bf16.mxu1 %v181_v50  ;;  %v7906_v50 = vld [vmem:[%s11196_s1 + $0xc04] ss:$16 sps:$4 sm:$0xff]  }
 0x147   :  { %5133 = vmatpush1.bf16.msra.mxu0 %v7813_v51  ;;  %5666 = vmatpush1.bf16.msra.mxu1 %v7816_v52  ;;  %v7909_v51 = vld [vmem:[%s11196_s1 + $0xc0c] ss:$16 sps:$4 sm:$0xff]   ;;  %v102_v52 = vcombine.high %v9807_v47, %v9807_v47 }
 0x148   :  { %5134 = vmatprep.subr.bf16.mxu0 %v7821_v53  ;;  %5667 = vmatprep.subr.bf16.mxu1 %v7824_v54  ;;  %v180_v53 = vpack.c.bf16 %v9602_v39, %v9602_v39  ;;  %v7904_v54 = vld [vmem:[%s11196_s1 + $0xc00] ss:$16 sps:$4 sm:$0xff]   ;;  %v7915_v39 = vld [vmem:[%s11196_s1 + $0xc2c] ss:$16 sps:$4 sm:$0xff]  }
 0x14b   :  { %5135 = vmatpush1.bf16.msra.mxu0 %v7819_v55  ;;  %5668 = vmatpush1.bf16.msra.mxu1 %v7822_v56  ;;  %v7907_v55 = vld [vmem:[%s11196_s1 + $0xc08] ss:$16 sps:$4 sm:$0xff]   ;;  %v7912_v56 = vld [vmem:[%s11196_s1 + $0xc24] ss:$16 sps:$4 sm:$0xff]  }
 0x14c   :  { %5136 = vmatprep.subr.bf16.mxu0 %v7827_v57  ;;  %5669 = vmatprep.subr.bf16.mxu1 %v7830_v58  ;;  %v183_v57 = vpack.c.bf16 %v102_v52, %v102_v52  ;;  %v7910_v58 = vld [vmem:[%s11196_s1 + $0xc20] ss:$16 sps:$4 sm:$0xff]  }
 0x14d   :  { %v7988_v52 = vld [vmem:[%s11196_s1 + $0xdc0] ss:$16 sps:$4 sm:$0xff]  }
 0x14f   :  { %5137 = vmatpush1.bf16.msra.mxu0 %v7825_v59  ;;  %5670 = vmatpush1.bf16.msra.mxu1 %v7828_v60  ;;  %v7913_v59 = vld [vmem:[%s11196_s1 + $0xc28] ss:$16 sps:$4 sm:$0xff]   ;;  %v7918_v60 = vld [vmem:[%s11196_s1 + $0xc44] ss:$16 sps:$4 sm:$0xff]  }
 0x150   :  { %5138 = vmatprep.subr.bf16.mxu0 %v7833_v61  ;;  %5671 = vmatprep.subr.bf16.mxu1 %v7836_v62  ;;  %v7921_v61 = vld [vmem:[%s11196_s1 + $0xc4c] ss:$16 sps:$4 sm:$0xff]   ;;  %v7916_v62 = vld [vmem:[%s11196_s1 + $0xc40] ss:$16 sps:$4 sm:$0xff]  }
 0x153   :  { %5139 = vmatpush1.bf16.msra.mxu0 %v7831_v63  ;;  %5672 = vmatpush1.bf16.msra.mxu1 %v7834_v0  ;;  %v7919_v63 = vld [vmem:[%s11196_s1 + $0xc48] ss:$16 sps:$4 sm:$0xff]   ;;  %v7924_v0 = vld [vmem:[%s11196_s1 + $0xc64] ss:$16 sps:$4 sm:$0xff]  }
 0x154   :  { %5140 = vmatprep.subr.bf16.mxu0 %v7839_v1  ;;  %5673 = vmatprep.subr.bf16.mxu1 %v7842_v2  ;;  %v7927_v1 = vld [vmem:[%s11196_s1 + $0xc6c] ss:$16 sps:$4 sm:$0xff]   ;;  %v7922_v2 = vld [vmem:[%s11196_s1 + $0xc60] ss:$16 sps:$4 sm:$0xff]  }
 0x157   :  { %5141 = vmatpush1.bf16.msra.mxu0 %v7837_v3  ;;  %5674 = vmatpush1.bf16.msra.mxu1 %v7840_v4  ;;  %v7925_v3 = vld [vmem:[%s11196_s1 + $0xc68] ss:$16 sps:$4 sm:$0xff]   ;;  %v7930_v4 = vld [vmem:[%s11196_s1 + $0xc84] ss:$16 sps:$4 sm:$0xff]  }
 0x158   :  { %5142 = vmatprep.subr.bf16.mxu0 %v7845_v5  ;;  %5675 = vmatprep.subr.bf16.mxu1 %v7848_v6  ;;  %v7933_v5 = vld [vmem:[%s11196_s1 + $0xc8c] ss:$16 sps:$4 sm:$0xff]   ;;  %v7928_v6 = vld [vmem:[%s11196_s1 + $0xc80] ss:$16 sps:$4 sm:$0xff]  }
 0x15b   :  { %5143 = vmatpush1.bf16.msra.mxu0 %v7843_v7  ;;  %5676 = vmatpush1.bf16.msra.mxu1 %v7846_v8  ;;  %v7931_v7 = vld [vmem:[%s11196_s1 + $0xc88] ss:$16 sps:$4 sm:$0xff]   ;;  %v7936_v8 = vld [vmem:[%s11196_s1 + $0xca4] ss:$16 sps:$4 sm:$0xff]  }
 0x15c   :  { %5144 = vmatprep.subr.bf16.mxu0 %v7851_v10  ;;  %5677 = vmatprep.subr.bf16.mxu1 %v7854_v11  ;;  %v7939_v10 = vld [vmem:[%s11196_s1 + $0xcac] ss:$16 sps:$4 sm:$0xff]   ;;  %v7934_v11 = vld [vmem:[%s11196_s1 + $0xca0] ss:$16 sps:$4 sm:$0xff]  }
 0x15f   :  { %5145 = vmatpush1.bf16.msra.mxu0 %v7849_v12  ;;  %5678 = vmatpush1.bf16.msra.mxu1 %v7852_v13  ;;  %v7937_v12 = vld [vmem:[%s11196_s1 + $0xca8] ss:$16 sps:$4 sm:$0xff]   ;;  %v7942_v13 = vld [vmem:[%s11196_s1 + $0xcc4] ss:$16 sps:$4 sm:$0xff]  }
 0x160   :  { %5146 = vmatprep.subr.bf16.mxu0 %v7857_v14  ;;  %5679 = vmatprep.subr.bf16.mxu1 %v7860_v15  ;;  %v7945_v14 = vld [vmem:[%s11196_s1 + $0xccc] ss:$16 sps:$4 sm:$0xff]   ;;  %v7940_v15 = vld [vmem:[%s11196_s1 + $0xcc0] ss:$16 sps:$4 sm:$0xff]  }
 0x163   :  { %5147 = vmatpush1.bf16.msra.mxu0 %v7855_v16  ;;  %5680 = vmatpush1.bf16.msra.mxu1 %v7858_v17  ;;  %v7943_v16 = vld [vmem:[%s11196_s1 + $0xcc8] ss:$16 sps:$4 sm:$0xff]   ;;  %v7948_v17 = vld [vmem:[%s11196_s1 + $0xce4] ss:$16 sps:$4 sm:$0xff]  }
 0x164   :  { %5148 = vmatprep.subr.bf16.mxu0 %v7863_v18  ;;  %5681 = vmatprep.subr.bf16.mxu1 %v7866_v19  ;;  %v7951_v18 = vld [vmem:[%s11196_s1 + $0xcec] ss:$16 sps:$4 sm:$0xff]   ;;  %v7946_v19 = vld [vmem:[%s11196_s1 + $0xce0] ss:$16 sps:$4 sm:$0xff]  }
 0x167   :  { %5149 = vmatpush1.bf16.msra.mxu0 %v7861_v20  ;;  %5682 = vmatpush1.bf16.msra.mxu1 %v7864_v21  ;;  %v7949_v20 = vld [vmem:[%s11196_s1 + $0xce8] ss:$16 sps:$4 sm:$0xff]   ;;  %v7954_v21 = vld [vmem:[%s11196_s1 + $0xd04] ss:$16 sps:$4 sm:$0xff]  }
 0x168   :  { %5150 = vmatprep.subr.bf16.mxu0 %v7869_v22  ;;  %5683 = vmatprep.subr.bf16.mxu1 %v7872_v23  ;;  %v7957_v22 = vld [vmem:[%s11196_s1 + $0xd0c] ss:$16 sps:$4 sm:$0xff]   ;;  %v7952_v23 = vld [vmem:[%s11196_s1 + $0xd00] ss:$16 sps:$4 sm:$0xff]  }
 0x16b   :  { %5151 = vmatpush1.bf16.msra.mxu0 %v7867_v9  ;;  %5684 = vmatpush1.bf16.msra.mxu1 %v7870_v26  ;;  %v7955_v9 = vld [vmem:[%s11196_s1 + $0xd08] ss:$16 sps:$4 sm:$0xff]   ;;  %v7960_v26 = vld [vmem:[%s11196_s1 + $0xd24] ss:$16 sps:$4 sm:$0xff]  }
 0x16c   :  { %5152 = vmatprep.subr.bf16.mxu0 %v7875_v27  ;;  %5685 = vmatprep.subr.bf16.mxu1 %v7878_v29  ;;  %v7963_v27 = vld [vmem:[%s11196_s1 + $0xd2c] ss:$16 sps:$4 sm:$0xff]   ;;  %v7958_v29 = vld [vmem:[%s11196_s1 + $0xd20] ss:$16 sps:$4 sm:$0xff]  }
 0x16f   :  { %5153 = vmatpush1.bf16.msra.mxu0 %v7873_v30  ;;  %5686 = vmatpush1.bf16.msra.mxu1 %v7876_v31  ;;  %v7961_v30 = vld [vmem:[%s11196_s1 + $0xd28] ss:$16 sps:$4 sm:$0xff]   ;;  %v7966_v31 = vld [vmem:[%s11196_s1 + $0xd44] ss:$16 sps:$4 sm:$0xff]  }
 0x170   :  { %5154 = vmatprep.subr.bf16.mxu0 %v7881_v33  ;;  %5687 = vmatprep.subr.bf16.mxu1 %v7884_v25  ;;  %v7969_v33 = vld [vmem:[%s11196_s1 + $0xd4c] ss:$16 sps:$4 sm:$0xff]   ;;  %v7964_v25 = vld [vmem:[%s11196_s1 + $0xd40] ss:$16 sps:$4 sm:$0xff]  }
 0x173   :  { %5155 = vmatpush1.bf16.msra.mxu0 %v7879_v34  ;;  %5688 = vmatpush1.bf16.msra.mxu1 %v7882_v35  ;;  %v7967_v34 = vld [vmem:[%s11196_s1 + $0xd48] ss:$16 sps:$4 sm:$0xff]   ;;  %v7972_v35 = vld [vmem:[%s11196_s1 + $0xd64] ss:$16 sps:$4 sm:$0xff]  }
 0x174   :  { %5156 = vmatprep.subr.bf16.mxu0 %v7887_v36  ;;  %5689 = vmatprep.subr.bf16.mxu1 %v7890_v37  ;;  %v7975_v36 = vld [vmem:[%s11196_s1 + $0xd6c] ss:$16 sps:$4 sm:$0xff]   ;;  %v7970_v37 = vld [vmem:[%s11196_s1 + $0xd60] ss:$16 sps:$4 sm:$0xff]  }
 0x177   :  { %5157 = vmatpush1.bf16.msra.mxu0 %v7885_v38  ;;  %5690 = vmatpush1.bf16.msra.mxu1 %v7888_v28  ;;  %v7973_v38 = vld [vmem:[%s11196_s1 + $0xd68] ss:$16 sps:$4 sm:$0xff]   ;;  %v7978_v28 = vld [vmem:[%s11196_s1 + $0xd84] ss:$16 sps:$4 sm:$0xff]  }
 0x178   :  { %5158 = vmatprep.subr.bf16.mxu0 %v7893_v40  ;;  %5691 = vmatprep.subr.bf16.mxu1 %v7896_v41  ;;  %v7981_v40 = vld [vmem:[%s11196_s1 + $0xd8c] ss:$16 sps:$4 sm:$0xff]   ;;  %v7976_v41 = vld [vmem:[%s11196_s1 + $0xd80] ss:$16 sps:$4 sm:$0xff]  }
 0x17b   :  { %5159 = vmatpush1.bf16.msra.mxu0 %v7891_v24  ;;  %5692 = vmatpush1.bf16.msra.mxu1 %v7894_v44  ;;  %v7979_v24 = vld [vmem:[%s11196_s1 + $0xd88] ss:$16 sps:$4 sm:$0xff]   ;;  %v7984_v44 = vld [vmem:[%s11196_s1 + $0xda4] ss:$16 sps:$4 sm:$0xff]  }
 0x17c   :  { %5160 = vmatprep.subr.bf16.mxu0 %v7899_v45  ;;  %5693 = vmatprep.subr.bf16.mxu1 %v7902_v46  ;;  %v7987_v45 = vld [vmem:[%s11196_s1 + $0xdac] ss:$16 sps:$4 sm:$0xff]   ;;  %v7982_v46 = vld [vmem:[%s11196_s1 + $0xda0] ss:$16 sps:$4 sm:$0xff]  }
 0x17f   :  { %5161 = vmatpush1.bf16.msra.mxu0 %v7897_v48  ;;  %5694 = vmatpush1.bf16.msra.mxu1 %v7900_v32  ;;  %v7985_v48 = vld [vmem:[%s11196_s1 + $0xda8] ss:$16 sps:$4 sm:$0xff]   ;;  %v7990_v32 = vld [vmem:[%s11196_s1 + $0xdc4] ss:$16 sps:$4 sm:$0xff]  }
 0x180   :  { %5171 = vmatprep.subr.bf16.mxu0 %v7906_v50  ;;  %5704 = vmatprep.subr.bf16.mxu1 %v7909_v51  ;;  %v7993_v50 = vld [vmem:[%s11196_s1 + $0xdcc] ss:$16 sps:$4 sm:$0xff]   ;;  %v87_v51 = vcombine.high %v9791_v42, %v9791_v42 }
 0x181   :  { %v7999_v42 = vld [vmem:[%s11196_s1 + $0xdec] ss:$16 sps:$4 sm:$0xff]  }
 0x182   :  { %5163 = vmatmul.mubr.bf16.vlgmr.msra.gmra.mrb[0].mxu0 %v180_v53  ;;  %5696 = vmatmul.mubr.bf16.vlgmr.msra.gmra.mrb[0].mxu1 %v180_v53  ;;  %v7991_v53 = vld [vmem:[%s11196_s1 + $0xdc8] ss:$16 sps:$4 sm:$0xff]  }
 0x183   :  { %5172 = vmatpush1.bf16.msra.mxu0 %v7904_v54  ;;  %5705 = vmatpush1.bf16.msra.mxu1 %v7907_v55  ;;  %v7996_v54 = vld [vmem:[%s11196_s1 + $0xde4] ss:$16 sps:$4 sm:$0xff]   ;;  %v10008_v55 = vrot.slane %v87_v51, %v8731_v49 }
 0x184   :  { %5173 = vmatprep.subr.bf16.mxu0 %v7912_v56  ;;  %5706 = vmatprep.subr.bf16.mxu1 %v7915_v39  ;;  %v7994_v56 = vld [vmem:[%s11196_s1 + $0xde0] ss:$16 sps:$4 sm:$0xff]   ;;  %v7997_v39 = vld [vmem:[%s11196_s1 + $0xde8] ss:$16 sps:$4 sm:$0xff]  }
 0x185   :  { %5203 = vmatprep.mubr.bf16.mxu0 %v183_v57  ;;  %5736 = vmatprep.mubr.bf16.mxu1 %v183_v57  ;;  %v8002_v57 = vld [vmem:[%s11196_s1 + $0xe04] ss:$16 sps:$4 sm:$0xff]  }
 0x187   :  { %5174 = vmatpush1.bf16.msra.mxu0 %v7910_v58  ;;  %5707 = vmatpush1.bf16.msra.mxu1 %v7913_v59  ;;  %v8005_v58 = vld [vmem:[%s11196_s1 + $0xe0c] ss:$16 sps:$4 sm:$0xff]   ;;  %v103_v59 = vcombine.high %v10008_v55, %v10008_v55 }
 0x188   :  { %5175 = vmatprep.subr.bf16.mxu0 %v7918_v60  ;;  %5708 = vmatprep.subr.bf16.mxu1 %v7921_v61  ;;  %v182_v60 = vpack.c.bf16 %v9807_v47, %v9807_v47  ;;  %v8000_v61 = vld [vmem:[%s11196_s1 + $0xe00] ss:$16 sps:$4 sm:$0xff]   ;;  %v8011_v47 = vld [vmem:[%s11196_s1 + $0xe2c] ss:$16 sps:$4 sm:$0xff]  }
 0x18b   :  { %5176 = vmatpush1.bf16.msra.mxu0 %v7916_v62  ;;  %5709 = vmatpush1.bf16.msra.mxu1 %v7919_v63  ;;  %v8003_v62 = vld [vmem:[%s11196_s1 + $0xe08] ss:$16 sps:$4 sm:$0xff]   ;;  %v8008_v63 = vld [vmem:[%s11196_s1 + $0xe24] ss:$16 sps:$4 sm:$0xff]  }
 0x18c   :  { %5177 = vmatprep.subr.bf16.mxu0 %v7924_v0  ;;  %5710 = vmatprep.subr.bf16.mxu1 %v7927_v1  ;;  %v185_v0 = vpack.c.bf16 %v103_v59, %v103_v59  ;;  %v8006_v1 = vld [vmem:[%s11196_s1 + $0xe20] ss:$16 sps:$4 sm:$0xff]  }
 0x18f   :  { %5178 = vmatpush1.bf16.msra.mxu0 %v7922_v2  ;;  %5711 = vmatpush1.bf16.msra.mxu1 %v7925_v3  ;;  %v8009_v2 = vld [vmem:[%s11196_s1 + $0xe28] ss:$16 sps:$4 sm:$0xff]   ;;  %v8014_v3 = vld [vmem:[%s11196_s1 + $0xe44] ss:$16 sps:$4 sm:$0xff]  }
 0x190   :  { %5179 = vmatprep.subr.bf16.mxu0 %v7930_v4  ;;  %5712 = vmatprep.subr.bf16.mxu1 %v7933_v5  ;;  %v8017_v4 = vld [vmem:[%s11196_s1 + $0xe4c] ss:$16 sps:$4 sm:$0xff]   ;;  %v8012_v5 = vld [vmem:[%s11196_s1 + $0xe40] ss:$16 sps:$4 sm:$0xff]  }
 0x193   :  { %5180 = vmatpush1.bf16.msra.mxu0 %v7928_v6  ;;  %5713 = vmatpush1.bf16.msra.mxu1 %v7931_v7  ;;  %v8015_v6 = vld [vmem:[%s11196_s1 + $0xe48] ss:$16 sps:$4 sm:$0xff]   ;;  %v8020_v7 = vld [vmem:[%s11196_s1 + $0xe64] ss:$16 sps:$4 sm:$0xff]  }
 0x194   :  { %5181 = vmatprep.subr.bf16.mxu0 %v7936_v8  ;;  %5714 = vmatprep.subr.bf16.mxu1 %v7939_v10  ;;  %v8023_v8 = vld [vmem:[%s11196_s1 + $0xe6c] ss:$16 sps:$4 sm:$0xff]   ;;  %v8018_v10 = vld [vmem:[%s11196_s1 + $0xe60] ss:$16 sps:$4 sm:$0xff]  }
 0x197   :  { %5182 = vmatpush1.bf16.msra.mxu0 %v7934_v11  ;;  %5715 = vmatpush1.bf16.msra.mxu1 %v7937_v12  ;;  %v8021_v11 = vld [vmem:[%s11196_s1 + $0xe68] ss:$16 sps:$4 sm:$0xff]   ;;  %v8026_v12 = vld [vmem:[%s11196_s1 + $0xe84] ss:$16 sps:$4 sm:$0xff]  }
 0x198   :  { %5183 = vmatprep.subr.bf16.mxu0 %v7942_v13  ;;  %5716 = vmatprep.subr.bf16.mxu1 %v7945_v14  ;;  %v8029_v13 = vld [vmem:[%s11196_s1 + $0xe8c] ss:$16 sps:$4 sm:$0xff]   ;;  %v8024_v14 = vld [vmem:[%s11196_s1 + $0xe80] ss:$16 sps:$4 sm:$0xff]  }
 0x19b   :  { %5184 = vmatpush1.bf16.msra.mxu0 %v7940_v15  ;;  %5717 = vmatpush1.bf16.msra.mxu1 %v7943_v16  ;;  %v8027_v15 = vld [vmem:[%s11196_s1 + $0xe88] ss:$16 sps:$4 sm:$0xff]   ;;  %v8032_v16 = vld [vmem:[%s11196_s1 + $0xea4] ss:$16 sps:$4 sm:$0xff]  }
 0x19c   :  { %5185 = vmatprep.subr.bf16.mxu0 %v7948_v17  ;;  %5718 = vmatprep.subr.bf16.mxu1 %v7951_v18  ;;  %v8035_v17 = vld [vmem:[%s11196_s1 + $0xeac] ss:$16 sps:$4 sm:$0xff]   ;;  %v8030_v18 = vld [vmem:[%s11196_s1 + $0xea0] ss:$16 sps:$4 sm:$0xff]  }
 0x19f   :  { %5186 = vmatpush1.bf16.msra.mxu0 %v7946_v19  ;;  %5719 = vmatpush1.bf16.msra.mxu1 %v7949_v20  ;;  %v8033_v19 = vld [vmem:[%s11196_s1 + $0xea8] ss:$16 sps:$4 sm:$0xff]   ;;  %v8038_v20 = vld [vmem:[%s11196_s1 + $0xec4] ss:$16 sps:$4 sm:$0xff]  }
 0x1a0   :  { %5187 = vmatprep.subr.bf16.mxu0 %v7954_v21  ;;  %5720 = vmatprep.subr.bf16.mxu1 %v7957_v22  ;;  %v8041_v21 = vld [vmem:[%s11196_s1 + $0xecc] ss:$16 sps:$4 sm:$0xff]   ;;  %v8036_v22 = vld [vmem:[%s11196_s1 + $0xec0] ss:$16 sps:$4 sm:$0xff]  }
 0x1a3   :  { %5188 = vmatpush1.bf16.msra.mxu0 %v7952_v23  ;;  %5721 = vmatpush1.bf16.msra.mxu1 %v7955_v9  ;;  %v8039_v23 = vld [vmem:[%s11196_s1 + $0xec8] ss:$16 sps:$4 sm:$0xff]   ;;  %v8044_v9 = vld [vmem:[%s11196_s1 + $0xee4] ss:$16 sps:$4 sm:$0xff]  }
 0x1a4   :  { %5189 = vmatprep.subr.bf16.mxu0 %v7960_v26  ;;  %5722 = vmatprep.subr.bf16.mxu1 %v7963_v27  ;;  %v8047_v26 = vld [vmem:[%s11196_s1 + $0xeec] ss:$16 sps:$4 sm:$0xff]   ;;  %v8042_v27 = vld [vmem:[%s11196_s1 + $0xee0] ss:$16 sps:$4 sm:$0xff]  }
 0x1a7   :  { %5190 = vmatpush1.bf16.msra.mxu0 %v7958_v29  ;;  %5723 = vmatpush1.bf16.msra.mxu1 %v7961_v30  ;;  %v8045_v29 = vld [vmem:[%s11196_s1 + $0xee8] ss:$16 sps:$4 sm:$0xff]   ;;  %v8050_v30 = vld [vmem:[%s11196_s1 + $0xf04] ss:$16 sps:$4 sm:$0xff]  }
 0x1a8   :  { %5191 = vmatprep.subr.bf16.mxu0 %v7966_v31  ;;  %5724 = vmatprep.subr.bf16.mxu1 %v7969_v33  ;;  %v8053_v31 = vld [vmem:[%s11196_s1 + $0xf0c] ss:$16 sps:$4 sm:$0xff]   ;;  %v8048_v33 = vld [vmem:[%s11196_s1 + $0xf00] ss:$16 sps:$4 sm:$0xff]  }
 0x1ab   :  { %5192 = vmatpush1.bf16.msra.mxu0 %v7964_v25  ;;  %5725 = vmatpush1.bf16.msra.mxu1 %v7967_v34  ;;  %v8051_v25 = vld [vmem:[%s11196_s1 + $0xf08] ss:$16 sps:$4 sm:$0xff]   ;;  %v8056_v34 = vld [vmem:[%s11196_s1 + $0xf24] ss:$16 sps:$4 sm:$0xff]  }
 0x1ac   :  { %5193 = vmatprep.subr.bf16.mxu0 %v7972_v35  ;;  %5726 = vmatprep.subr.bf16.mxu1 %v7975_v36  ;;  %v8059_v35 = vld [vmem:[%s11196_s1 + $0xf2c] ss:$16 sps:$4 sm:$0xff]   ;;  %v8054_v36 = vld [vmem:[%s11196_s1 + $0xf20] ss:$16 sps:$4 sm:$0xff]  }
 0x1af   :  { %5194 = vmatpush1.bf16.msra.mxu0 %v7970_v37  ;;  %5727 = vmatpush1.bf16.msra.mxu1 %v7973_v38  ;;  %v8057_v37 = vld [vmem:[%s11196_s1 + $0xf28] ss:$16 sps:$4 sm:$0xff]   ;;  %v8062_v38 = vld [vmem:[%s11196_s1 + $0xf44] ss:$16 sps:$4 sm:$0xff]  }
 0x1b0   :  { %5195 = vmatprep.subr.bf16.mxu0 %v7978_v28  ;;  %5728 = vmatprep.subr.bf16.mxu1 %v7981_v40  ;;  %v8065_v28 = vld [vmem:[%s11196_s1 + $0xf4c] ss:$16 sps:$4 sm:$0xff]   ;;  %v8060_v40 = vld [vmem:[%s11196_s1 + $0xf40] ss:$16 sps:$4 sm:$0xff]  }
 0x1b3   :  { %5196 = vmatpush1.bf16.msra.mxu0 %v7976_v41  ;;  %5729 = vmatpush1.bf16.msra.mxu1 %v7979_v24  ;;  %v8063_v41 = vld [vmem:[%s11196_s1 + $0xf48] ss:$16 sps:$4 sm:$0xff]   ;;  %v8068_v24 = vld [vmem:[%s11196_s1 + $0xf64] ss:$16 sps:$4 sm:$0xff]  }
 0x1b4   :  { %5197 = vmatprep.subr.bf16.mxu0 %v7984_v44  ;;  %5730 = vmatprep.subr.bf16.mxu1 %v7987_v45  ;;  %v8071_v44 = vld [vmem:[%s11196_s1 + $0xf6c] ss:$16 sps:$4 sm:$0xff]  }
 0x1b7   :  { %5198 = vmatpush1.bf16.msra.mxu0 %v7982_v46  ;;  %5731 = vmatpush1.bf16.msra.mxu1 %v7985_v48 }
 0x1b8   :  { %5199 = vmatprep.subr.bf16.mxu0 %v7990_v32  ;;  %5732 = vmatprep.subr.bf16.mxu1 %v7993_v50 }
 0x1bb   :  { %5200 = vmatpush1.bf16.msra.mxu0 %v7988_v52  ;;  %5733 = vmatpush1.bf16.msra.mxu1 %v7991_v53 }
 0x1bc   :  { %5201 = vmatprep.subr.bf16.mxu0 %v7996_v54  ;;  %5734 = vmatprep.subr.bf16.mxu1 %v7999_v42 }
 0x1bf   :  { %5202 = vmatpush1.bf16.msra.mxu0 %v7994_v56  ;;  %5735 = vmatpush1.bf16.msra.mxu1 %v7997_v39 }
 0x1c0   :  { %5212 = vmatprep.subr.bf16.mxu0 %v8002_v57  ;;  %5745 = vmatprep.subr.bf16.mxu1 %v8005_v58 }
 0x1c2   :  { %5204 = vmatmul.mubr.bf16.vlgmr.msra.gmra.mrb[0].mxu0 %v182_v60  ;;  %5737 = vmatmul.mubr.bf16.vlgmr.msra.gmra.mrb[0].mxu1 %v182_v60 }
 0x1c3   :  { %5213 = vmatpush1.bf16.msra.mxu0 %v8000_v61  ;;  %5746 = vmatpush1.bf16.msra.mxu1 %v8003_v62 }
 0x1c4   :  { %5214 = vmatprep.subr.bf16.mxu0 %v8008_v63  ;;  %5747 = vmatprep.subr.bf16.mxu1 %v8011_v47 }
 0x1c5   :  { %5244 = vmatprep.mubr.bf16.mxu0 %v185_v0  ;;  %5777 = vmatprep.mubr.bf16.mxu1 %v185_v0 }
 0x1c7   :  { %5215 = vmatpush1.bf16.msra.mxu0 %v8006_v1  ;;  %5748 = vmatpush1.bf16.msra.mxu1 %v8009_v2 }
 0x1c8   :  { %5216 = vmatprep.subr.bf16.mxu0 %v8014_v3  ;;  %5749 = vmatprep.subr.bf16.mxu1 %v8017_v4 }
 0x1cb   :  { %5217 = vmatpush1.bf16.msra.mxu0 %v8012_v5  ;;  %5750 = vmatpush1.bf16.msra.mxu1 %v8015_v6 }
 0x1cc   :  { %5218 = vmatprep.subr.bf16.mxu0 %v8020_v7  ;;  %5751 = vmatprep.subr.bf16.mxu1 %v8023_v8 }
 0x1cf   :  { %5219 = vmatpush1.bf16.msra.mxu0 %v8018_v10  ;;  %5752 = vmatpush1.bf16.msra.mxu1 %v8021_v11 }
 0x1d0   :  { %5220 = vmatprep.subr.bf16.mxu0 %v8026_v12  ;;  %5753 = vmatprep.subr.bf16.mxu1 %v8029_v13 }
 0x1d3   :  { %5221 = vmatpush1.bf16.msra.mxu0 %v8024_v14  ;;  %5754 = vmatpush1.bf16.msra.mxu1 %v8027_v15 }
 0x1d4   :  { %5222 = vmatprep.subr.bf16.mxu0 %v8032_v16  ;;  %5755 = vmatprep.subr.bf16.mxu1 %v8035_v17 }
 0x1d7   :  { %5223 = vmatpush1.bf16.msra.mxu0 %v8030_v18  ;;  %5756 = vmatpush1.bf16.msra.mxu1 %v8033_v19 }
 0x1d8   :  { %5224 = vmatprep.subr.bf16.mxu0 %v8038_v20  ;;  %5757 = vmatprep.subr.bf16.mxu1 %v8041_v21 }
 0x1db   :  { %5225 = vmatpush1.bf16.msra.mxu0 %v8036_v22  ;;  %5758 = vmatpush1.bf16.msra.mxu1 %v8039_v23 }
 0x1dc   :  { %5226 = vmatprep.subr.bf16.mxu0 %v8044_v9  ;;  %5759 = vmatprep.subr.bf16.mxu1 %v8047_v26 }
 0x1df   :  { %5227 = vmatpush1.bf16.msra.mxu0 %v8042_v27  ;;  %5760 = vmatpush1.bf16.msra.mxu1 %v8045_v29 }
 0x1e0   :  { %5228 = vmatprep.subr.bf16.mxu0 %v8050_v30  ;;  %5761 = vmatprep.subr.bf16.mxu1 %v8053_v31 }
 0x1e3   :  { %5229 = vmatpush1.bf16.msra.mxu0 %v8048_v33  ;;  %5762 = vmatpush1.bf16.msra.mxu1 %v8051_v25 }
 0x1e4   :  { %5230 = vmatprep.subr.bf16.mxu0 %v8056_v34  ;;  %5763 = vmatprep.subr.bf16.mxu1 %v8059_v35 }
 0x1e7   :  { %5231 = vmatpush1.bf16.msra.mxu0 %v8054_v36  ;;  %5764 = vmatpush1.bf16.msra.mxu1 %v8057_v37 }
 0x1e8   :  { %5232 = vmatprep.subr.bf16.mxu0 %v8062_v38  ;;  %5765 = vmatprep.subr.bf16.mxu1 %v8065_v28 }
 0x1e9   :  { %10 = vsyncpa [#allocation3], 0  ;;  %v8066_v45 = vld [vmem:[%s11196_s1 + $0xf60] ss:$16 sps:$4 sm:$0xff]   ;;  %v8069_v46 = vld [vmem:[%s11196_s1 + $0xf68] ss:$16 sps:$4 sm:$0xff]   ;;  %v184_v3 = vpack.c.bf16 %v10008_v55, %v10008_v55 }
 0x1ea   :  { %v8074_v48 = vld [vmem:[%s11196_s1 + $0xf84] ss:$16 sps:$4 sm:$0xff]   ;;  %v8077_v32 = vld [vmem:[%s11196_s1 + $0xf8c] ss:$16 sps:$4 sm:$0xff]   ;;  %v8072_v50 = vld [vmem:[%s11196_s1 + $0xf80] ss:$16 sps:$4 sm:$0xff]  }
 0x1eb   :  { %5233 = vmatpush1.bf16.msra.mxu0 %v8060_v40  ;;  %5766 = vmatpush1.bf16.msra.mxu1 %v8063_v41  ;;  %v8075_v51 = vld [vmem:[%s11196_s1 + $0xf88] ss:$16 sps:$4 sm:$0xff]   ;;  %v8080_v52 = vld [vmem:[%s11196_s1 + $0xfa4] ss:$16 sps:$4 sm:$0xff]   ;;  %v8083_v53 = vld [vmem:[%s11196_s1 + $0xfac] ss:$16 sps:$4 sm:$0xff]  }
 0x1ec   :  { %5234 = vmatprep.subr.bf16.mxu0 %v8068_v24  ;;  %5767 = vmatprep.subr.bf16.mxu1 %v8071_v44  ;;  %v8078_v54 = vld [vmem:[%s11196_s1 + $0xfa0] ss:$16 sps:$4 sm:$0xff]   ;;  %v8081_v42 = vld [vmem:[%s11196_s1 + $0xfa8] ss:$16 sps:$4 sm:$0xff]   ;;  %v8086_v56 = vld [vmem:[%s11196_s1 + $0xfc4] ss:$16 sps:$4 sm:$0xff]  }
 0x1ed   :  { %v8089_v39 = vld [vmem:[%s11196_s1 + $0xfcc] ss:$16 sps:$4 sm:$0xff]   ;;  %v10197_v57 = vld [vmem:[%s11195_s0 + $0x20] sm:$0xff]  ;;  %v8087_v59 = vld [vmem:[%s11196_s1 + $0xfc8] ss:$16 sps:$4 sm:$0xff]   ;;  %vm4921_vm0 = vcmask 523264  }
 0x1ee   :  { %v8084_v58 = vld [vmem:[%s11196_s1 + $0xfc0] ss:$16 sps:$4 sm:$0xff]   ;;  %v8092_v60 = vld [vmem:[%s11196_s1 + $0xfe4] ss:$16 sps:$4 sm:$0xff]   ;;  %v8095_v61 = vld [vmem:[%s11196_s1 + $0xfec] ss:$16 sps:$4 sm:$0xff]   ;;  %v10213_v62 = vrot.slane %v10197_v57, %v8731_v49 }
 0x1ef   :  { %5235 = vmatpush1.bf16.msra.mxu0 %v8066_v45  ;;  %5768 = vmatpush1.bf16.msra.mxu1 %v8069_v46  ;;  %v8090_v63 = vld [vmem:[%s11196_s1 + $0xfe0] ss:$16 sps:$4 sm:$0xff]   ;;  %v8093_v47 = vld [vmem:[%s11196_s1 + $0xfe8] ss:$16 sps:$4 sm:$0xff]   ;;  %v8099_v0 = vld [vmem:[%s11196_s1 + $0x1004] ss:$16 sps:$4 sm:$0xff]  }
 0x1f0   :  { %5236 = vmatprep.subr.bf16.mxu0 %v8074_v48  ;;  %5769 = vmatprep.subr.bf16.mxu1 %v8077_v32  ;;  %v8102_v1 = vld [vmem:[%s11196_s1 + $0x100c] ss:$16 sps:$4 sm:$0xff]   ;;  %v119_v2 = vcombine.high %v10213_v62, %v10213_v62  ;;  %v8097_v4 = vld [vmem:[%s11196_s1 + $0x1000] ss:$16 sps:$4 sm:$0xff]   ;;  %v8100_v5 = vld [vmem:[%s11196_s1 + $0x1008] ss:$16 sps:$4 sm:$0xff]  }
 0x1f1   :  { %v8105_v6 = vld [vmem:[%s11196_s1 + $0x1024] ss:$16 sps:$4 sm:$0xff]   ;;  %v8108_v55 = vld [vmem:[%s11196_s1 + $0x102c] ss:$16 sps:$4 sm:$0xff]   ;;  %v8103_v8 = vld [vmem:[%s11196_s1 + $0x1020] ss:$16 sps:$4 sm:$0xff]  }
 0x1f2   :  { %v187_v7 = vpack.c.bf16 %v119_v2, %v119_v2  ;;  %v8106_v10 = vld [vmem:[%s11196_s1 + $0x1028] ss:$16 sps:$4 sm:$0xff]   ;;  %v8111_v11 = vld [vmem:[%s11196_s1 + $0x1044] ss:$16 sps:$4 sm:$0xff]   ;;  %v8114_v12 = vld [vmem:[%s11196_s1 + $0x104c] ss:$16 sps:$4 sm:$0xff]  }
 0x1f3   :  { %5237 = vmatpush1.bf16.msra.mxu0 %v8072_v50  ;;  %5770 = vmatpush1.bf16.msra.mxu1 %v8075_v51  ;;  %v8109_v13 = vld [vmem:[%s11196_s1 + $0x1040] ss:$16 sps:$4 sm:$0xff]   ;;  %v8112_v14 = vld [vmem:[%s11196_s1 + $0x1048] ss:$16 sps:$4 sm:$0xff]   ;;  %v8117_v15 = vld [vmem:[%s11196_s1 + $0x1064] ss:$16 sps:$4 sm:$0xff]  }
 0x1f4   :  { %5238 = vmatprep.subr.bf16.mxu0 %v8080_v52  ;;  %5771 = vmatprep.subr.bf16.mxu1 %v8083_v53  ;;  %v8120_v16 = vld [vmem:[%s11196_s1 + $0x106c] ss:$16 sps:$4 sm:$0xff]   ;;  %v8115_v17 = vld [vmem:[%s11196_s1 + $0x1060] ss:$16 sps:$4 sm:$0xff]   ;;  %v8118_v18 = vld [vmem:[%s11196_s1 + $0x1068] ss:$16 sps:$4 sm:$0xff]  }
 0x1f5   :  { %v8123_v19 = vld [vmem:[%s11196_s1 + $0x1084] ss:$16 sps:$4 sm:$0xff]   ;;  %v8126_v20 = vld [vmem:[%s11196_s1 + $0x108c] ss:$16 sps:$4 sm:$0xff]   ;;  %v8121_v21 = vld [vmem:[%s11196_s1 + $0x1080] ss:$16 sps:$4 sm:$0xff]  }
 0x1f6   :  { %v8124_v22 = vld [vmem:[%s11196_s1 + $0x1088] ss:$16 sps:$4 sm:$0xff]   ;;  %v8129_v23 = vld [vmem:[%s11196_s1 + $0x10a4] ss:$16 sps:$4 sm:$0xff]   ;;  %v8132_v9 = vld [vmem:[%s11196_s1 + $0x10ac] ss:$16 sps:$4 sm:$0xff]  }
 0x1f7   :  { %5239 = vmatpush1.bf16.msra.mxu0 %v8078_v54  ;;  %5772 = vmatpush1.bf16.msra.mxu1 %v8081_v42  ;;  %v8127_v26 = vld [vmem:[%s11196_s1 + $0x10a0] ss:$16 sps:$4 sm:$0xff]   ;;  %v8130_v27 = vld [vmem:[%s11196_s1 + $0x10a8] ss:$16 sps:$4 sm:$0xff]   ;;  %v8135_v29 = vld [vmem:[%s11196_s1 + $0x10c4] ss:$16 sps:$4 sm:$0xff]  }
 0x1f8   :  { %5240 = vmatprep.subr.bf16.mxu0 %v8086_v56  ;;  %5773 = vmatprep.subr.bf16.mxu1 %v8089_v39  ;;  %v8138_v30 = vld [vmem:[%s11196_s1 + $0x10cc] ss:$16 sps:$4 sm:$0xff]   ;;  %v8133_v31 = vld [vmem:[%s11196_s1 + $0x10c0] ss:$16 sps:$4 sm:$0xff]   ;;  %v8136_v33 = vld [vmem:[%s11196_s1 + $0x10c8] ss:$16 sps:$4 sm:$0xff]  }
 0x1f9   :  { %v8141_v25 = vld [vmem:[%s11196_s1 + $0x10e4] ss:$16 sps:$4 sm:$0xff]   ;;  %v8144_v34 = vld [vmem:[%s11196_s1 + $0x10ec] ss:$16 sps:$4 sm:$0xff]   ;;  %v8139_v35 = vld [vmem:[%s11196_s1 + $0x10e0] ss:$16 sps:$4 sm:$0xff]  }
 0x1fa   :  { %v8142_v36 = vld [vmem:[%s11196_s1 + $0x10e8] ss:$16 sps:$4 sm:$0xff]   ;;  %v8147_v37 = vld [vmem:[%s11196_s1 + $0x1104] ss:$16 sps:$4 sm:$0xff]   ;;  %v8150_v38 = vld [vmem:[%s11196_s1 + $0x110c] ss:$16 sps:$4 sm:$0xff]  }
 0x1fb   :  { %5241 = vmatpush1.bf16.msra.mxu0 %v8084_v58  ;;  %5774 = vmatpush1.bf16.msra.mxu1 %v8087_v59  ;;  %v8145_v28 = vld [vmem:[%s11196_s1 + $0x1100] ss:$16 sps:$4 sm:$0xff]   ;;  %v8148_v40 = vld [vmem:[%s11196_s1 + $0x1108] ss:$16 sps:$4 sm:$0xff]   ;;  %v8153_v41 = vld [vmem:[%s11196_s1 + $0x1124] ss:$16 sps:$4 sm:$0xff]  }
 0x1fc   :  { %5242 = vmatprep.subr.bf16.mxu0 %v8092_v60  ;;  %5775 = vmatprep.subr.bf16.mxu1 %v8095_v61  ;;  %v8156_v24 = vld [vmem:[%s11196_s1 + $0x112c] ss:$16 sps:$4 sm:$0xff]   ;;  %v8151_v44 = vld [vmem:[%s11196_s1 + $0x1120] ss:$16 sps:$4 sm:$0xff]   ;;  %v8154_v45 = vld [vmem:[%s11196_s1 + $0x1128] ss:$16 sps:$4 sm:$0xff]  }
 0x1fd   :  { %v8159_v46 = vld [vmem:[%s11196_s1 + $0x1144] ss:$16 sps:$4 sm:$0xff]   ;;  %v8162_v48 = vld [vmem:[%s11196_s1 + $0x114c] ss:$16 sps:$4 sm:$0xff]   ;;  %v8157_v32 = vld [vmem:[%s11196_s1 + $0x1140] ss:$16 sps:$4 sm:$0xff]  }
 0x1fe   :  { %v8160_v50 = vld [vmem:[%s11196_s1 + $0x1148] ss:$16 sps:$4 sm:$0xff]   ;;  %v8165_v51 = vld [vmem:[%s11196_s1 + $0x1164] ss:$16 sps:$4 sm:$0xff]   ;;  %v8168_v52 = vld [vmem:[%s11196_s1 + $0x116c] ss:$16 sps:$4 sm:$0xff]  }
 0x1ff   :  { %5243 = vmatpush1.bf16.msra.mxu0 %v8090_v63  ;;  %5776 = vmatpush1.bf16.msra.mxu1 %v8093_v47  ;;  %v8163_v53 = vld [vmem:[%s11196_s1 + $0x1160] ss:$16 sps:$4 sm:$0xff]   ;;  %v8166_v54 = vld [vmem:[%s11196_s1 + $0x1168] ss:$16 sps:$4 sm:$0xff]   ;;  %v8171_v42 = vld [vmem:[%s11196_s1 + $0x1184] ss:$16 sps:$4 sm:$0xff]  }
 0x200   :  { %5253 = vmatprep.subr.bf16.mxu0 %v8099_v0  ;;  %5786 = vmatprep.subr.bf16.mxu1 %v8102_v1  ;;  %v8174_v56 = vld [vmem:[%s11196_s1 + $0x118c] ss:$16 sps:$4 sm:$0xff]   ;;  %v8169_v39 = vld [vmem:[%s11196_s1 + $0x1180] ss:$16 sps:$4 sm:$0xff]   ;;  %v8172_v58 = vld [vmem:[%s11196_s1 + $0x1188] ss:$16 sps:$4 sm:$0xff]   ;;  %v104_v1 = vcombine.high %v10197_v57, %v10197_v57 }
 0x201   :  { %v8177_v59 = vld [vmem:[%s11196_s1 + $0x11a4] ss:$16 sps:$4 sm:$0xff]   ;;  %v8180_v60 = vld [vmem:[%s11196_s1 + $0x11ac] ss:$16 sps:$4 sm:$0xff]   ;;  %v8175_v61 = vld [vmem:[%s11196_s1 + $0x11a0] ss:$16 sps:$4 sm:$0xff]  }
 0x202   :  { %5245 = vmatmul.mubr.bf16.vlgmr.msra.gmra.mrb[0].mxu0 %v184_v3  ;;  %5778 = vmatmul.mubr.bf16.vlgmr.msra.gmra.mrb[0].mxu1 %v184_v3  ;;  %v8178_v63 = vld [vmem:[%s11196_s1 + $0x11a8] ss:$16 sps:$4 sm:$0xff]   ;;  %v8183_v47 = vld [vmem:[%s11196_s1 + $0x11c4] ss:$16 sps:$4 sm:$0xff]   ;;  %v8186_v0 = vld [vmem:[%s11196_s1 + $0x11cc] ss:$16 sps:$4 sm:$0xff]  }
 0x203   :  { %5254 = vmatpush1.bf16.msra.mxu0 %v8097_v4  ;;  %5787 = vmatpush1.bf16.msra.mxu1 %v8100_v5  ;;  %v8181_v2 = vld [vmem:[%s11196_s1 + $0x11c0] ss:$16 sps:$4 sm:$0xff]   ;;  %v8184_v3 = vld [vmem:[%s11196_s1 + $0x11c8] ss:$16 sps:$4 sm:$0xff]   ;;  %v8189_v4 = vld [vmem:[%s11196_s1 + $0x11e4] ss:$16 sps:$4 sm:$0xff]   ;;  %v10414_v5 = vrot.slane %v104_v1, %v8731_v49 }
 0x204   :  { %5255 = vmatprep.subr.bf16.mxu0 %v8105_v6  ;;  %5788 = vmatprep.subr.bf16.mxu1 %v8108_v55  ;;  %v8192_v57 = vld [vmem:[%s11196_s1 + $0x11ec] ss:$16 sps:$4 sm:$0xff]   ;;  %v8187_v6 = vld [vmem:[%s11196_s1 + $0x11e0] ss:$16 sps:$4 sm:$0xff]   ;;  %v8190_v55 = vld [vmem:[%s11196_s1 + $0x11e8] ss:$16 sps:$4 sm:$0xff]  }
 0x205   :  { %5285 = vmatprep.mubr.bf16.mxu0 %v187_v7  ;;  %5818 = vmatprep.mubr.bf16.mxu1 %v187_v7  ;;  %v8195_v7 = vld [vmem:[%s11196_s1 + $0x1204] ss:$16 sps:$4 sm:$0xff]   ;;  %v8268_v1 = vld [vmem:[%s11196_s1 + $0x1388] ss:$16 sps:$4 sm:$0xff]   ;;  %s8565_s10 = smov [#allocation2]   ;;  %vm6342_vm1 = vcmask 9216  }
 0x206   :  { %s6350_s11 = sshll.u32 %s8565_s10, 4  ;;  %s6351_s11 = int_to_ptr.vmem [resolvable:$true] %s6350_s11 }
 0x207   :  { %5256 = vmatpush1.bf16.msra.mxu0 %v8103_v8  ;;  %5789 = vmatpush1.bf16.msra.mxu1 %v8106_v10  ;;  %v8198_v8 = vld [vmem:[%s11196_s1 + $0x120c] ss:$16 sps:$4 sm:$0xff]   ;;  %v120_v10 = vcombine.high %v10414_v5, %v10414_v5  ;;  %s8539_s12 = scalar_lea.vmem %s6351_s11, 32  ;;  %p8544_p1 = scmp.lt.s32.totalorder %s6351_s11, %s6351_s11 }
 0x208   :  { %5257 = vmatprep.subr.bf16.mxu0 %v8111_v11  ;;  %5790 = vmatprep.subr.bf16.mxu1 %v8114_v12  ;;  %v186_v11 = vpack.c.bf16 %v10213_v62, %v10213_v62  ;;  %v8193_v12 = vld [vmem:[%s11196_s1 + $0x1200] ss:$16 sps:$4 sm:$0xff]   ;;  %v8204_v62 = vld [vmem:[%s11196_s1 + $0x122c] ss:$16 sps:$4 sm:$0xff]   ;;  %p8540_p0 = scmp.ne.s32.totalorder %s6351_s11, %s8539_s12  ;;  %p8545_p2 = scmp.lt.s32.totalorder %s8539_s12, %s8539_s12 }
 0x20a   :  { %p8546_p3 = por %p8545_p2, %p8544_p1 }
 0x20b   :  { %5258 = vmatpush1.bf16.msra.mxu0 %v8109_v13  ;;  %5791 = vmatpush1.bf16.msra.mxu1 %v8112_v14  ;;  %v8196_v13 = vld [vmem:[%s11196_s1 + $0x1208] ss:$16 sps:$4 sm:$0xff]   ;;  %v8201_v14 = vld [vmem:[%s11196_s1 + $0x1224] ss:$16 sps:$4 sm:$0xff]  }
 0x20c   :  { %5259 = vmatprep.subr.bf16.mxu0 %v8117_v15  ;;  %5792 = vmatprep.subr.bf16.mxu1 %v8120_v16  ;;  %v189_v15 = vpack.c.bf16 %v120_v10, %v120_v10  ;;  %v8199_v16 = vld [vmem:[%s11196_s1 + $0x1220] ss:$16 sps:$4 sm:$0xff]   ;;  %v8280_v10 = vld [vmem:[%s11196_s1 + $0x13c8] ss:$16 sps:$4 sm:$0xff]   ;;  %p8547_p4 = pnand %p8546_p3, %p8540_p0 }
 0x20f   :  { %5260 = vmatpush1.bf16.msra.mxu0 %v8115_v17  ;;  %5793 = vmatpush1.bf16.msra.mxu1 %v8118_v18  ;;  %v8202_v17 = vld [vmem:[%s11196_s1 + $0x1228] ss:$16 sps:$4 sm:$0xff]   ;;  %v8207_v18 = vld [vmem:[%s11196_s1 + $0x1244] ss:$16 sps:$4 sm:$0xff]  }
 0x210   :  { %5261 = vmatprep.subr.bf16.mxu0 %v8123_v19  ;;  %5794 = vmatprep.subr.bf16.mxu1 %v8126_v20  ;;  %v8210_v19 = vld [vmem:[%s11196_s1 + $0x124c] ss:$16 sps:$4 sm:$0xff]   ;;  %v8205_v20 = vld [vmem:[%s11196_s1 + $0x1240] ss:$16 sps:$4 sm:$0xff]  }
 0x213   :  { %5262 = vmatpush1.bf16.msra.mxu0 %v8121_v21  ;;  %5795 = vmatpush1.bf16.msra.mxu1 %v8124_v22  ;;  %v8208_v21 = vld [vmem:[%s11196_s1 + $0x1248] ss:$16 sps:$4 sm:$0xff]   ;;  %v8213_v22 = vld [vmem:[%s11196_s1 + $0x1264] ss:$16 sps:$4 sm:$0xff]  }
 0x214   :  { %5263 = vmatprep.subr.bf16.mxu0 %v8129_v23  ;;  %5796 = vmatprep.subr.bf16.mxu1 %v8132_v9  ;;  %v8216_v23 = vld [vmem:[%s11196_s1 + $0x126c] ss:$16 sps:$4 sm:$0xff]   ;;  %v8211_v9 = vld [vmem:[%s11196_s1 + $0x1260] ss:$16 sps:$4 sm:$0xff]  }
 0x217   :  { %5264 = vmatpush1.bf16.msra.mxu0 %v8127_v26  ;;  %5797 = vmatpush1.bf16.msra.mxu1 %v8130_v27  ;;  %v8214_v26 = vld [vmem:[%s11196_s1 + $0x1268] ss:$16 sps:$4 sm:$0xff]   ;;  %v8219_v27 = vld [vmem:[%s11196_s1 + $0x1284] ss:$16 sps:$4 sm:$0xff]  }
 0x218   :  { %5265 = vmatprep.subr.bf16.mxu0 %v8135_v29  ;;  %5798 = vmatprep.subr.bf16.mxu1 %v8138_v30  ;;  %v8222_v29 = vld [vmem:[%s11196_s1 + $0x128c] ss:$16 sps:$4 sm:$0xff]   ;;  %v8217_v30 = vld [vmem:[%s11196_s1 + $0x1280] ss:$16 sps:$4 sm:$0xff]  }
 0x21b   :  { %5266 = vmatpush1.bf16.msra.mxu0 %v8133_v31  ;;  %5799 = vmatpush1.bf16.msra.mxu1 %v8136_v33  ;;  %v8220_v31 = vld [vmem:[%s11196_s1 + $0x1288] ss:$16 sps:$4 sm:$0xff]   ;;  %v8225_v33 = vld [vmem:[%s11196_s1 + $0x12a4] ss:$16 sps:$4 sm:$0xff]  }
 0x21c   :  { %5267 = vmatprep.subr.bf16.mxu0 %v8141_v25  ;;  %5800 = vmatprep.subr.bf16.mxu1 %v8144_v34  ;;  %v8228_v25 = vld [vmem:[%s11196_s1 + $0x12ac] ss:$16 sps:$4 sm:$0xff]   ;;  %v8223_v34 = vld [vmem:[%s11196_s1 + $0x12a0] ss:$16 sps:$4 sm:$0xff]  }
 0x21f   :  { %5268 = vmatpush1.bf16.msra.mxu0 %v8139_v35  ;;  %5801 = vmatpush1.bf16.msra.mxu1 %v8142_v36  ;;  %v8226_v35 = vld [vmem:[%s11196_s1 + $0x12a8] ss:$16 sps:$4 sm:$0xff]   ;;  %v8231_v36 = vld [vmem:[%s11196_s1 + $0x12c4] ss:$16 sps:$4 sm:$0xff]  }
 0x220   :  { %5269 = vmatprep.subr.bf16.mxu0 %v8147_v37  ;;  %5802 = vmatprep.subr.bf16.mxu1 %v8150_v38  ;;  %v8234_v37 = vld [vmem:[%s11196_s1 + $0x12cc] ss:$16 sps:$4 sm:$0xff]   ;;  %v8229_v38 = vld [vmem:[%s11196_s1 + $0x12c0] ss:$16 sps:$4 sm:$0xff]  }
 0x223   :  { %5270 = vmatpush1.bf16.msra.mxu0 %v8145_v28  ;;  %5803 = vmatpush1.bf16.msra.mxu1 %v8148_v40  ;;  %v8232_v28 = vld [vmem:[%s11196_s1 + $0x12c8] ss:$16 sps:$4 sm:$0xff]   ;;  %v8237_v40 = vld [vmem:[%s11196_s1 + $0x12e4] ss:$16 sps:$4 sm:$0xff]  }
 0x224   :  { %5271 = vmatprep.subr.bf16.mxu0 %v8153_v41  ;;  %5804 = vmatprep.subr.bf16.mxu1 %v8156_v24  ;;  %v8240_v41 = vld [vmem:[%s11196_s1 + $0x12ec] ss:$16 sps:$4 sm:$0xff]   ;;  %v8235_v24 = vld [vmem:[%s11196_s1 + $0x12e0] ss:$16 sps:$4 sm:$0xff]  }
 0x227   :  { %5272 = vmatpush1.bf16.msra.mxu0 %v8151_v44  ;;  %5805 = vmatpush1.bf16.msra.mxu1 %v8154_v45  ;;  %v8238_v44 = vld [vmem:[%s11196_s1 + $0x12e8] ss:$16 sps:$4 sm:$0xff]   ;;  %v8243_v45 = vld [vmem:[%s11196_s1 + $0x1304] ss:$16 sps:$4 sm:$0xff]  }
 0x228   :  { %5273 = vmatprep.subr.bf16.mxu0 %v8159_v46  ;;  %5806 = vmatprep.subr.bf16.mxu1 %v8162_v48  ;;  %v8246_v46 = vld [vmem:[%s11196_s1 + $0x130c] ss:$16 sps:$4 sm:$0xff]   ;;  %v8241_v48 = vld [vmem:[%s11196_s1 + $0x1300] ss:$16 sps:$4 sm:$0xff]  }
 0x22b   :  { %5274 = vmatpush1.bf16.msra.mxu0 %v8157_v32  ;;  %5807 = vmatpush1.bf16.msra.mxu1 %v8160_v50  ;;  %v8244_v32 = vld [vmem:[%s11196_s1 + $0x1308] ss:$16 sps:$4 sm:$0xff]   ;;  %v8249_v50 = vld [vmem:[%s11196_s1 + $0x1324] ss:$16 sps:$4 sm:$0xff]  }
 0x22c   :  { %5275 = vmatprep.subr.bf16.mxu0 %v8165_v51  ;;  %5808 = vmatprep.subr.bf16.mxu1 %v8168_v52  ;;  %v8252_v51 = vld [vmem:[%s11196_s1 + $0x132c] ss:$16 sps:$4 sm:$0xff]   ;;  %v8247_v52 = vld [vmem:[%s11196_s1 + $0x1320] ss:$16 sps:$4 sm:$0xff]  }
 0x22f   :  { %5276 = vmatpush1.bf16.msra.mxu0 %v8163_v53  ;;  %5809 = vmatpush1.bf16.msra.mxu1 %v8166_v54  ;;  %v8250_v53 = vld [vmem:[%s11196_s1 + $0x1328] ss:$16 sps:$4 sm:$0xff]   ;;  %v8255_v54 = vld [vmem:[%s11196_s1 + $0x1344] ss:$16 sps:$4 sm:$0xff]  }
 0x230   :  { %5277 = vmatprep.subr.bf16.mxu0 %v8171_v42  ;;  %5810 = vmatprep.subr.bf16.mxu1 %v8174_v56  ;;  %v8258_v42 = vld [vmem:[%s11196_s1 + $0x134c] ss:$16 sps:$4 sm:$0xff]   ;;  %v8253_v56 = vld [vmem:[%s11196_s1 + $0x1340] ss:$16 sps:$4 sm:$0xff]  }
 0x233   :  { %5278 = vmatpush1.bf16.msra.mxu0 %v8169_v39  ;;  %5811 = vmatpush1.bf16.msra.mxu1 %v8172_v58  ;;  %v8256_v39 = vld [vmem:[%s11196_s1 + $0x1348] ss:$16 sps:$4 sm:$0xff]   ;;  %v8261_v58 = vld [vmem:[%s11196_s1 + $0x1364] ss:$16 sps:$4 sm:$0xff]  }
 0x234   :  { %5279 = vmatprep.subr.bf16.mxu0 %v8177_v59  ;;  %5812 = vmatprep.subr.bf16.mxu1 %v8180_v60  ;;  %v8264_v59 = vld [vmem:[%s11196_s1 + $0x136c] ss:$16 sps:$4 sm:$0xff]   ;;  %v8259_v60 = vld [vmem:[%s11196_s1 + $0x1360] ss:$16 sps:$4 sm:$0xff]  }
 0x237   :  { %5280 = vmatpush1.bf16.msra.mxu0 %v8175_v61  ;;  %5813 = vmatpush1.bf16.msra.mxu1 %v8178_v63  ;;  %v8262_v61 = vld [vmem:[%s11196_s1 + $0x1368] ss:$16 sps:$4 sm:$0xff]   ;;  %v8267_v63 = vld [vmem:[%s11196_s1 + $0x1384] ss:$16 sps:$4 sm:$0xff]  }
 0x238   :  { %5281 = vmatprep.subr.bf16.mxu0 %v8183_v47  ;;  %5814 = vmatprep.subr.bf16.mxu1 %v8186_v0  ;;  %v8270_v47 = vld [vmem:[%s11196_s1 + $0x138c] ss:$16 sps:$4 sm:$0xff]   ;;  %v8265_v0 = vld [vmem:[%s11196_s1 + $0x1380] ss:$16 sps:$4 sm:$0xff]  }
 0x23b   :  { %5282 = vmatpush1.bf16.msra.mxu0 %v8181_v2  ;;  %5815 = vmatpush1.bf16.msra.mxu1 %v8184_v3  ;;  %v8273_v2 = vld [vmem:[%s11196_s1 + $0x13a4] ss:$16 sps:$4 sm:$0xff]   ;;  %v8276_v3 = vld [vmem:[%s11196_s1 + $0x13ac] ss:$16 sps:$4 sm:$0xff]  }
 0x23c   :  { %5283 = vmatprep.subr.bf16.mxu0 %v8189_v4  ;;  %5816 = vmatprep.subr.bf16.mxu1 %v8192_v57  ;;  %v8271_v4 = vld [vmem:[%s11196_s1 + $0x13a0] ss:$16 sps:$4 sm:$0xff]   ;;  %v8274_v57 = vld [vmem:[%s11196_s1 + $0x13a8] ss:$16 sps:$4 sm:$0xff]  }
 0x23f   :  { %5284 = vmatpush1.bf16.msra.mxu0 %v8187_v6  ;;  %5817 = vmatpush1.bf16.msra.mxu1 %v8190_v55  ;;  %v8279_v6 = vld [vmem:[%s11196_s1 + $0x13c4] ss:$16 sps:$4 sm:$0xff]   ;;  %v8282_v55 = vld [vmem:[%s11196_s1 + $0x13cc] ss:$16 sps:$4 sm:$0xff]  }
 0x240   :  { %5294 = vmatprep.subr.bf16.mxu0 %v8195_v7  ;;  %5827 = vmatprep.subr.bf16.mxu1 %v8198_v8  ;;  %v10603_v7 = vld [vmem:[%s11195_s0 + $0x28] sm:$0xff]  ;;  %v8277_v8 = vld [vmem:[%s11196_s1 + $0x13c0] ss:$16 sps:$4 sm:$0xff]  }
 0x242   :  { %5286 = vmatmul.mubr.bf16.vlgmr.msra.gmra.mrb[0].mxu0 %v186_v11  ;;  %5819 = vmatmul.mubr.bf16.vlgmr.msra.gmra.mrb[0].mxu1 %v186_v11  ;;  %v8285_v11 = vld [vmem:[%s11196_s1 + $0x13e4] ss:$16 sps:$4 sm:$0xff]  }
 0x243   :  { %5295 = vmatpush1.bf16.msra.mxu0 %v8193_v12  ;;  %5828 = vmatpush1.bf16.msra.mxu1 %v8196_v13  ;;  %v8288_v12 = vld [vmem:[%s11196_s1 + $0x13ec] ss:$16 sps:$4 sm:$0xff]   ;;  %v10619_v13 = vrot.slane %v10603_v7, %v8731_v49 }
 0x244   :  { %5296 = vmatprep.subr.bf16.mxu0 %v8201_v14  ;;  %5829 = vmatprep.subr.bf16.mxu1 %v8204_v62  ;;  %v8283_v14 = vld [vmem:[%s11196_s1 + $0x13e0] ss:$16 sps:$4 sm:$0xff]   ;;  %v8286_v62 = vld [vmem:[%s11196_s1 + $0x13e8] ss:$16 sps:$4 sm:$0xff]  }
 0x245   :  { %5326 = vmatprep.mubr.bf16.mxu0 %v189_v15  ;;  %5859 = vmatprep.mubr.bf16.mxu1 %v189_v15  ;;  %v8292_v15 = vld [vmem:[%s11196_s1 + $0x1404] ss:$16 sps:$4 sm:$0xff]  }
 0x247   :  { %5297 = vmatpush1.bf16.msra.mxu0 %v8199_v16  ;;  %5830 = vmatpush1.bf16.msra.mxu1 %v8202_v17  ;;  %v8295_v16 = vld [vmem:[%s11196_s1 + $0x140c] ss:$16 sps:$4 sm:$0xff]   ;;  %v136_v17 = vcombine.high %v10619_v13, %v10619_v13 }
 0x248   :  { %5298 = vmatprep.subr.bf16.mxu0 %v8207_v18  ;;  %5831 = vmatprep.subr.bf16.mxu1 %v8210_v19  ;;  %v188_v18 = vpack.c.bf16 %v10414_v5, %v10414_v5  ;;  %v8290_v19 = vld [vmem:[%s11196_s1 + $0x1400] ss:$16 sps:$4 sm:$0xff]   ;;  %v8301_v5 = vld [vmem:[%s11196_s1 + $0x142c] ss:$16 sps:$4 sm:$0xff]  }
 0x24b   :  { %5299 = vmatpush1.bf16.msra.mxu0 %v8205_v20  ;;  %5832 = vmatpush1.bf16.msra.mxu1 %v8208_v21  ;;  %v8293_v20 = vld [vmem:[%s11196_s1 + $0x1408] ss:$16 sps:$4 sm:$0xff]   ;;  %v8298_v21 = vld [vmem:[%s11196_s1 + $0x1424] ss:$16 sps:$4 sm:$0xff]  }
 0x24c   :  { %5300 = vmatprep.subr.bf16.mxu0 %v8213_v22  ;;  %5833 = vmatprep.subr.bf16.mxu1 %v8216_v23  ;;  %v191_v22 = vpack.c.bf16 %v136_v17, %v136_v17  ;;  %v8296_v23 = vld [vmem:[%s11196_s1 + $0x1420] ss:$16 sps:$4 sm:$0xff]  }
 0x24d   :  { %v8374_v17 = vld [vmem:[%s11196_s1 + $0x15c0] ss:$16 sps:$4 sm:$0xff]  }
 0x24f   :  { %5301 = vmatpush1.bf16.msra.mxu0 %v8211_v9  ;;  %5834 = vmatpush1.bf16.msra.mxu1 %v8214_v26  ;;  %v8299_v9 = vld [vmem:[%s11196_s1 + $0x1428] ss:$16 sps:$4 sm:$0xff]   ;;  %v8304_v26 = vld [vmem:[%s11196_s1 + $0x1444] ss:$16 sps:$4 sm:$0xff]  }
 0x250   :  { %5302 = vmatprep.subr.bf16.mxu0 %v8219_v27  ;;  %5835 = vmatprep.subr.bf16.mxu1 %v8222_v29  ;;  %v8307_v27 = vld [vmem:[%s11196_s1 + $0x144c] ss:$16 sps:$4 sm:$0xff]   ;;  %v8302_v29 = vld [vmem:[%s11196_s1 + $0x1440] ss:$16 sps:$4 sm:$0xff]  }
 0x253   :  { %5303 = vmatpush1.bf16.msra.mxu0 %v8217_v30  ;;  %5836 = vmatpush1.bf16.msra.mxu1 %v8220_v31  ;;  %v8305_v30 = vld [vmem:[%s11196_s1 + $0x1448] ss:$16 sps:$4 sm:$0xff]   ;;  %v8310_v31 = vld [vmem:[%s11196_s1 + $0x1464] ss:$16 sps:$4 sm:$0xff]  }
 0x254   :  { %5304 = vmatprep.subr.bf16.mxu0 %v8225_v33  ;;  %5837 = vmatprep.subr.bf16.mxu1 %v8228_v25  ;;  %v8313_v33 = vld [vmem:[%s11196_s1 + $0x146c] ss:$16 sps:$4 sm:$0xff]   ;;  %v8308_v25 = vld [vmem:[%s11196_s1 + $0x1460] ss:$16 sps:$4 sm:$0xff]  }
 0x257   :  { %5305 = vmatpush1.bf16.msra.mxu0 %v8223_v34  ;;  %5838 = vmatpush1.bf16.msra.mxu1 %v8226_v35  ;;  %v8311_v34 = vld [vmem:[%s11196_s1 + $0x1468] ss:$16 sps:$4 sm:$0xff]   ;;  %v8316_v35 = vld [vmem:[%s11196_s1 + $0x1484] ss:$16 sps:$4 sm:$0xff]  }
 0x258   :  { %5306 = vmatprep.subr.bf16.mxu0 %v8231_v36  ;;  %5839 = vmatprep.subr.bf16.mxu1 %v8234_v37  ;;  %v8319_v36 = vld [vmem:[%s11196_s1 + $0x148c] ss:$16 sps:$4 sm:$0xff]   ;;  %v8314_v37 = vld [vmem:[%s11196_s1 + $0x1480] ss:$16 sps:$4 sm:$0xff]  }
 0x25b   :  { %5307 = vmatpush1.bf16.msra.mxu0 %v8229_v38  ;;  %5840 = vmatpush1.bf16.msra.mxu1 %v8232_v28  ;;  %v8317_v38 = vld [vmem:[%s11196_s1 + $0x1488] ss:$16 sps:$4 sm:$0xff]   ;;  %v8322_v28 = vld [vmem:[%s11196_s1 + $0x14a4] ss:$16 sps:$4 sm:$0xff]  }
 0x25c   :  { %5308 = vmatprep.subr.bf16.mxu0 %v8237_v40  ;;  %5841 = vmatprep.subr.bf16.mxu1 %v8240_v41  ;;  %v8325_v40 = vld [vmem:[%s11196_s1 + $0x14ac] ss:$16 sps:$4 sm:$0xff]   ;;  %v8320_v41 = vld [vmem:[%s11196_s1 + $0x14a0] ss:$16 sps:$4 sm:$0xff]  }
 0x25f   :  { %5309 = vmatpush1.bf16.msra.mxu0 %v8235_v24  ;;  %5842 = vmatpush1.bf16.msra.mxu1 %v8238_v44  ;;  %v8323_v24 = vld [vmem:[%s11196_s1 + $0x14a8] ss:$16 sps:$4 sm:$0xff]   ;;  %v8328_v44 = vld [vmem:[%s11196_s1 + $0x14c4] ss:$16 sps:$4 sm:$0xff]  }
 0x260   :  { %5310 = vmatprep.subr.bf16.mxu0 %v8243_v45  ;;  %5843 = vmatprep.subr.bf16.mxu1 %v8246_v46  ;;  %v8331_v45 = vld [vmem:[%s11196_s1 + $0x14cc] ss:$16 sps:$4 sm:$0xff]   ;;  %v8326_v46 = vld [vmem:[%s11196_s1 + $0x14c0] ss:$16 sps:$4 sm:$0xff]  }
 0x263   :  { %5311 = vmatpush1.bf16.msra.mxu0 %v8241_v48  ;;  %5844 = vmatpush1.bf16.msra.mxu1 %v8244_v32  ;;  %v8329_v48 = vld [vmem:[%s11196_s1 + $0x14c8] ss:$16 sps:$4 sm:$0xff]   ;;  %v8334_v32 = vld [vmem:[%s11196_s1 + $0x14e4] ss:$16 sps:$4 sm:$0xff]  }
 0x264   :  { %5312 = vmatprep.subr.bf16.mxu0 %v8249_v50  ;;  %5845 = vmatprep.subr.bf16.mxu1 %v8252_v51  ;;  %v8337_v50 = vld [vmem:[%s11196_s1 + $0x14ec] ss:$16 sps:$4 sm:$0xff]   ;;  %v8332_v51 = vld [vmem:[%s11196_s1 + $0x14e0] ss:$16 sps:$4 sm:$0xff]  }
 0x267   :  { %5313 = vmatpush1.bf16.msra.mxu0 %v8247_v52  ;;  %5846 = vmatpush1.bf16.msra.mxu1 %v8250_v53  ;;  %v8335_v52 = vld [vmem:[%s11196_s1 + $0x14e8] ss:$16 sps:$4 sm:$0xff]   ;;  %v8340_v53 = vld [vmem:[%s11196_s1 + $0x1504] ss:$16 sps:$4 sm:$0xff]  }
 0x268   :  { %5314 = vmatprep.subr.bf16.mxu0 %v8255_v54  ;;  %5847 = vmatprep.subr.bf16.mxu1 %v8258_v42  ;;  %v8343_v54 = vld [vmem:[%s11196_s1 + $0x150c] ss:$16 sps:$4 sm:$0xff]   ;;  %v8338_v42 = vld [vmem:[%s11196_s1 + $0x1500] ss:$16 sps:$4 sm:$0xff]  }
 0x26b   :  { %5315 = vmatpush1.bf16.msra.mxu0 %v8253_v56  ;;  %5848 = vmatpush1.bf16.msra.mxu1 %v8256_v39  ;;  %v8341_v56 = vld [vmem:[%s11196_s1 + $0x1508] ss:$16 sps:$4 sm:$0xff]   ;;  %v8346_v39 = vld [vmem:[%s11196_s1 + $0x1524] ss:$16 sps:$4 sm:$0xff]  }
 0x26c   :  { %5316 = vmatprep.subr.bf16.mxu0 %v8261_v58  ;;  %5849 = vmatprep.subr.bf16.mxu1 %v8264_v59  ;;  %v8349_v58 = vld [vmem:[%s11196_s1 + $0x152c] ss:$16 sps:$4 sm:$0xff]   ;;  %v8344_v59 = vld [vmem:[%s11196_s1 + $0x1520] ss:$16 sps:$4 sm:$0xff]  }
 0x26f   :  { %5317 = vmatpush1.bf16.msra.mxu0 %v8259_v60  ;;  %5850 = vmatpush1.bf16.msra.mxu1 %v8262_v61  ;;  %v8347_v60 = vld [vmem:[%s11196_s1 + $0x1528] ss:$16 sps:$4 sm:$0xff]   ;;  %v8352_v61 = vld [vmem:[%s11196_s1 + $0x1544] ss:$16 sps:$4 sm:$0xff]  }
 0x270   :  { %5318 = vmatprep.subr.bf16.mxu0 %v8267_v63  ;;  %5851 = vmatprep.subr.bf16.mxu1 %v8270_v47  ;;  %v8355_v63 = vld [vmem:[%s11196_s1 + $0x154c] ss:$16 sps:$4 sm:$0xff]   ;;  %v8350_v47 = vld [vmem:[%s11196_s1 + $0x1540] ss:$16 sps:$4 sm:$0xff]  }
 0x273   :  { %5319 = vmatpush1.bf16.msra.mxu0 %v8265_v0  ;;  %5852 = vmatpush1.bf16.msra.mxu1 %v8268_v1  ;;  %v8353_v0 = vld [vmem:[%s11196_s1 + $0x1548] ss:$16 sps:$4 sm:$0xff]   ;;  %v8358_v1 = vld [vmem:[%s11196_s1 + $0x1564] ss:$16 sps:$4 sm:$0xff]  }
 0x274   :  { %5320 = vmatprep.subr.bf16.mxu0 %v8273_v2  ;;  %5853 = vmatprep.subr.bf16.mxu1 %v8276_v3  ;;  %v8361_v2 = vld [vmem:[%s11196_s1 + $0x156c] ss:$16 sps:$4 sm:$0xff]   ;;  %v8356_v3 = vld [vmem:[%s11196_s1 + $0x1560] ss:$16 sps:$4 sm:$0xff]  }
 0x277   :  { %5321 = vmatpush1.bf16.msra.mxu0 %v8271_v4  ;;  %5854 = vmatpush1.bf16.msra.mxu1 %v8274_v57  ;;  %v8359_v4 = vld [vmem:[%s11196_s1 + $0x1568] ss:$16 sps:$4 sm:$0xff]   ;;  %v8364_v57 = vld [vmem:[%s11196_s1 + $0x1584] ss:$16 sps:$4 sm:$0xff]  }
 0x278   :  { %5322 = vmatprep.subr.bf16.mxu0 %v8279_v6  ;;  %5855 = vmatprep.subr.bf16.mxu1 %v8282_v55  ;;  %v8367_v6 = vld [vmem:[%s11196_s1 + $0x158c] ss:$16 sps:$4 sm:$0xff]   ;;  %v8362_v55 = vld [vmem:[%s11196_s1 + $0x1580] ss:$16 sps:$4 sm:$0xff]  }
 0x27b   :  { %5323 = vmatpush1.bf16.msra.mxu0 %v8277_v8  ;;  %5856 = vmatpush1.bf16.msra.mxu1 %v8280_v10  ;;  %v8365_v8 = vld [vmem:[%s11196_s1 + $0x1588] ss:$16 sps:$4 sm:$0xff]   ;;  %v8370_v10 = vld [vmem:[%s11196_s1 + $0x15a4] ss:$16 sps:$4 sm:$0xff]  }
 0x27c   :  { %5324 = vmatprep.subr.bf16.mxu0 %v8285_v11  ;;  %5857 = vmatprep.subr.bf16.mxu1 %v8288_v12  ;;  %v8373_v11 = vld [vmem:[%s11196_s1 + $0x15ac] ss:$16 sps:$4 sm:$0xff]   ;;  %v8368_v12 = vld [vmem:[%s11196_s1 + $0x15a0] ss:$16 sps:$4 sm:$0xff]  }
 0x27f   :  { %5325 = vmatpush1.bf16.msra.mxu0 %v8283_v14  ;;  %5858 = vmatpush1.bf16.msra.mxu1 %v8286_v62  ;;  %v8371_v14 = vld [vmem:[%s11196_s1 + $0x15a8] ss:$16 sps:$4 sm:$0xff]   ;;  %v8376_v62 = vld [vmem:[%s11196_s1 + $0x15c4] ss:$16 sps:$4 sm:$0xff]  }
 0x280   :  { %5335 = vmatprep.subr.bf16.mxu0 %v8292_v15  ;;  %5868 = vmatprep.subr.bf16.mxu1 %v8295_v16  ;;  %v8379_v15 = vld [vmem:[%s11196_s1 + $0x15cc] ss:$16 sps:$4 sm:$0xff]   ;;  %v121_v16 = vcombine.high %v10603_v7, %v10603_v7 }
 0x281   :  { %v8385_v7 = vld [vmem:[%s11196_s1 + $0x15ec] ss:$16 sps:$4 sm:$0xff]  }
 0x282   :  { %5327 = vmatmul.mubr.bf16.vlgmr.msra.gmra.mrb[0].mxu0 %v188_v18  ;;  %5860 = vmatmul.mubr.bf16.vlgmr.msra.gmra.mrb[0].mxu1 %v188_v18  ;;  %v8377_v18 = vld [vmem:[%s11196_s1 + $0x15c8] ss:$16 sps:$4 sm:$0xff]  }
 0x283   :  { %5336 = vmatpush1.bf16.msra.mxu0 %v8290_v19  ;;  %5869 = vmatpush1.bf16.msra.mxu1 %v8293_v20  ;;  %v8382_v19 = vld [vmem:[%s11196_s1 + $0x15e4] ss:$16 sps:$4 sm:$0xff]   ;;  %v10820_v20 = vrot.slane %v121_v16, %v8731_v49  ;;  %v8391_v49 = vld [vmem:[%s11196_s1 + $0x160c] ss:$16 sps:$4 sm:$0xff]  }
 0x284   :  { %5337 = vmatprep.subr.bf16.mxu0 %v8298_v21  ;;  %5870 = vmatprep.subr.bf16.mxu1 %v8301_v5  ;;  %v8380_v21 = vld [vmem:[%s11196_s1 + $0x15e0] ss:$16 sps:$4 sm:$0xff]   ;;  %v8383_v5 = vld [vmem:[%s11196_s1 + $0x15e8] ss:$16 sps:$4 sm:$0xff]   ;;  %v8466_v16 = vld [vmem:[%s11196_s1 + $0x17a4] ss:$16 sps:$4 sm:$0xff]  }
 0x285   :  { %5367 = vmatprep.mubr.bf16.mxu0 %v191_v22  ;;  %5900 = vmatprep.mubr.bf16.mxu1 %v191_v22  ;;  %v8388_v22 = vld [vmem:[%s11196_s1 + $0x1604] ss:$16 sps:$4 sm:$0xff]  }
 0x287   :  { %5338 = vmatpush1.bf16.msra.mxu0 %v8296_v23  ;;  %5871 = vmatpush1.bf16.msra.mxu1 %v8299_v9  ;;  %v137_v23 = vcombine.high %v10820_v20, %v10820_v20  ;;  %v190_v9 = vpack.c.bf16 %v10619_v13, %v10619_v13  ;;  %v8397_v13 = vld [vmem:[%s11196_s1 + $0x162c] ss:$16 sps:$4 sm:$0xff]  }
 0x288   :  { %5339 = vmatprep.subr.bf16.mxu0 %v8304_v26  ;;  %5872 = vmatprep.subr.bf16.mxu1 %v8307_v27  ;;  %v8386_v26 = vld [vmem:[%s11196_s1 + $0x1600] ss:$16 sps:$4 sm:$0xff]   ;;  %v8389_v27 = vld [vmem:[%s11196_s1 + $0x1608] ss:$16 sps:$4 sm:$0xff]  }
 0x28b   :  { %5340 = vmatpush1.bf16.msra.mxu0 %v8302_v29  ;;  %5873 = vmatpush1.bf16.msra.mxu1 %v8305_v30  ;;  %v8394_v29 = vld [vmem:[%s11196_s1 + $0x1624] ss:$16 sps:$4 sm:$0xff]   ;;  %v193_v30 = vpack.c.bf16 %v137_v23, %v137_v23  ;;  %v8481_v23 = vld [vmem:[%s11196_s1 + $0x17ec] ss:$16 sps:$4 sm:$0xff]  }
 0x28c   :  { %5341 = vmatprep.subr.bf16.mxu0 %v8310_v31  ;;  %5874 = vmatprep.subr.bf16.mxu1 %v8313_v33  ;;  %v8392_v31 = vld [vmem:[%s11196_s1 + $0x1620] ss:$16 sps:$4 sm:$0xff]   ;;  %v8395_v33 = vld [vmem:[%s11196_s1 + $0x1628] ss:$16 sps:$4 sm:$0xff]  }
 0x28f   :  { %5342 = vmatpush1.bf16.msra.mxu0 %v8308_v25  ;;  %5875 = vmatpush1.bf16.msra.mxu1 %v8311_v34  ;;  %v8400_v25 = vld [vmem:[%s11196_s1 + $0x1644] ss:$16 sps:$4 sm:$0xff]   ;;  %v8403_v34 = vld [vmem:[%s11196_s1 + $0x164c] ss:$16 sps:$4 sm:$0xff]  }
 0x290   :  { %5343 = vmatprep.subr.bf16.mxu0 %v8316_v35  ;;  %5876 = vmatprep.subr.bf16.mxu1 %v8319_v36  ;;  %v8398_v35 = vld [vmem:[%s11196_s1 + $0x1640] ss:$16 sps:$4 sm:$0xff]   ;;  %v8401_v36 = vld [vmem:[%s11196_s1 + $0x1648] ss:$16 sps:$4 sm:$0xff]  }
 0x293   :  { %5344 = vmatpush1.bf16.msra.mxu0 %v8314_v37  ;;  %5877 = vmatpush1.bf16.msra.mxu1 %v8317_v38  ;;  %v8406_v37 = vld [vmem:[%s11196_s1 + $0x1664] ss:$16 sps:$4 sm:$0xff]   ;;  %v8409_v38 = vld [vmem:[%s11196_s1 + $0x166c] ss:$16 sps:$4 sm:$0xff]  }
 0x294   :  { %5345 = vmatprep.subr.bf16.mxu0 %v8322_v28  ;;  %5878 = vmatprep.subr.bf16.mxu1 %v8325_v40  ;;  %v8404_v28 = vld [vmem:[%s11196_s1 + $0x1660] ss:$16 sps:$4 sm:$0xff]   ;;  %v8407_v40 = vld [vmem:[%s11196_s1 + $0x1668] ss:$16 sps:$4 sm:$0xff]  }
 0x297   :  { %5346 = vmatpush1.bf16.msra.mxu0 %v8320_v41  ;;  %5879 = vmatpush1.bf16.msra.mxu1 %v8323_v24  ;;  %v8412_v41 = vld [vmem:[%s11196_s1 + $0x1684] ss:$16 sps:$4 sm:$0xff]   ;;  %v8415_v24 = vld [vmem:[%s11196_s1 + $0x168c] ss:$16 sps:$4 sm:$0xff]  }
 0x298   :  { %5347 = vmatprep.subr.bf16.mxu0 %v8328_v44  ;;  %5880 = vmatprep.subr.bf16.mxu1 %v8331_v45  ;;  %v8410_v44 = vld [vmem:[%s11196_s1 + $0x1680] ss:$16 sps:$4 sm:$0xff]   ;;  %v8413_v45 = vld [vmem:[%s11196_s1 + $0x1688] ss:$16 sps:$4 sm:$0xff]  }
 0x29b   :  { %5348 = vmatpush1.bf16.msra.mxu0 %v8326_v46  ;;  %5881 = vmatpush1.bf16.msra.mxu1 %v8329_v48  ;;  %v8418_v46 = vld [vmem:[%s11196_s1 + $0x16a4] ss:$16 sps:$4 sm:$0xff]   ;;  %v8421_v48 = vld [vmem:[%s11196_s1 + $0x16ac] ss:$16 sps:$4 sm:$0xff]  }
 0x29c   :  { %5349 = vmatprep.subr.bf16.mxu0 %v8334_v32  ;;  %5882 = vmatprep.subr.bf16.mxu1 %v8337_v50  ;;  %v8416_v32 = vld [vmem:[%s11196_s1 + $0x16a0] ss:$16 sps:$4 sm:$0xff]   ;;  %v8419_v50 = vld [vmem:[%s11196_s1 + $0x16a8] ss:$16 sps:$4 sm:$0xff]  }
 0x29f   :  { %5350 = vmatpush1.bf16.msra.mxu0 %v8332_v51  ;;  %5883 = vmatpush1.bf16.msra.mxu1 %v8335_v52  ;;  %v8424_v51 = vld [vmem:[%s11196_s1 + $0x16c4] ss:$16 sps:$4 sm:$0xff]   ;;  %v8427_v52 = vld [vmem:[%s11196_s1 + $0x16cc] ss:$16 sps:$4 sm:$0xff]  }
 0x2a0   :  { %5351 = vmatprep.subr.bf16.mxu0 %v8340_v53  ;;  %5884 = vmatprep.subr.bf16.mxu1 %v8343_v54  ;;  %v8422_v53 = vld [vmem:[%s11196_s1 + $0x16c0] ss:$16 sps:$4 sm:$0xff]   ;;  %v8425_v54 = vld [vmem:[%s11196_s1 + $0x16c8] ss:$16 sps:$4 sm:$0xff]  }
 0x2a3   :  { %5352 = vmatpush1.bf16.msra.mxu0 %v8338_v42  ;;  %5885 = vmatpush1.bf16.msra.mxu1 %v8341_v56  ;;  %v8430_v42 = vld [vmem:[%s11196_s1 + $0x16e4] ss:$16 sps:$4 sm:$0xff]   ;;  %v8433_v56 = vld [vmem:[%s11196_s1 + $0x16ec] ss:$16 sps:$4 sm:$0xff]  }
 0x2a4   :  { %5353 = vmatprep.subr.bf16.mxu0 %v8346_v39  ;;  %5886 = vmatprep.subr.bf16.mxu1 %v8349_v58  ;;  %v8428_v39 = vld [vmem:[%s11196_s1 + $0x16e0] ss:$16 sps:$4 sm:$0xff]   ;;  %v8431_v58 = vld [vmem:[%s11196_s1 + $0x16e8] ss:$16 sps:$4 sm:$0xff]  }
 0x2a7   :  { %5354 = vmatpush1.bf16.msra.mxu0 %v8344_v59  ;;  %5887 = vmatpush1.bf16.msra.mxu1 %v8347_v60  ;;  %v8436_v59 = vld [vmem:[%s11196_s1 + $0x1704] ss:$16 sps:$4 sm:$0xff]   ;;  %v8439_v60 = vld [vmem:[%s11196_s1 + $0x170c] ss:$16 sps:$4 sm:$0xff]  }
 0x2a8   :  { %5355 = vmatprep.subr.bf16.mxu0 %v8352_v61  ;;  %5888 = vmatprep.subr.bf16.mxu1 %v8355_v63  ;;  %v8434_v61 = vld [vmem:[%s11196_s1 + $0x1700] ss:$16 sps:$4 sm:$0xff]   ;;  %v8437_v63 = vld [vmem:[%s11196_s1 + $0x1708] ss:$16 sps:$4 sm:$0xff]  }
 0x2ab   :  { %5356 = vmatpush1.bf16.msra.mxu0 %v8350_v47  ;;  %5889 = vmatpush1.bf16.msra.mxu1 %v8353_v0  ;;  %v8442_v47 = vld [vmem:[%s11196_s1 + $0x1724] ss:$16 sps:$4 sm:$0xff]   ;;  %v8445_v0 = vld [vmem:[%s11196_s1 + $0x172c] ss:$16 sps:$4 sm:$0xff]  }
 0x2ac   :  { %5357 = vmatprep.subr.bf16.mxu0 %v8358_v1  ;;  %5890 = vmatprep.subr.bf16.mxu1 %v8361_v2  ;;  %v8440_v1 = vld [vmem:[%s11196_s1 + $0x1720] ss:$16 sps:$4 sm:$0xff]   ;;  %v8443_v2 = vld [vmem:[%s11196_s1 + $0x1728] ss:$16 sps:$4 sm:$0xff]  }
 0x2af   :  { %5358 = vmatpush1.bf16.msra.mxu0 %v8356_v3  ;;  %5891 = vmatpush1.bf16.msra.mxu1 %v8359_v4  ;;  %v8448_v3 = vld [vmem:[%s11196_s1 + $0x1744] ss:$16 sps:$4 sm:$0xff]   ;;  %v8451_v4 = vld [vmem:[%s11196_s1 + $0x174c] ss:$16 sps:$4 sm:$0xff]  }
 0x2b0   :  { %5359 = vmatprep.subr.bf16.mxu0 %v8364_v57  ;;  %5892 = vmatprep.subr.bf16.mxu1 %v8367_v6  ;;  %v8446_v57 = vld [vmem:[%s11196_s1 + $0x1740] ss:$16 sps:$4 sm:$0xff]   ;;  %v8449_v6 = vld [vmem:[%s11196_s1 + $0x1748] ss:$16 sps:$4 sm:$0xff]  }
 0x2b3   :  { %5360 = vmatpush1.bf16.msra.mxu0 %v8362_v55  ;;  %5893 = vmatpush1.bf16.msra.mxu1 %v8365_v8  ;;  %v8454_v55 = vld [vmem:[%s11196_s1 + $0x1764] ss:$16 sps:$4 sm:$0xff]   ;;  %v8457_v8 = vld [vmem:[%s11196_s1 + $0x176c] ss:$16 sps:$4 sm:$0xff]  }
 0x2b4   :  { %5361 = vmatprep.subr.bf16.mxu0 %v8370_v10  ;;  %5894 = vmatprep.subr.bf16.mxu1 %v8373_v11  ;;  %v8452_v10 = vld [vmem:[%s11196_s1 + $0x1760] ss:$16 sps:$4 sm:$0xff]   ;;  %v8455_v11 = vld [vmem:[%s11196_s1 + $0x1768] ss:$16 sps:$4 sm:$0xff]  }
 0x2b7   :  { %5362 = vmatpush1.bf16.msra.mxu0 %v8368_v12  ;;  %5895 = vmatpush1.bf16.msra.mxu1 %v8371_v14  ;;  %v8460_v12 = vld [vmem:[%s11196_s1 + $0x1784] ss:$16 sps:$4 sm:$0xff]   ;;  %v8463_v14 = vld [vmem:[%s11196_s1 + $0x178c] ss:$16 sps:$4 sm:$0xff]  }
 0x2b8   :  { %5363 = vmatprep.subr.bf16.mxu0 %v8376_v62  ;;  %5896 = vmatprep.subr.bf16.mxu1 %v8379_v15  ;;  %v8458_v62 = vld [vmem:[%s11196_s1 + $0x1780] ss:$16 sps:$4 sm:$0xff]   ;;  %v8461_v15 = vld [vmem:[%s11196_s1 + $0x1788] ss:$16 sps:$4 sm:$0xff]  }
 0x2bb   :  { %5364 = vmatpush1.bf16.msra.mxu0 %v8374_v17  ;;  %5897 = vmatpush1.bf16.msra.mxu1 %v8377_v18  ;;  %v8469_v17 = vld [vmem:[%s11196_s1 + $0x17ac] ss:$16 sps:$4 sm:$0xff]   ;;  %v8464_v18 = vld [vmem:[%s11196_s1 + $0x17a0] ss:$16 sps:$4 sm:$0xff]  }
 0x2bc   :  { %5365 = vmatprep.subr.bf16.mxu0 %v8382_v19  ;;  %5898 = vmatprep.subr.bf16.mxu1 %v8385_v7  ;;  %v8467_v19 = vld [vmem:[%s11196_s1 + $0x17a8] ss:$16 sps:$4 sm:$0xff]   ;;  %v8472_v7 = vld [vmem:[%s11196_s1 + $0x17c4] ss:$16 sps:$4 sm:$0xff]  }
 0x2bf   :  { %5366 = vmatpush1.bf16.msra.mxu0 %v8380_v21  ;;  %5899 = vmatpush1.bf16.msra.mxu1 %v8383_v5  ;;  %v8475_v21 = vld [vmem:[%s11196_s1 + $0x17cc] ss:$16 sps:$4 sm:$0xff]   ;;  %v8470_v5 = vld [vmem:[%s11196_s1 + $0x17c0] ss:$16 sps:$4 sm:$0xff]  }
 0x2c0   :  { %5376 = vmatprep.subr.bf16.mxu0 %v8388_v22  ;;  %5909 = vmatprep.subr.bf16.mxu1 %v8391_v49  ;;  %v8473_v22 = vld [vmem:[%s11196_s1 + $0x17c8] ss:$16 sps:$4 sm:$0xff]   ;;  %v8478_v49 = vld [vmem:[%s11196_s1 + $0x17e4] ss:$16 sps:$4 sm:$0xff]  }
 0x2c2   :  { %5368 = vmatmul.mubr.bf16.vlgmr.msra.gmra.mrb[0].mxu0 %v190_v9  ;;  %5901 = vmatmul.mubr.bf16.vlgmr.msra.gmra.mrb[0].mxu1 %v190_v9  ;;  %v8476_v9 = vld [vmem:[%s11196_s1 + $0x17e0] ss:$16 sps:$4 sm:$0xff]  }
 0x2c3   :  { %5377 = vmatpush1.bf16.msra.mxu0 %v8386_v26  ;;  %5910 = vmatpush1.bf16.msra.mxu1 %v8389_v27  ;;  %v8479_v26 = vld [vmem:[%s11196_s1 + $0x17e8] ss:$16 sps:$4 sm:$0xff]   ;;  %v8485_v27 = vld [vmem:[%s11196_s1 + $0x1804] ss:$16 sps:$4 sm:$0xff]  }
 0x2c4   :  { %5378 = vmatprep.subr.bf16.mxu0 %v8394_v29  ;;  %5911 = vmatprep.subr.bf16.mxu1 %v8397_v13  ;;  %v8488_v29 = vld [vmem:[%s11196_s1 + $0x180c] ss:$16 sps:$4 sm:$0xff]   ;;  %v192_v13 = vpack.c.bf16 %v10820_v20, %v10820_v20 }
 0x2c5   :  { %5408 = vmatprep.mubr.bf16.mxu0 %v193_v30  ;;  %5941 = vmatprep.mubr.bf16.mxu1 %v193_v30  ;;  %v8483_v30 = vld [vmem:[%s11196_s1 + $0x1800] ss:$16 sps:$4 sm:$0xff]   ;;  %v8494_v20 = vld [vmem:[%s11196_s1 + $0x182c] ss:$16 sps:$4 sm:$0xff]  }
 0x2c7   :  { %5379 = vmatpush1.bf16.msra.mxu0 %v8392_v31  ;;  %5912 = vmatpush1.bf16.msra.mxu1 %v8395_v33  ;;  %v8486_v31 = vld [vmem:[%s11196_s1 + $0x1808] ss:$16 sps:$4 sm:$0xff]   ;;  %v8491_v33 = vld [vmem:[%s11196_s1 + $0x1824] ss:$16 sps:$4 sm:$0xff]  }
 0x2c8   :  { %5380 = vmatprep.subr.bf16.mxu0 %v8400_v25  ;;  %5913 = vmatprep.subr.bf16.mxu1 %v8403_v34  ;;  %v8489_v25 = vld [vmem:[%s11196_s1 + $0x1820] ss:$16 sps:$4 sm:$0xff]   ;;  %v8492_v34 = vld [vmem:[%s11196_s1 + $0x1828] ss:$16 sps:$4 sm:$0xff]  }
 0x2cb   :  { %5381 = vmatpush1.bf16.msra.mxu0 %v8398_v35  ;;  %5914 = vmatpush1.bf16.msra.mxu1 %v8401_v36  ;;  %v8497_v35 = vld [vmem:[%s11196_s1 + $0x1844] ss:$16 sps:$4 sm:$0xff]   ;;  %v8500_v36 = vld [vmem:[%s11196_s1 + $0x184c] ss:$16 sps:$4 sm:$0xff]  }
 0x2cc   :  { %5382 = vmatprep.subr.bf16.mxu0 %v8406_v37  ;;  %5915 = vmatprep.subr.bf16.mxu1 %v8409_v38  ;;  %v8564_v37 = vmov 0   ;;  %v8495_v38 = vld [vmem:[%s11196_s1 + $0x1840] ss:$16 sps:$4 sm:$0xff]  }
 0x2cf   :  { %5383 = vmatpush1.bf16.msra.mxu0 %v8404_v28  ;;  %5916 = vmatpush1.bf16.msra.mxu1 %v8407_v40  ;;  %v8498_v28 = vld [vmem:[%s11196_s1 + $0x1848] ss:$16 sps:$4 sm:$0xff]   ;;  %v8503_v40 = vld [vmem:[%s11196_s1 + $0x1864] ss:$16 sps:$4 sm:$0xff]  }
 0x2d0   :  { %5384 = vmatprep.subr.bf16.mxu0 %v8412_v41  ;;  %5917 = vmatprep.subr.bf16.mxu1 %v8415_v24  ;;  %v8506_v41 = vld [vmem:[%s11196_s1 + $0x186c] ss:$16 sps:$4 sm:$0xff]   ;;  %v8501_v24 = vld [vmem:[%s11196_s1 + $0x1860] ss:$16 sps:$4 sm:$0xff]  }
 0x2d3   :  { %5385 = vmatpush1.bf16.msra.mxu0 %v8410_v44  ;;  %5918 = vmatpush1.bf16.msra.mxu1 %v8413_v45  ;;  %v8504_v44 = vld [vmem:[%s11196_s1 + $0x1868] ss:$16 sps:$4 sm:$0xff]   ;;  %v6358_v45 = vld.sshfl [vmem:[%s11195_s0 + $0x30] sm:$0x3 pattern:$0x76325410] }
 0x2d4   :  { %5386 = vmatprep.subr.bf16.mxu0 %v8418_v46  ;;  %5919 = vmatprep.subr.bf16.mxu1 %v8421_v48  ;;  %v8507_v46 = vld [vmem:[%s11198_s3 + $0x40] sm:$0xff]  }
 0x2d5   :  { %v8508_v48 = vld [vmem:[%s11198_s3 + $0xc0] sm:$0xff]  }
 0x2d7   :  { %5387 = vmatpush1.bf16.msra.mxu0 %v8416_v32  ;;  %5920 = vmatpush1.bf16.msra.mxu1 %v8419_v50  ;;  %v194_v32 = vpack.c.bf16 %v6358_v45, %v6358_v45  ;;  %v8509_v50 = vld [vmem:[%s11198_s3] sm:$0xff]  }
 0x2d8   :  { %5388 = vmatprep.subr.bf16.mxu0 %v8424_v51  ;;  %5921 = vmatprep.subr.bf16.mxu1 %v8427_v52  ;;  %v8510_v51 = vld [vmem:[%s11198_s3 + $0x80] sm:$0xff]   ;;  %v8511_v52 = vld [vmem:[%s11198_s3 + $0x48] sm:$0xff]  }
 0x2db   :  { %5389 = vmatpush1.bf16.msra.mxu0 %v8422_v53  ;;  %5922 = vmatpush1.bf16.msra.mxu1 %v8425_v54  ;;  %v8512_v53 = vld [vmem:[%s11198_s3 + $0xc8] sm:$0xff]  }
 0x2dc   :  { %5390 = vmatprep.subr.bf16.mxu0 %v8430_v42  ;;  %5923 = vmatprep.subr.bf16.mxu1 %v8433_v56  ;;  %v8513_v54 = vld [vmem:[%s11198_s3 + $0x8] sm:$0xff]   ;;  %v8515_v56 = vld [vmem:[%s11198_s3 + $0x50] sm:$0xff]  }
 0x2dd   :  { %v8514_v42 = vld [vmem:[%s11198_s3 + $0x88] sm:$0xff]  }
 0x2df   :  { %5391 = vmatpush1.bf16.msra.mxu0 %v8428_v39  ;;  %5924 = vmatpush1.bf16.msra.mxu1 %v8431_v58  ;;  %v8516_v39 = vld [vmem:[%s11198_s3 + $0xd0] sm:$0xff]  }
 0x2e0   :  { %5392 = vmatprep.subr.bf16.mxu0 %v8436_v59  ;;  %5925 = vmatprep.subr.bf16.mxu1 %v8439_v60  ;;  %v8517_v58 = vld [vmem:[%s11198_s3 + $0x10] sm:$0xff]   ;;  %v8519_v60 = vld [vmem:[%s11198_s3 + $0x58] sm:$0xff]  }
 0x2e1   :  { %v8518_v59 = vld [vmem:[%s11198_s3 + $0x90] sm:$0xff]  }
 0x2e3   :  { %5393 = vmatpush1.bf16.msra.mxu0 %v8434_v61  ;;  %5926 = vmatpush1.bf16.msra.mxu1 %v8437_v63  ;;  %v8520_v61 = vld [vmem:[%s11198_s3 + $0xd8] sm:$0xff]  }
 0x2e4   :  { %5394 = vmatprep.subr.bf16.mxu0 %v8442_v47  ;;  %5927 = vmatprep.subr.bf16.mxu1 %v8445_v0  ;;  %v8521_v63 = vld [vmem:[%s11198_s3 + $0x18] sm:$0xff]   ;;  %v8523_v0 = vld [vmem:[%s11198_s3 + $0x60] sm:$0xff]  }
 0x2e5   :  { %v8522_v47 = vld [vmem:[%s11198_s3 + $0x98] sm:$0xff]  }
 0x2e7   :  { %5395 = vmatpush1.bf16.msra.mxu0 %v8440_v1  ;;  %5928 = vmatpush1.bf16.msra.mxu1 %v8443_v2  ;;  %v8524_v1 = vld [vmem:[%s11198_s3 + $0xe0] sm:$0xff]  }
 0x2e8   :  { %5396 = vmatprep.subr.bf16.mxu0 %v8448_v3  ;;  %5929 = vmatprep.subr.bf16.mxu1 %v8451_v4  ;;  %v8525_v2 = vld [vmem:[%s11198_s3 + $0x20] sm:$0xff]   ;;  %v8527_v4 = vld [vmem:[%s11198_s3 + $0x68] sm:$0xff]  }
 0x2e9   :  { %v8526_v3 = vld [vmem:[%s11198_s3 + $0xa0] sm:$0xff]  }
 0x2eb   :  { %5397 = vmatpush1.bf16.msra.mxu0 %v8446_v57  ;;  %5930 = vmatpush1.bf16.msra.mxu1 %v8449_v6  ;;  %v8528_v57 = vld [vmem:[%s11198_s3 + $0xe8] sm:$0xff]  }
 0x2ec   :  { %5398 = vmatprep.subr.bf16.mxu0 %v8454_v55  ;;  %5931 = vmatprep.subr.bf16.mxu1 %v8457_v8  ;;  %v8529_v6 = vld [vmem:[%s11198_s3 + $0x28] sm:$0xff]   ;;  %v8531_v8 = vld [vmem:[%s11198_s3 + $0x70] sm:$0xff]  }
 0x2ed   :  { %v8530_v55 = vld [vmem:[%s11198_s3 + $0xa8] sm:$0xff]  }
 0x2ef   :  { %5399 = vmatpush1.bf16.msra.mxu0 %v8452_v10  ;;  %5932 = vmatpush1.bf16.msra.mxu1 %v8455_v11  ;;  %v8532_v10 = vld [vmem:[%s11198_s3 + $0xf0] sm:$0xff]  }
 0x2f0   :  { %5400 = vmatprep.subr.bf16.mxu0 %v8460_v12  ;;  %5933 = vmatprep.subr.bf16.mxu1 %v8463_v14  ;;  %v8533_v11 = vld [vmem:[%s11198_s3 + $0x30] sm:$0xff]   ;;  %v8535_v14 = vld [vmem:[%s11198_s3 + $0x78] sm:$0xff]  }
 0x2f1   :  { %v8534_v12 = vld [vmem:[%s11198_s3 + $0xb0] sm:$0xff]  }
 0x2f3   :  { %5401 = vmatpush1.bf16.msra.mxu0 %v8458_v62  ;;  %5934 = vmatpush1.bf16.msra.mxu1 %v8461_v15  ;;  %v8536_v62 = vld [vmem:[%s11198_s3 + $0xf8] sm:$0xff]  }
 0x2f4   :  { %5402 = vmatprep.subr.bf16.mxu0 %v8466_v16  ;;  %5935 = vmatprep.subr.bf16.mxu1 %v8469_v17  ;;  %v8537_v15 = vld [vmem:[%s11198_s3 + $0x38] sm:$0xff]   ;;  %v983_v17 = vsub.s32 0, %v8713_v43 }
 0x2f5   :  { %v8538_v16 = vld [vmem:[%s11198_s3 + $0xb8] sm:$0xff]  }
 0x2f7   :  { %5403 = vmatpush1.bf16.msra.mxu0 %v8464_v18  ;;  %5936 = vmatpush1.bf16.msra.mxu1 %v8467_v19  ;;  %v991_v18 = vsub.s32 2, %v8713_v43  ;;  %v979_v19 = vld [vmem:[%s11197_s2] sm:$0xf] }
 0x2f8   :  { %5404 = vmatprep.subr.bf16.mxu0 %v8472_v7  ;;  %5937 = vmatprep.subr.bf16.mxu1 %v8475_v21  ;;  %v987_v7 = vsub.s32 1, %v8713_v43  ;;  %v995_v21 = vsub.s32 3, %v8713_v43 }
 0x2fb   :  { %5405 = vmatpush1.bf16.msra.mxu0 %v8470_v5  ;;  %5938 = vmatpush1.bf16.msra.mxu1 %v8473_v22  ;;  %v984_v5 = vrot.slane %v979_v19, %v983_v17  ;;  %v992_v22 = vrot.slane %v979_v19, %v991_v18 }
 0x2fc   :  { %5406 = vmatprep.subr.bf16.mxu0 %v8478_v49  ;;  %5939 = vmatprep.subr.bf16.mxu1 %v8481_v23  ;;  %v988_v49 = vrot.slane %v979_v19, %v987_v7  ;;  %v996_v23 = vrot.slane %v979_v19, %v995_v21 }
 0x2ff   :  { %5407 = vmatpush1.bf16.msra.mxu0 %v8476_v9  ;;  %5940 = vmatpush1.bf16.msra.mxu1 %v8479_v26 }
 0x300   :  { %5417 = vmatprep.subr.bf16.mxu0 %v8485_v27  ;;  %5950 = vmatprep.subr.bf16.mxu1 %v8488_v29 }
 0x302   :  { %5409 = vmatmul.mubr.bf16.vlgmr.msra.gmra.mrb[0].mxu0 %v192_v13  ;;  %5942 = vmatmul.mubr.bf16.vlgmr.msra.gmra.mrb[0].mxu1 %v192_v13 }
 0x303   :  { %5418 = vmatpush1.bf16.msra.mxu0 %v8483_v30  ;;  %5951 = vmatpush1.bf16.msra.mxu1 %v8486_v31 }
 0x304   :  { %5419 = vmatprep.subr.bf16.mxu0 %v8491_v33  ;;  %5952 = vmatprep.subr.bf16.mxu1 %v8494_v20 }
 0x305   :  { %5449 = vmatprep.mubr.bf16.mxu0 %v8564_v37  ;;  %5982 = vmatprep.mubr.bf16.mxu1 %v8564_v37 }
 0x307   :  { %5420 = vmatpush1.bf16.msra.mxu0 %v8489_v25  ;;  %5953 = vmatpush1.bf16.msra.mxu1 %v8492_v34 }
 0x308   :  { %5421 = vmatprep.subr.bf16.mxu0 %v8497_v35  ;;  %5954 = vmatprep.subr.bf16.mxu1 %v8500_v36 }
 0x30b   :  { %5422 = vmatpush1.bf16.msra.mxu0 %v8495_v38  ;;  %5955 = vmatpush1.bf16.msra.mxu1 %v8498_v28 }
 0x30c   :  { %5423 = vmatprep.subr.bf16.mxu0 %v8503_v40  ;;  %5956 = vmatprep.subr.bf16.mxu1 %v8506_v41 }
 0x30f   :  { %5424 = vmatpush1.bf16.msra.mxu0 %v8501_v24  ;;  %5957 = vmatpush1.bf16.msra.mxu1 %v8504_v44 }
 0x310   :  { %7178 = vmatprep.subr.bf16.mxu0 %v8507_v46  ;;  %7200 = vmatprep.subr.bf16.mxu1 %v8508_v48  ;;  %v7145_v46 = vld [vmem:[%s11199_s4] ss:$0 sm:$0xff] }
 0x312   :  { %7143 = vmatmul.mubr.msk.bf16.vlgmr.msra.gmra.mrb[0].mxu0 %vm4921_vm0, %v194_v32  ;;  %7144 = vmatmul.mubr.msk.bf16.vlgmr.msra.gmra.mrb[0].mxu1 %vm4921_vm0, %v194_v32 }
 0x313   :  { %7179 = vmatpush3.bf16.msra.mxu0 %v8509_v50  ;;  %7201 = vmatpush3.bf16.msra.mxu1 %v8510_v51 }
 0x314   :  { %7180 = vmatprep.subr.bf16.mxu0 %v8511_v52  ;;  %7202 = vmatprep.subr.bf16.mxu1 %v8512_v53 }
 0x317   :  { %7181 = vmatpush3.bf16.msra.mxu0 %v8513_v54  ;;  %7203 = vmatpush3.bf16.msra.mxu1 %v8514_v42 }
 0x318   :  { %7182 = vmatprep.subr.bf16.mxu0 %v8515_v56  ;;  %7204 = vmatprep.subr.bf16.mxu1 %v8516_v39 }
 0x31b   :  { %7183 = vmatpush3.bf16.msra.mxu0 %v8517_v58  ;;  %7205 = vmatpush3.bf16.msra.mxu1 %v8518_v59 }
 0x31c   :  { %7184 = vmatprep.subr.bf16.mxu0 %v8519_v60  ;;  %7206 = vmatprep.subr.bf16.mxu1 %v8520_v61 }
 0x31f   :  { %7185 = vmatpush3.bf16.msra.mxu0 %v8521_v63  ;;  %7207 = vmatpush3.bf16.msra.mxu1 %v8522_v47 }
 0x320   :  { %7186 = vmatprep.subr.bf16.mxu0 %v8523_v0  ;;  %7208 = vmatprep.subr.bf16.mxu1 %v8524_v1 }
 0x323   :  { %7187 = vmatpush3.bf16.msra.mxu0 %v8525_v2  ;;  %7209 = vmatpush3.bf16.msra.mxu1 %v8526_v3 }
 0x324   :  { %7188 = vmatprep.subr.bf16.mxu0 %v8527_v4  ;;  %7210 = vmatprep.subr.bf16.mxu1 %v8528_v57 }
 0x327   :  { %7189 = vmatpush3.bf16.msra.mxu0 %v8529_v6  ;;  %7211 = vmatpush3.bf16.msra.mxu1 %v8530_v55 }
 0x328   :  { %7190 = vmatprep.subr.bf16.mxu0 %v8531_v8  ;;  %7212 = vmatprep.subr.bf16.mxu1 %v8532_v10 }
 0x32b   :  { %7191 = vmatpush3.bf16.msra.mxu0 %v8533_v11  ;;  %7213 = vmatpush3.bf16.msra.mxu1 %v8534_v12 }
 0x32c   :  { %7192 = vmatprep.subr.bf16.mxu0 %v8535_v14  ;;  %7214 = vmatprep.subr.bf16.mxu1 %v8536_v62 }
 0x32f   :  { %7193 = vmatpush3.bf16.msra.mxu0 %v8537_v15  ;;  %7215 = vmatpush3.bf16.msra.mxu1 %v8538_v16 }
 0x3e5   :  { %v5451_v9 = vpop.f32.mrb[0].mxu0  ;;  %v5984_v26 = vpop.f32.mrb[0].mxu1 }
 0x3e6   :  { %v7222_v27 = vadd.f32 %v5451_v9, %v984_v5  ;;  %v7224_v29 = vadd.f32 %v5984_v26, %v992_v22  ;;  %v5453_v13 = vpop.f32.mrb[1].mxu0  ;;  %v5986_v30 = vpop.f32.mrb[1].mxu1 }
 0x3e7   :  { %v7223_v31 = vadd.f32 %v5453_v13, %v988_v49  ;;  %v7225_v33 = vadd.f32 %v5986_v30, %v996_v23  ;;  %v5455_v20 = vpop.f32.mrb[2].mxu0  ;;  %v5988_v25 = vpop.f32.mrb[2].mxu1 }
 0x3e8   :  { %v5991_v34 = vmax.f32 %v7222_v27, 0.0  ;;  %v5993_v35 = vmax.f32 %v7224_v29, 0.0  ;;  %v5456_v36 = vpop.f32.mrb[3].mxu0  ;;  %v5989_v37 = vpop.f32.mrb[3].mxu1 }
 0x3e9   :  { %v5992_v38 = vmax.f32 %v7223_v31, 0.0  ;;  %v5994_v43 = vmax.f32 %v7225_v33, 0.0 }
 0x3ea   :  { %v5995_v41 = vpack.c.bf16 %v5991_v34, %v5991_v34  ;;  %v5997_v24 = vpack.c.bf16 %v5993_v35, %v5993_v35 }
 0x3eb   :  { %v5996_v28 = vpack.c.bf16 %v5992_v38, %v5992_v38  ;;  %v5998_v40 = vpack.c.bf16 %v5994_v43, %v5994_v43 }
 0x3ed   :  { %6294 = vmatprep.mubr.bf16.mxu0 %v5996_v28  ;;  %6334 = vmatprep.mubr.bf16.mxu1 %v5998_v40 }
 0x3ee   :  { %6295 = vmatmul.mubr.bf16.vlgmr.msra.gmra.mrb[4].mxu0 %v5995_v41  ;;  %6335 = vmatmul.mubr.bf16.vlgmr.msra.gmra.mrb[4].mxu1 %v5997_v24 }
 0x4c1   :  { %v7194_v44 = vpop.f32.mrb[4].mxu0  ;;  %v7216_v45 = vpop.f32.mrb[4].mxu1 }
 0x4c2   :  { %v7195_v48 = vpop.f32.mrb[5].mxu0  ;;  %v7217_v32 = vpop.f32.mrb[5].mxu1 }
 0x4c3   :  { %v7196_v50 = vadd.f32 %v7195_v48, %v7194_v44  ;;  %v7218_v51 = vadd.f32 %v7217_v32, %v7216_v45  ;;  %v7197_v52 = vpop.f32.mrb[6].mxu0  ;;  %v7219_v53 = vpop.f32.mrb[6].mxu1 }
 0x4c4   :  { %v7198_v54 = vpop.f32.mrb[7].mxu0  ;;  %v7220_v42 = vpop.f32.mrb[7].mxu1 }
 0x4c5   :  { %v6297_v56 = vadd.f32 %v7196_v50, %v7145_v46 }
 0x4c7   :  { %v6337_v39 = vadd.f32 %v7218_v51, %v6297_v56 }
 0x4c9   :  { %6343 = vst.msk [vmem:[#allocation2] sm:$0x3] %vm6342_vm1, %v6337_v39 }
 0x4ca   :  { %8550 = shalt.err (!%p8547_p4)
}
 0x4cb   :  { %s8551_s14 = scalar_lea.hbm %s11200_s5, 32 }
 0x4cc   :  { %p8552_p5 = scmp.ne.s32.totalorder %s11200_s5, %s8551_s14  ;;  %p8555_p6 = scmp.lt.u32.totalorder %s8551_s14, %s11200_s5 }
 0x4ce   :  { %p8557_p7 = pnand %p8555_p6, %p8552_p5 }
 0x4d0   :  { %8560 = shalt.err (!%p8557_p7)
}
 0x4d1   :  { %6353 = dma.vmem_to_hbm [thread:$0]  %s6351_s11, 32, %s11200_s5, [#allocation3]  }
 0x4d2   :  { %8561 = dma.done.wait [#allocation3], 32  }
 0x4d3   :  { %8562 = vsyncadd [#allocation3], 4294967264 }
 0x4d4   :  { %6357 = vsyncpa [#allocation3], 1 }

</bundles_post_ra>
